<compile_context>
chip_gen: v7x
topology: tpu7x:2x2x1
jax: 0.10.0
libtpu: 0.0.40
codegen_flags: <defaults>
</compile_context>

<pallas_src>
import functools

import jax
import jax.numpy as jnp
from jax.experimental import pallas as pl
from jax.experimental.pallas import tpu as pltpu


def _round_up(x, m):
    return (x + m - 1) // m * m


# ----------------------------------------------------------------------------
# Kernel 1: fused [3x3 conv (im2col) + channel concat + 1x1 fuser], row-tiled
# ----------------------------------------------------------------------------
def _conv_fuse_kernel(patches_ref, global_ref, wr_ref, br_ref,
                      wfg_ref, wfl_ref, bf_ref, o_ref):
    # local = relu(patches @ Wr + br)                   -> [TM, 256] f32
    local = jnp.dot(patches_ref[...], wr_ref[...],
                    preferred_element_type=jnp.float32)
    local = jnp.maximum(local + br_ref[...], 0.0)
    # fused = relu(global @ Wf_g + local @ Wf_l + bf)   -> [TM, 128]
    acc = jnp.dot(global_ref[...], wfg_ref[...],
                  preferred_element_type=jnp.float32)
    acc = acc + jnp.dot(local.astype(jnp.bfloat16), wfl_ref[...],
                        preferred_element_type=jnp.float32)
    acc = jnp.maximum(acc + bf_ref[...], 0.0)
    o_ref[...] = acc.astype(o_ref.dtype)


def conv_concat_fuse(patches, gfeat, wr, br, wfg, wfl, bf, *, tm):
    """patches: [M,32] bf16, gfeat: [M,256] bf16  ->  fused [M,128] bf16."""
    M, kp = patches.shape
    _, cg = gfeat.shape
    cl = wr.shape[1]          # 256 (local conv out channels)
    cf = wfg.shape[1]         # 128 (fused channels)
    assert M % tm == 0
    return pl.pallas_call(
        _conv_fuse_kernel,
        out_shape=jax.ShapeDtypeStruct((M, cf), jnp.bfloat16),
        grid=(M // tm,),
        in_specs=[
            pl.BlockSpec((tm, kp), lambda i: (i, 0)),   # im2col patches tile
            pl.BlockSpec((tm, cg), lambda i: (i, 0)),   # global feature tile
            pl.BlockSpec((kp, cl), lambda i: (0, 0)),   # conv weight (resident)
            pl.BlockSpec((1, cl), lambda i: (0, 0)),    # conv bias
            pl.BlockSpec((cg, cf), lambda i: (0, 0)),   # fuser W (global rows)
            pl.BlockSpec((cl, cf), lambda i: (0, 0)),   # fuser W (local rows)
            pl.BlockSpec((1, cf), lambda i: (0, 0)),    # fuser bias
        ],
        out_specs=pl.BlockSpec((tm, cf), lambda i: (i, 0)),
        compiler_params=pltpu.CompilerParams(dimension_semantics=("parallel",)),
    )(patches, gfeat, wr, br, wfg, wfl, bf)


# ----------------------------------------------------------------------------
# Kernel 2: fused [SE channel attention + recognizer 1x1 conv], per batch elem
# ----------------------------------------------------------------------------
def _attn_rec_kernel(x_ref, w1_ref, b1_ref, w2_ref, b2_ref,
                     wrec_ref, brec_ref, o_ref):
    x = x_ref[0]                                   # (HW, C) bf16
    xf = x.astype(jnp.float32)
    hw = x.shape[0]
    # Global average pool (sublane/XLU reduction; 1/HW is a compile-time const)
    pooled = jnp.sum(xf, axis=0, keepdims=True) * (1.0 / hw)      # (1, C) f32
    h = jnp.dot(pooled.astype(jnp.bfloat16), w1_ref[...],
                preferred_element_type=jnp.float32) + b1_ref[...]
    h = jnp.maximum(h, 0.0)
    a = jnp.dot(h.astype(jnp.bfloat16), w2_ref[...],
                preferred_element_type=jnp.float32) + b2_ref[...]
    a = jax.nn.sigmoid(a)                                         # (1, C) f32
    scaled = (xf * a).astype(jnp.bfloat16)                        # channel scale
    # Recognizer: 1x1 conv 128->128 + ReLU, fused here to avoid an HBM trip.
    rec = jnp.dot(scaled, wrec_ref[...],
                  preferred_element_type=jnp.float32) + brec_ref[...]
    o_ref[0] = jnp.maximum(rec, 0.0).astype(o_ref.dtype)


def attention_recognizer(x, w1, b1, w2, b2, wrec, brec):
    """x: [N, HW, C] bf16 -> [N, HW, C] f32 (attention + recognizer fused)."""
    # TODO(synk): tile HW with a two-pass GAP if HW*C grows toward v7x's VMEM cap.
    N, HW, C = x.shape
    return pl.pallas_call(
        _attn_rec_kernel,
        out_shape=jax.ShapeDtypeStruct((N, HW, C), jnp.float32),
        grid=(N,),
        in_specs=[
            pl.BlockSpec((1, HW, C), lambda n: (n, 0, 0)),
            pl.BlockSpec((C, C), lambda n: (0, 0)),
            pl.BlockSpec((1, C), lambda n: (0, 0)),
            pl.BlockSpec((C, C), lambda n: (0, 0)),
            pl.BlockSpec((1, C), lambda n: (0, 0)),
            pl.BlockSpec((C, C), lambda n: (0, 0)),
            pl.BlockSpec((1, C), lambda n: (0, 0)),
        ],
        out_specs=pl.BlockSpec((1, HW, C), lambda n: (n, 0, 0)),
        compiler_params=pltpu.CompilerParams(dimension_semantics=("parallel",)),
    )(x, w1, b1, w2, b2, wrec, brec)


# ----------------------------------------------------------------------------
# Kernel 3: recognizer only (used when use_attention=False), row-tiled
# ----------------------------------------------------------------------------
def _matmul_bias_relu_kernel(x_ref, w_ref, b_ref, o_ref):
    acc = jnp.dot(x_ref[...], w_ref[...], preferred_element_type=jnp.float32)
    o_ref[...] = jnp.maximum(acc + b_ref[...], 0.0).astype(o_ref.dtype)


def recognizer(x, w, b, *, tm):
    M, C = x.shape
    co = w.shape[1]
    assert M % tm == 0
    return pl.pallas_call(
        _matmul_bias_relu_kernel,
        out_shape=jax.ShapeDtypeStruct((M, co), jnp.float32),
        grid=(M // tm,),
        in_specs=[
            pl.BlockSpec((tm, C), lambda i: (i, 0)),
            pl.BlockSpec((C, co), lambda i: (0, 0)),
            pl.BlockSpec((1, co), lambda i: (0, 0)),
        ],
        out_specs=pl.BlockSpec((tm, co), lambda i: (i, 0)),
        compiler_params=pltpu.CompilerParams(dimension_semantics=("parallel",)),
    )(x, w, b)


# ----------------------------------------------------------------------------
# JAX glue (im2col, parameter init, full forward)
# ----------------------------------------------------------------------------
def im2col_3x3(x_nhwc):
    """x: [N,H,W,C] -> [N*H*W, 9*C] patches for a 3x3 conv with padding=1."""
    N, H, W, C = x_nhwc.shape
    xp = jnp.pad(x_nhwc, ((0, 0), (1, 1), (1, 1), (0, 0)))
    cols = [xp[:, dy:dy + H, dx:dx + W, :] for dy in range(3) for dx in range(3)]
    patches = jnp.concatenate(cols, axis=-1)      # [N,H,W,9*C], order (kh,kw,cin)
    return patches.reshape(N * H * W, 9 * C)


def init_params(key):
    ks = jax.random.split(key, 5)
    scale = 0.05
    return {
        # ResNetFeatureExtractor(3, 256): 3x3 conv, weight layout (kh, kw, cin, cout)
        "res_w": jax.random.normal(ks[0], (3, 3, 3, 256), jnp.float32) * scale,
        "res_b": jnp.zeros((256,), jnp.float32),
        # FeatureFuser(512): 1x1 conv 512 -> 128, weight layout (cin, cout)
        "fuse_w": jax.random.normal(ks[1], (512, 128), jnp.float32) * scale,
        "fuse_b": jnp.zeros((128,), jnp.float32),
        # ChannelAttention(128, 128)
        "att_w1": jax.random.normal(ks[2], (128, 128), jnp.float32) * scale,
        "att_b1": jnp.zeros((128,), jnp.float32),
        "att_w2": jax.random.normal(ks[3], (128, 128), jnp.float32) * scale,
        "att_b2": jnp.zeros((128,), jnp.float32),
        # Recognizer(128, 128): 1x1 conv 128 -> 128
        "rec_w": jax.random.normal(ks[4], (128, 128), jnp.float32) * scale,
        "rec_b": jnp.zeros((128,), jnp.float32),
    }


def model_forward(params, x, use_attention=True):
    """x: [N, 3 + 256, H, W] (NCHW, PyTorch convention). Returns [N, 128, H, W]."""
    N, Ctot, H, W = x.shape
    assert Ctot == 3 + 256, "input must carry 3 RGB channels + 256 global-feature channels"

    img = jnp.transpose(x[:, :3, :, :], (0, 2, 3, 1))           # [N, H, W, 3]
    gfeat = jnp.transpose(x[:, 3:, :, :], (0, 2, 3, 1))         # [N, H, W, 256]

    M = N * H * W
    tm = min(512, _round_up(M, 8))          # row tile (second-to-last dim, %8)
    m_pad = _round_up(M, tm)

    # im2col for the 3x3 conv; pad K 27 -> 32 and rows M -> m_pad (zeros).
    patches = im2col_3x3(img)                                   # [M, 27] f32
    patches = jnp.pad(patches, ((0, m_pad - M), (0, 5))).astype(jnp.bfloat16)
    gflat = jnp.pad(gfeat.reshape(M, 256),
                    ((0, m_pad - M), (0, 0))).astype(jnp.bfloat16)

    wr = jnp.pad(params["res_w"].reshape(27, 256),
                 ((0, 5), (0, 0))).astype(jnp.bfloat16)          # [32, 256]
    br = params["res_b"].reshape(1, 256).astype(jnp.float32)
    # torch.cat((global, local), dim=1): fuser rows 0:256 -> global, 256: -> local
    wfg = params["fuse_w"][:256].astype(jnp.bfloat16)
    wfl = params["fuse_w"][256:].astype(jnp.bfloat16)
    bf = params["fuse_b"].reshape(1, 128).astype(jnp.float32)

    # Stage 1: conv + concat + fuser, fully fused, row-tiled, bf16 in/out.
    fused = conv_concat_fuse(patches, gflat, wr, br, wfg, wfl, bf, tm=tm)

    rec_w = params["rec_w"].astype(jnp.bfloat16)
    rec_b = params["rec_b"].reshape(1, 128).astype(jnp.float32)

    if use_attention:
        fused3 = fused[:M].reshape(N, H * W, 128)
        out = attention_recognizer(
            fused3,
            params["att_w1"].astype(jnp.bfloat16),
            params["att_b1"].reshape(1, 128).astype(jnp.float32),
            params["att_w2"].astype(jnp.bfloat16),
            params["att_b2"].reshape(1, 128).astype(jnp.float32),
            rec_w, rec_b,
        )                                                        # [N, HW, 128] f32
        out = out.reshape(N, H, W, 128)
    else:
        out = recognizer(fused, rec_w, rec_b, tm=tm)             # [m_pad, 128] f32
        out = out[:M].reshape(N, H, W, 128)

    return jnp.transpose(out, (0, 3, 1, 2))                      # back to NCHW


if __name__ == "__main__":
    key = jax.random.PRNGKey(0)
    k_param, k_x = jax.random.split(key)

    params = init_params(k_param)

    # small shapes: batch=2, spatial=32x32; channels fixed by the module (3 + 256)
    # -> M = 2048 rows, tm = 512, a 4-step parallel grid for stage 1.
    x = jax.random.normal(k_x, (2, 259, 32, 32), jnp.float32)

    y = jax.jit(model_forward)(params, x)
    jax.block_until_ready(y)
    assert y.shape == (2, 128, 32, 32), y.shape
    assert bool(jnp.all(jnp.isfinite(y)))

    # also exercise the use_attention=False path (recognizer-only kernel)
    y2 = jax.jit(functools.partial(model_forward, use_attention=False))(params, x)
    jax.block_until_ready(y2)
    assert y2.shape == (2, 128, 32, 32), y2.shape

    print("KERNEL_OK")
</pallas_src>

<mosaic_0001>
module attributes {stable_mosaic.version = 11 : i64} {
  func.func @_conv_fuse_kernel(%arg0: i32, %arg1: memref<512x32xbf16, #tpu.memory_space<vmem>>, %arg2: memref<512x256xbf16, #tpu.memory_space<vmem>>, %arg3: memref<32x256xbf16, #tpu.memory_space<vmem>>, %arg4: memref<1x256xf32, #tpu.memory_space<vmem>>, %arg5: memref<256x128xbf16, #tpu.memory_space<vmem>>, %arg6: memref<256x128xbf16, #tpu.memory_space<vmem>>, %arg7: memref<1x128xf32, #tpu.memory_space<vmem>>, %arg8: memref<512x128xbf16, #tpu.memory_space<vmem>>) attributes {dimension_semantics = [#tpu.dimension_semantics<parallel>], iteration_bounds = array<i64: 4>, scalar_prefetch = 0 : i64, scratch_operands = 0 : i64, tpu.core_type = #tpu.core_type<tc>, window_params = [{transform_indices = @transform_0, window_bounds = array<i64: 512, 32>}, {transform_indices = @transform_1, window_bounds = array<i64: 512, 256>}, {pipeline_mode = #tpu.pipeline_mode<synchronous>, transform_indices = @transform_2, window_bounds = array<i64: 32, 256>}, {pipeline_mode = #tpu.pipeline_mode<synchronous>, transform_indices = @transform_3, window_bounds = array<i64: 1, 256>}, {pipeline_mode = #tpu.pipeline_mode<synchronous>, transform_indices = @transform_4, window_bounds = array<i64: 256, 128>}, {pipeline_mode = #tpu.pipeline_mode<synchronous>, transform_indices = @transform_5, window_bounds = array<i64: 256, 128>}, {pipeline_mode = #tpu.pipeline_mode<synchronous>, transform_indices = @transform_6, window_bounds = array<i64: 1, 128>}, {transform_indices = @transform_7, window_bounds = array<i64: 512, 128>}]} {
    %c0 = arith.constant 0 : index
    %c0_0 = arith.constant 0 : index
    %0 = vector.load %arg1[%c0, %c0_0] : memref<512x32xbf16, #tpu.memory_space<vmem>>, vector<512x32xbf16>
    %c0_1 = arith.constant 0 : index
    %c0_2 = arith.constant 0 : index
    %1 = vector.load %arg3[%c0_1, %c0_2] : memref<32x256xbf16, #tpu.memory_space<vmem>>, vector<32x256xbf16>
    %cst = arith.constant dense<0.000000e+00> : vector<512x256xf32>
    %2 = tpu.matmul %0, %1, %cst {dimension_numbers = #tpu.dot_dimension_numbers<[1], [0], [0], [1], [0, 0, 1, 1], [], []>} : vector<512x32xbf16>, vector<32x256xbf16>, vector<512x256xf32> -> vector<512x256xf32>
    %c0_3 = arith.constant 0 : index
    %c0_4 = arith.constant 0 : index
    %3 = vector.load %arg4[%c0_3, %c0_4] : memref<1x256xf32, #tpu.memory_space<vmem>>, vector<1x256xf32>
    %4 = vector.broadcast %3 : vector<1x256xf32> to vector<512x256xf32>
    %5 = arith.addf %2, %4 : vector<512x256xf32>
    %cst_5 = arith.constant 0.000000e+00 : f32
    %6 = vector.broadcast %cst_5 : f32 to vector<512x256xf32>
    %7 = arith.maximumf %5, %6 : vector<512x256xf32>
    %c0_6 = arith.constant 0 : index
    %c0_7 = arith.constant 0 : index
    %8 = vector.load %arg2[%c0_6, %c0_7] : memref<512x256xbf16, #tpu.memory_space<vmem>>, vector<512x256xbf16>
    %c0_8 = arith.constant 0 : index
    %c0_9 = arith.constant 0 : index
    %9 = vector.load %arg5[%c0_8, %c0_9] : memref<256x128xbf16, #tpu.memory_space<vmem>>, vector<256x128xbf16>
    %cst_10 = arith.constant dense<0.000000e+00> : vector<512x128xf32>
    %10 = tpu.matmul %8, %9, %cst_10 {dimension_numbers = #tpu.dot_dimension_numbers<[1], [0], [0], [1], [0, 0, 1, 1], [], []>} : vector<512x256xbf16>, vector<256x128xbf16>, vector<512x128xf32> -> vector<512x128xf32>
    %11 = arith.truncf %7 : vector<512x256xf32> to vector<512x256xbf16>
    %c0_11 = arith.constant 0 : index
    %c0_12 = arith.constant 0 : index
    %12 = vector.load %arg6[%c0_11, %c0_12] : memref<256x128xbf16, #tpu.memory_space<vmem>>, vector<256x128xbf16>
    %cst_13 = arith.constant dense<0.000000e+00> : vector<512x128xf32>
    %13 = tpu.matmul %11, %12, %cst_13 {dimension_numbers = #tpu.dot_dimension_numbers<[1], [0], [0], [1], [0, 0, 1, 1], [], []>} : vector<512x256xbf16>, vector<256x128xbf16>, vector<512x128xf32> -> vector<512x128xf32>
    %14 = arith.addf %10, %13 : vector<512x128xf32>
    %c0_14 = arith.constant 0 : index
    %c0_15 = arith.constant 0 : index
    %15 = vector.load %arg7[%c0_14, %c0_15] : memref<1x128xf32, #tpu.memory_space<vmem>>, vector<1x128xf32>
    %16 = vector.broadcast %15 : vector<1x128xf32> to vector<512x128xf32>
    %17 = arith.addf %14, %16 : vector<512x128xf32>
    %cst_16 = arith.constant 0.000000e+00 : f32
    %18 = vector.broadcast %cst_16 : f32 to vector<512x128xf32>
    %19 = arith.maximumf %17, %18 : vector<512x128xf32>
    %20 = arith.truncf %19 : vector<512x128xf32> to vector<512x128xbf16>
    %c0_17 = arith.constant 0 : index
    %c0_18 = arith.constant 0 : index
    %21 = vector.load %arg8[%c0_17, %c0_18] : memref<512x128xbf16, #tpu.memory_space<vmem>>, vector<512x128xbf16>
    tpu.vector_store %arg8[%c0_17, %c0_18], %20 {strides = array<i32>} : memref<512x128xbf16, #tpu.memory_space<vmem>>, vector<512x128xbf16>,
    return
  }
  func.func @transform_0(%arg0: i32) -> (i32, i32) {
    %c0_i32 = arith.constant 0 : i32
    %c0_i32_0 = arith.constant 0 : i32
    return %arg0, %c0_i32 : i32, i32
  }
  func.func @transform_1(%arg0: i32) -> (i32, i32) {
    %c0_i32 = arith.constant 0 : i32
    %c0_i32_0 = arith.constant 0 : i32
    return %arg0, %c0_i32 : i32, i32
  }
  func.func @transform_2(%arg0: i32) -> (i32, i32) {
    %c0_i32 = arith.constant 0 : i32
    %c0_i32_0 = arith.constant 0 : i32
    %c0_i32_1 = arith.constant 0 : i32
    return %c0_i32, %c0_i32_0 : i32, i32
  }
  func.func @transform_3(%arg0: i32) -> (i32, i32) {
    %c0_i32 = arith.constant 0 : i32
    %c0_i32_0 = arith.constant 0 : i32
    %c0_i32_1 = arith.constant 0 : i32
    return %c0_i32, %c0_i32_0 : i32, i32
  }
  func.func @transform_4(%arg0: i32) -> (i32, i32) {
    %c0_i32 = arith.constant 0 : i32
    %c0_i32_0 = arith.constant 0 : i32
    %c0_i32_1 = arith.constant 0 : i32
    return %c0_i32, %c0_i32_0 : i32, i32
  }
  func.func @transform_5(%arg0: i32) -> (i32, i32) {
    %c0_i32 = arith.constant 0 : i32
    %c0_i32_0 = arith.constant 0 : i32
    %c0_i32_1 = arith.constant 0 : i32
    return %c0_i32, %c0_i32_0 : i32, i32
  }
  func.func @transform_6(%arg0: i32) -> (i32, i32) {
    %c0_i32 = arith.constant 0 : i32
    %c0_i32_0 = arith.constant 0 : i32
    %c0_i32_1 = arith.constant 0 : i32
    return %c0_i32, %c0_i32_0 : i32, i32
  }
  func.func @transform_7(%arg0: i32) -> (i32, i32) {
    %c0_i32 = arith.constant 0 : i32
    %c0_i32_0 = arith.constant 0 : i32
    return %arg0, %c0_i32 : i32, i32
  }
}

module attributes {stable_mosaic.version = 11 : i64} {
  func.func @_attn_rec_kernel(%arg0: i32, %arg1: memref<1x1024x128xbf16, #tpu.memory_space<vmem>>, %arg2: memref<128x128xbf16, #tpu.memory_space<vmem>>, %arg3: memref<1x128xf32, #tpu.memory_space<vmem>>, %arg4: memref<128x128xbf16, #tpu.memory_space<vmem>>, %arg5: memref<1x128xf32, #tpu.memory_space<vmem>>, %arg6: memref<128x128xbf16, #tpu.memory_space<vmem>>, %arg7: memref<1x128xf32, #tpu.memory_space<vmem>>, %arg8: memref<1x1024x128xf32, #tpu.memory_space<vmem>>) attributes {dimension_semantics = [#tpu.dimension_semantics<parallel>], iteration_bounds = array<i64: 2>, scalar_prefetch = 0 : i64, scratch_operands = 0 : i64, tpu.core_type = #tpu.core_type<tc>, window_params = [{transform_indices = @transform_0, window_bounds = array<i64: 1, 1024, 128>}, {pipeline_mode = #tpu.pipeline_mode<synchronous>, transform_indices = @transform_1, window_bounds = array<i64: 128, 128>}, {pipeline_mode = #tpu.pipeline_mode<synchronous>, transform_indices = @transform_2, window_bounds = array<i64: 1, 128>}, {pipeline_mode = #tpu.pipeline_mode<synchronous>, transform_indices = @transform_3, window_bounds = array<i64: 128, 128>}, {pipeline_mode = #tpu.pipeline_mode<synchronous>, transform_indices = @transform_4, window_bounds = array<i64: 1, 128>}, {pipeline_mode = #tpu.pipeline_mode<synchronous>, transform_indices = @transform_5, window_bounds = array<i64: 128, 128>}, {pipeline_mode = #tpu.pipeline_mode<synchronous>, transform_indices = @transform_6, window_bounds = array<i64: 1, 128>}, {transform_indices = @transform_7, window_bounds = array<i64: 1, 1024, 128>}]} {
    %c0 = arith.constant 0 : index
    %c0_0 = arith.constant 0 : index
    %c0_1 = arith.constant 0 : index
    %0 = vector.load %arg1[%c0, %c0_0, %c0_1] : memref<1x1024x128xbf16, #tpu.memory_space<vmem>>, vector<1x1024x128xbf16>
    %1 = vector.shape_cast %0 : vector<1x1024x128xbf16> to vector<1024x128xbf16>
    %2 = arith.extf %1 : vector<1024x128xbf16> to vector<1024x128xf32>
    %cst = arith.constant dense<0.000000e+00> : vector<128xf32>
    %3 = vector.multi_reduction <add>, %2, %cst [0] : vector<1024x128xf32> to vector<128xf32>
    %4 = vector.shape_cast %3 : vector<128xf32> to vector<1x128xf32>
    %cst_2 = arith.constant 9.765625E-4 : f32
    %5 = vector.broadcast %cst_2 : f32 to vector<1x128xf32>
    %6 = arith.mulf %4, %5 : vector<1x128xf32>
    %7 = arith.truncf %6 : vector<1x128xf32> to vector<1x128xbf16>
    %c0_3 = arith.constant 0 : index
    %c0_4 = arith.constant 0 : index
    %8 = vector.load %arg2[%c0_3, %c0_4] : memref<128x128xbf16, #tpu.memory_space<vmem>>, vector<128x128xbf16>
    %cst_5 = arith.constant dense<0.000000e+00> : vector<1x128xf32>
    %9 = tpu.matmul %7, %8, %cst_5 {dimension_numbers = #tpu.dot_dimension_numbers<[1], [0], [0], [1], [0, 0, 1, 1], [], []>} : vector<1x128xbf16>, vector<128x128xbf16>, vector<1x128xf32> -> vector<1x128xf32>
    %c0_6 = arith.constant 0 : index
    %c0_7 = arith.constant 0 : index
    %10 = vector.load %arg3[%c0_6, %c0_7] : memref<1x128xf32, #tpu.memory_space<vmem>>, vector<1x128xf32>
    %11 = arith.addf %9, %10 : vector<1x128xf32>
    %cst_8 = arith.constant 0.000000e+00 : f32
    %12 = vector.broadcast %cst_8 : f32 to vector<1x128xf32>
    %13 = arith.maximumf %11, %12 : vector<1x128xf32>
    %14 = arith.truncf %13 : vector<1x128xf32> to vector<1x128xbf16>
    %c0_9 = arith.constant 0 : index
    %c0_10 = arith.constant 0 : index
    %15 = vector.load %arg4[%c0_9, %c0_10] : memref<128x128xbf16, #tpu.memory_space<vmem>>, vector<128x128xbf16>
    %cst_11 = arith.constant dense<0.000000e+00> : vector<1x128xf32>
    %16 = tpu.matmul %14, %15, %cst_11 {dimension_numbers = #tpu.dot_dimension_numbers<[1], [0], [0], [1], [0, 0, 1, 1], [], []>} : vector<1x128xbf16>, vector<128x128xbf16>, vector<1x128xf32> -> vector<1x128xf32>
    %c0_12 = arith.constant 0 : index
    %c0_13 = arith.constant 0 : index
    %17 = vector.load %arg5[%c0_12, %c0_13] : memref<1x128xf32, #tpu.memory_space<vmem>>, vector<1x128xf32>
    %18 = arith.addf %16, %17 : vector<1x128xf32>
    %19 = arith.negf %18 : vector<1x128xf32>
    %20 = math.exp %19 : vector<1x128xf32>
    %cst_14 = arith.constant 1.000000e+00 : f32
    %21 = vector.broadcast %cst_14 : f32 to vector<1x128xf32>
    %22 = arith.addf %21, %20 : vector<1x128xf32>
    %23 = arith.divf %21, %22 : vector<1x128xf32>
    %24 = vector.broadcast %23 : vector<1x128xf32> to vector<1024x128xf32>
    %25 = arith.mulf %2, %24 : vector<1024x128xf32>
    %26 = arith.truncf %25 : vector<1024x128xf32> to vector<1024x128xbf16>
    %c0_15 = arith.constant 0 : index
    %c0_16 = arith.constant 0 : index
    %27 = vector.load %arg6[%c0_15, %c0_16] : memref<128x128xbf16, #tpu.memory_space<vmem>>, vector<128x128xbf16>
    %cst_17 = arith.constant dense<0.000000e+00> : vector<1024x128xf32>
    %28 = tpu.matmul %26, %27, %cst_17 {dimension_numbers = #tpu.dot_dimension_numbers<[1], [0], [0], [1], [0, 0, 1, 1], [], []>} : vector<1024x128xbf16>, vector<128x128xbf16>, vector<1024x128xf32> -> vector<1024x128xf32>
    %c0_18 = arith.constant 0 : index
    %c0_19 = arith.constant 0 : index
    %29 = vector.load %arg7[%c0_18, %c0_19] : memref<1x128xf32, #tpu.memory_space<vmem>>, vector<1x128xf32>
    %30 = vector.broadcast %29 : vector<1x128xf32> to vector<1024x128xf32>
    %31 = arith.addf %28, %30 : vector<1024x128xf32>
    %cst_20 = arith.constant 0.000000e+00 : f32
    %32 = vector.broadcast %cst_20 : f32 to vector<1024x128xf32>
    %33 = arith.maximumf %31, %32 : vector<1024x128xf32>
    %c0_21 = arith.constant 0 : index
    %c0_22 = arith.constant 0 : index
    %c0_23 = arith.constant 0 : index
    %34 = vector.load %arg8[%c0_21, %c0_22, %c0_23] : memref<1x1024x128xf32, #tpu.memory_space<vmem>>, vector<1x1024x128xf32>
    %35 = vector.shape_cast %34 : vector<1x1024x128xf32> to vector<1024x128xf32>
    %36 = vector.shape_cast %33 : vector<1024x128xf32> to vector<1x1024x128xf32>
    tpu.vector_store %arg8[%c0_21, %c0_22, %c0_23], %36 {strides = array<i32>} : memref<1x1024x128xf32, #tpu.memory_space<vmem>>, vector<1x1024x128xf32>,
    return
  }
  func.func @transform_0(%arg0: i32) -> (i32, i32, i32) {
    %c0_i32 = arith.constant 0 : i32
    %c0_i32_0 = arith.constant 0 : i32
    %c0_i32_1 = arith.constant 0 : i32
    return %arg0, %c0_i32, %c0_i32_0 : i32, i32, i32
  }
  func.func @transform_1(%arg0: i32) -> (i32, i32) {
    %c0_i32 = arith.constant 0 : i32
    %c0_i32_0 = arith.constant 0 : i32
    %c0_i32_1 = arith.constant 0 : i32
    return %c0_i32, %c0_i32_0 : i32, i32
  }
  func.func @transform_2(%arg0: i32) -> (i32, i32) {
    %c0_i32 = arith.constant 0 : i32
    %c0_i32_0 = arith.constant 0 : i32
    %c0_i32_1 = arith.constant 0 : i32
    return %c0_i32, %c0_i32_0 : i32, i32
  }
  func.func @transform_3(%arg0: i32) -> (i32, i32) {
    %c0_i32 = arith.constant 0 : i32
    %c0_i32_0 = arith.constant 0 : i32
    %c0_i32_1 = arith.constant 0 : i32
    return %c0_i32, %c0_i32_0 : i32, i32
  }
  func.func @transform_4(%arg0: i32) -> (i32, i32) {
    %c0_i32 = arith.constant 0 : i32
    %c0_i32_0 = arith.constant 0 : i32
    %c0_i32_1 = arith.constant 0 : i32
    return %c0_i32, %c0_i32_0 : i32, i32
  }
  func.func @transform_5(%arg0: i32) -> (i32, i32) {
    %c0_i32 = arith.constant 0 : i32
    %c0_i32_0 = arith.constant 0 : i32
    %c0_i32_1 = arith.constant 0 : i32
    return %c0_i32, %c0_i32_0 : i32, i32
  }
  func.func @transform_6(%arg0: i32) -> (i32, i32) {
    %c0_i32 = arith.constant 0 : i32
    %c0_i32_0 = arith.constant 0 : i32
    %c0_i32_1 = arith.constant 0 : i32
    return %c0_i32, %c0_i32_0 : i32, i32
  }
  func.func @transform_7(%arg0: i32) -> (i32, i32, i32) {
    %c0_i32 = arith.constant 0 : i32
    %c0_i32_0 = arith.constant 0 : i32
    %c0_i32_1 = arith.constant 0 : i32
    return %arg0, %c0_i32, %c0_i32_0 : i32, i32, i32
  }
}

</mosaic_0001>

<bundles_post_ra>
// kernel: model_forward.2
= control target key start
LH: loop header
LB: loop body
LE: loop exit
PB: predicated region body
PF: predicated region fallthrough
CT: control target
= control target key end

     0   :  { %s3678_s24 = smov 0   ;;  %s4536_s0 = inlined_call_operand.vmem [shape: bf16[2048,32], index: 0, kind: input, shape index: {}]   ;;  %s4537_s1 = inlined_call_operand.vmem [shape: bf16[2048,256], index: 1, kind: input, shape index: {}]   ;;  %s4538_s2 = inlined_call_operand.vmem [shape: bf16[32,256], index: 2, kind: input, shape index: {}]   ;;  %s4539_s3 = inlined_call_operand.vmem [shape: f32[1,256], index: 3, kind: input, shape index: {}]   ;;  %s4540_s4 = inlined_call_operand.vmem [shape: bf16[256,128], index: 4, kind: input, shape index: {}]   ;;  %s4541_s5 = inlined_call_operand.vmem [shape: bf16[256,128], index: 5, kind: input, shape index: {}]   ;;  %s4542_s6 = inlined_call_operand.vmem [shape: f32[1,128], index: 6, kind: input, shape index: {}]   ;;  %s4543_s7 = inlined_call_operand.vmem [shape: bf16[2048,128], index: 7, kind: output, shape index: {}]  }
   0x1 LB: > { %s2951_s25 = sadd.s32 4294967295, %s3635_s24   ;;  %p2955_p0 = scmp.ge.s32.totalorder %s3635_s24, 1  ;;  %s3635_s24 = sphi %s3678_s24, %s17_s24  }
   0x2   : > { %p250_p1 = scmp.lt.s32.totalorder %s3635_s24, 5 }
   0x4   : > { %p251_p2 = pnand %p2955_p0, %p250_p1 }
   0x5   : > { %v3463_v0 = vld [vmem:[%s4538_s2 + $0x4] ss:$8 sps:$4 sm:$0xff] (!%p251_p2)   ;;  %s2956_s28 = sshll.u32 (!%p251_p2), %s2951_s25, 6  ;;  %v3465_v1 = vld [vmem:[%s4538_s2] ss:$8 sps:$4 sm:$0xff] (!%p251_p2)   ;;  %v3637_v2 = vmov (!%p251_p2), 0  }
   0x6   : > { %254 = sbr.rel (%p251_p2) target bundleno = 710 (0x2c6), region = 48  ;;  %697 = vmatprep.mubr.bf16.mxu0 (!%p251_p2), %v3637_v2  ;;  %p289_p3 = scmp.lt.s32.totalorder (!%p251_p2), %s2956_s28, 255  ;;  %857 = vmatprep.mubr.bf16.mxu1 (!%p251_p2), %v3637_v2  ;;  %v3466_v3 = vld [vmem:[%s4538_s2 + $0x14] ss:$8 sps:$4 sm:$0xff] (!%p251_p2)   ;;  %v3468_v4 = vld [vmem:[%s4538_s2 + $0x10] ss:$8 sps:$4 sm:$0xff] (!%p251_p2)  }
   0x7   : > { %665 = vmatprep.subr.bf16.mxu0 (!%p251_p2), %v3463_v0  ;;  %3450 = vmatprep.subr.bf16.mxu1 (!%p251_p2), %v3463_v0  ;;  %v3483_v5 = vld [vmem:[%s4540_s4] sm:$0xff] (!%p251_p2)   ;;  %vm568_vm0 = vcmask (!%p251_p2), 261120   ;;  %v3487_v7 = vld [vmem:[%s4540_s4 + $0x8] sm:$0xff] (!%p251_p2)   ;;  %v3491_v14 = vld [vmem:[%s4540_s4 + $0x10] sm:$0xff] (!%p251_p2)  }
   0x8   : > { %666 = vmatpush1.bf16.msra.mxu0 (!%p251_p2), %v3465_v1  ;;  %3452 = vmatpush1.bf16.msra.mxu1 (!%p251_p2), %v3465_v1  ;;  %v3482_v9 = vld [vmem:[%s4541_s5] sm:$0xff] (!%p251_p2)   ;;  %v3486_v11 = vld [vmem:[%s4541_s5 + $0x8] sm:$0xff] (!%p251_p2)   ;;  %v3490_v15 = vld [vmem:[%s4541_s5 + $0x10] sm:$0xff] (!%p251_p2)  }
   0x9   : > { %667 = vmatprep.subr.bf16.mxu0 (!%p251_p2), %v3466_v3  ;;  %3451 = vmatprep.subr.bf16.mxu1 (!%p251_p2), %v3466_v3  ;;  %v3495_v17 = vld [vmem:[%s4540_s4 + $0x18] sm:$0xff] (!%p251_p2)   ;;  %v3499_v20 = vld [vmem:[%s4540_s4 + $0x20] sm:$0xff] (!%p251_p2)   ;;  %v3502_v22 = vld [vmem:[%s4540_s4 + $0x28] sm:$0xff] (!%p251_p2)  }
   0xa   : > { %v3494_v18 = vld [vmem:[%s4541_s5 + $0x18] sm:$0xff] (!%p251_p2)   ;;  %v3498_v21 = vld [vmem:[%s4541_s5 + $0x20] sm:$0xff] (!%p251_p2)   ;;  %v3501_v24 = vld [vmem:[%s4541_s5 + $0x28] sm:$0xff] (!%p251_p2)  }
   0xb   : > { %v3505_v25 = vld [vmem:[%s4540_s4 + $0x30] sm:$0xff] (!%p251_p2)   ;;  %v3508_v28 = vld [vmem:[%s4540_s4 + $0x38] sm:$0xff] (!%p251_p2)   ;;  %v3511_v31 = vld [vmem:[%s4540_s4 + $0x40] sm:$0xff] (!%p251_p2)  }
   0xc   : > { %668 = vmatpush1.bf16.msra.mxu0 (!%p251_p2), %v3468_v4  ;;  %3453 = vmatpush1.bf16.msra.mxu1 (!%p251_p2), %v3468_v4  ;;  %v3504_v27 = vld [vmem:[%s4541_s5 + $0x30] sm:$0xff] (!%p251_p2)   ;;  %v3507_v30 = vld [vmem:[%s4541_s5 + $0x38] sm:$0xff] (!%p251_p2)   ;;  %v3510_v33 = vld [vmem:[%s4541_s5 + $0x40] sm:$0xff] (!%p251_p2)  }
   0xd   : > { %s4545_s28 = smov (!%p289_p3, %s2956_s28), 255  ;;  %1434 = vmatprep.subr.bf16.mxu1 %v3637_v2  ;;  %2139 = vmatprep.subr.bf16.mxu0 %v3637_v2  ;;  %v3514_v34 = vld [vmem:[%s4540_s4 + $0x48] sm:$0xff]   ;;  %v3517_v37 = vld [vmem:[%s4540_s4 + $0x50] sm:$0xff]   ;;  %v3520_v40 = vld [vmem:[%s4540_s4 + $0x58] sm:$0xff]  }
   0xe   : > { %s2957_s12 = sshll.u32 %s4545_s28, 2  ;;  %v3513_v36 = vld [vmem:[%s4541_s5 + $0x48] sm:$0xff]   ;;  %v3516_v39 = vld [vmem:[%s4541_s5 + $0x50] sm:$0xff]   ;;  %v3519_v42 = vld [vmem:[%s4541_s5 + $0x58] sm:$0xff]   ;;  %s3194_s21 = sshll.u32 %s4545_s28, 3 }
   0xf   : > { %s3708_s15 = scalar_lea.vmem %s4536_s0, %s2957_s12  ;;  %v3523_v44 = vld [vmem:[%s4540_s4 + $0x60] sm:$0xff]   ;;  %v3526_v46 = vld [vmem:[%s4540_s4 + $0x68] sm:$0xff]   ;;  %v3529_v49 = vld [vmem:[%s4540_s4 + $0x70] sm:$0xff]   ;;  %s3904_s25 = scalar_lea.vmem %s4537_s1, %s3194_s21 }
  0x10   : > { %v3469_v6 = vld [vmem:[%s3708_s15] sm:$0xff]   ;;  %v3470_v8 = vld [vmem:[%s3708_s15 + $0x8] sm:$0xff]   ;;  %v3471_v12 = vld [vmem:[%s3708_s15 + $0x10] sm:$0xff]   ;;  %s4292_s11 = scalar_lea.vmem %s4543_s7, %s2957_s12 }
  0x11   : > { %2999 = vmatmul.mubr.msk.bf16.vlgmr.msra.gmra.mrb[0].mxu0 %vm568_vm0, %v3469_v6  ;;  %v3481_v10 = vld [vmem:[%s3708_s15 + $0x80] sm:$0xff]   ;;  %v3485_v13 = vld [vmem:[%s3708_s15 + $0x88] sm:$0xff]   ;;  %v3472_v16 = vld [vmem:[%s3708_s15 + $0x18] sm:$0xff]  }
  0x12   : > { %707 = vmatprep.mubr.bf16.mxu0 %v3637_v2  ;;  %2140 = vmatpush1.bf16.msra.mxu0 %v3483_v5  ;;  %v3489_v19 = vld [vmem:[%s3708_s15 + $0x90] sm:$0xff]   ;;  %v3473_v23 = vld [vmem:[%s3708_s15 + $0x20] sm:$0xff]   ;;  %v3493_v26 = vld [vmem:[%s3708_s15 + $0x98] sm:$0xff]  }
  0x13   : > { %2141 = vmatprep.subr.bf16.mxu0 %v3637_v2  ;;  %3015 = vmatmul.mubr.msk.bf16.vlgmr.msra.gmra.mrb[0].mxu1 %vm568_vm0, %v3481_v10  ;;  %v3474_v29 = vld [vmem:[%s3708_s15 + $0x28] sm:$0xff]   ;;  %v3497_v32 = vld [vmem:[%s3708_s15 + $0xa0] sm:$0xff]   ;;  %v3475_v35 = vld [vmem:[%s3708_s15 + $0x30] sm:$0xff]  }
  0x14   : > { %1435 = vmatpush1.bf16.msra.mxu1 %v3482_v9  ;;  %867 = vmatprep.mubr.bf16.mxu1 %v3637_v2  ;;  %v3500_v38 = vld [vmem:[%s3708_s15 + $0xa8] sm:$0xff]   ;;  %v3476_v41 = vld [vmem:[%s3708_s15 + $0x38] sm:$0xff]   ;;  %v3503_v43 = vld [vmem:[%s3708_s15 + $0xb0] sm:$0xff]  }
  0x15   : > { %1436 = vmatprep.subr.bf16.mxu1 %v3637_v2  ;;  %v3522_v45 = vld [vmem:[%s4541_s5 + $0x60] sm:$0xff]   ;;  %v3525_v48 = vld [vmem:[%s4541_s5 + $0x68] sm:$0xff]   ;;  %v3506_v50 = vld [vmem:[%s3708_s15 + $0xb8] sm:$0xff]  }
  0x16   : > { %2142 = vmatpush1.bf16.msra.mxu0 %v3487_v7  ;;  %v3477_v47 = vld [vmem:[%s3708_s15 + $0x40] sm:$0xff]   ;;  %v3528_v51 = vld [vmem:[%s4541_s5 + $0x70] sm:$0xff]   ;;  %v3478_v52 = vld [vmem:[%s3708_s15 + $0x48] sm:$0xff]  }
  0x17   : > { %2143 = vmatprep.subr.bf16.mxu0 %v3637_v2  ;;  %v3509_v53 = vld [vmem:[%s3708_s15 + $0xc0] sm:$0xff]   ;;  %v3479_v54 = vld [vmem:[%s3708_s15 + $0x50] sm:$0xff]   ;;  %v3512_v55 = vld [vmem:[%s3708_s15 + $0xc8] sm:$0xff]  }
  0x18   : > { %1437 = vmatpush1.bf16.msra.mxu1 %v3486_v11  ;;  %v3480_v56 = vld [vmem:[%s3708_s15 + $0x58] sm:$0xff]   ;;  %v3515_v58 = vld [vmem:[%s3708_s15 + $0xd0] sm:$0xff]   ;;  %v3484_v60 = vld [vmem:[%s3708_s15 + $0x60] sm:$0xff]  }
  0x19   : > { %3000 = vmatmul.mubr.msk.bf16.gmra.mrb[4].mxu0 %vm568_vm0, %v3470_v8  ;;  %1438 = vmatprep.subr.bf16.mxu1 %v3637_v2  ;;  %v3532_v57 = vld [vmem:[%s4540_s4 + $0x78] sm:$0xff]   ;;  %v3488_v62 = vld [vmem:[%s3708_s15 + $0x68] sm:$0xff]   ;;  %v3521_v63 = vld [vmem:[%s3708_s15 + $0xe0] sm:$0xff]  }
  0x1a   : > { %717 = vmatprep.mubr.bf16.mxu0 %v3637_v2  ;;  %2144 = vmatpush1.bf16.msra.mxu0 %v3491_v14  ;;  %v3531_v59 = vld [vmem:[%s4541_s5 + $0x78] sm:$0xff]   ;;  %v3492_v0 = vld [vmem:[%s3708_s15 + $0x70] sm:$0xff]   ;;  %v3524_v1 = vld [vmem:[%s3708_s15 + $0xe8] sm:$0xff]  }
  0x1b   : > { %3016 = vmatmul.mubr.msk.bf16.gmra.mrb[4].mxu1 %vm568_vm0, %v3485_v13  ;;  %2145 = vmatprep.subr.bf16.mxu0 %v3637_v2  ;;  %v3518_v61 = vld [vmem:[%s3708_s15 + $0xd8] sm:$0xff]   ;;  %v3535_v4 = vld [vmem:[%s3904_s25 + $0x4] ss:$8 sps:$4 sm:$0xff]   ;;  %v3527_v5 = vld [vmem:[%s3708_s15 + $0xf0] sm:$0xff]  }
  0x1c   : > { %877 = vmatprep.mubr.bf16.mxu1 %v3637_v2  ;;  %1439 = vmatpush1.bf16.msra.mxu1 %v3490_v15  ;;  %v3496_v3 = vld [vmem:[%s3708_s15 + $0x78] sm:$0xff]   ;;  %v3533_v6 = vld [vmem:[%s3904_s25] ss:$8 sps:$4 sm:$0xff]   ;;  %v3539_v10 = vld [vmem:[%s3904_s25 + $0x24] ss:$8 sps:$4 sm:$0xff]  }
  0x1d   : > { %1440 = vmatprep.subr.bf16.mxu1 %v3637_v2  ;;  %v3536_v7 = vld [vmem:[%s3904_s25 + $0x14] ss:$8 sps:$4 sm:$0xff]   ;;  %v3538_v9 = vld [vmem:[%s3904_s25 + $0x10] ss:$8 sps:$4 sm:$0xff]   ;;  %v3541_v11 = vld [vmem:[%s3904_s25 + $0x20] ss:$8 sps:$4 sm:$0xff]  }
  0x1e   : > { %2146 = vmatpush1.bf16.msra.mxu0 %v3495_v17  ;;  %v3530_v8 = vld [vmem:[%s3708_s15 + $0xf8] sm:$0xff]   ;;  %v3545_v13 = vld [vmem:[%s3904_s25 + $0x44] ss:$8 sps:$4 sm:$0xff]   ;;  %v3547_v14 = vld [vmem:[%s3904_s25 + $0x40] ss:$8 sps:$4 sm:$0xff]  }
  0x1f   : > { %2147 = vmatprep.subr.bf16.mxu0 %v3637_v2  ;;  %v3548_v15 = vld [vmem:[%s3904_s25 + $0x54] ss:$8 sps:$4 sm:$0xff]   ;;  %v3551_v17 = vld [vmem:[%s3904_s25 + $0x64] ss:$8 sps:$4 sm:$0xff]  }
  0x20   : > { %1441 = vmatpush1.bf16.msra.mxu1 %v3494_v18  ;;  %v3553_v18 = vld [vmem:[%s3904_s25 + $0x60] ss:$8 sps:$4 sm:$0xff]  }
  0x21   : > { %3001 = vmatmul.mubr.msk.bf16.gmra.mrb[8].mxu0 %vm568_vm0, %v3471_v12  ;;  %1442 = vmatprep.subr.bf16.mxu1 %v3637_v2  ;;  %v3542_v12 = vld [vmem:[%s3904_s25 + $0x34] ss:$8 sps:$4 sm:$0xff]  }
  0x22   : > { %727 = vmatprep.mubr.bf16.mxu0 %v3637_v2  ;;  %2148 = vmatpush1.bf16.msra.mxu0 %v3499_v20  ;;  %v3556_v20 = vld [vmem:[%s3904_s25 + $0x70] ss:$8 sps:$4 sm:$0xff]  }
  0x23   : > { %3017 = vmatmul.mubr.msk.bf16.gmra.mrb[8].mxu1 %vm568_vm0, %v3489_v19  ;;  %2149 = vmatprep.subr.bf16.mxu0 %v3637_v2  ;;  %v3554_v19 = vld [vmem:[%s3904_s25 + $0x74] ss:$8 sps:$4 sm:$0xff]  }
  0x24   : > { %887 = vmatprep.mubr.bf16.mxu1 %v3637_v2  ;;  %1443 = vmatpush1.bf16.msra.mxu1 %v3498_v21  ;;  %v3557_v21 = vld [vmem:[%s3904_s25 + $0x84] ss:$8 sps:$4 sm:$0xff]  }
  0x25   : > { %1444 = vmatprep.subr.bf16.mxu1 %v3637_v2 }
  0x26   : > { %2150 = vmatpush1.bf16.msra.mxu0 %v3502_v22  ;;  %v3559_v22 = vld [vmem:[%s3904_s25 + $0x80] ss:$8 sps:$4 sm:$0xff]  }
  0x27   : > { %2151 = vmatprep.subr.bf16.mxu0 %v3637_v2 }
  0x28   : > { %1445 = vmatpush1.bf16.msra.mxu1 %v3501_v24  ;;  %v378_v24 = vlaneseq }
  0x29   : > { %3002 = vmatmul.mubr.msk.bf16.gmra.mrb[12].mxu0 %vm568_vm0, %v3472_v16  ;;  %1446 = vmatprep.subr.bf16.mxu1 %v3637_v2  ;;  %v3550_v16 = vld [vmem:[%s3904_s25 + $0x50] ss:$8 sps:$4 sm:$0xff]  }
  0x2a   : > { %737 = vmatprep.mubr.bf16.mxu0 %v3637_v2  ;;  %2152 = vmatpush1.bf16.msra.mxu0 %v3505_v25  ;;  %v3562_v25 = vld [vmem:[%s3904_s25 + $0x90] ss:$8 sps:$4 sm:$0xff]  }
  0x2b   : > { %3018 = vmatmul.mubr.msk.bf16.gmra.mrb[12].mxu1 %vm568_vm0, %v3493_v26  ;;  %2153 = vmatprep.subr.bf16.mxu0 %v3637_v2  ;;  %v3563_v26 = vld [vmem:[%s3904_s25 + $0xa4] ss:$8 sps:$4 sm:$0xff]  }
  0x2c   : > { %897 = vmatprep.mubr.bf16.mxu1 %v3637_v2  ;;  %1447 = vmatpush1.bf16.msra.mxu1 %v3504_v27  ;;  %v379_v27 = vshrl.u32 %v378_v24, 7 }
  0x2d   : > { %1448 = vmatprep.subr.bf16.mxu1 %v3637_v2 }
  0x2e   : > { %2154 = vmatpush1.bf16.msra.mxu0 %v3508_v28  ;;  %v380_v28 = vsub.s32 0, %v379_v27 }
  0x2f   : > { %2155 = vmatprep.subr.bf16.mxu0 %v3637_v2 }
  0x30   : > { %1449 = vmatpush1.bf16.msra.mxu1 %v3507_v30  ;;  %v376_v30 = vld [vmem:[%s4539_s3] sm:$0x3] }
  0x31   : > { %3003 = vmatmul.mubr.msk.bf16.gmra.mrb[16].mxu0 %vm568_vm0, %v3473_v23  ;;  %1450 = vmatprep.subr.bf16.mxu1 %v3637_v2  ;;  %v3560_v23 = vld [vmem:[%s3904_s25 + $0x94] ss:$8 sps:$4 sm:$0xff]  }
  0x32   : > { %747 = vmatprep.mubr.bf16.mxu0 %v3637_v2  ;;  %2156 = vmatpush1.bf16.msra.mxu0 %v3511_v31  ;;  %v384_v31 = vsub.s32 1, %v379_v27 }
  0x33   : > { %3019 = vmatmul.mubr.msk.bf16.gmra.mrb[16].mxu1 %vm568_vm0, %v3497_v32  ;;  %2157 = vmatprep.subr.bf16.mxu0 %v3637_v2  ;;  %v3566_v32 = vld [vmem:[%s3904_s25 + $0xb4] ss:$8 sps:$4 sm:$0xff]  }
  0x34   : > { %907 = vmatprep.mubr.bf16.mxu1 %v3637_v2  ;;  %1451 = vmatpush1.bf16.msra.mxu1 %v3510_v33  ;;  %v3964_v33 = vrot.slane %v376_v30, %v380_v28 }
  0x35   : > { %1452 = vmatprep.subr.bf16.mxu1 %v3637_v2 }
  0x36   : > { %2158 = vmatpush1.bf16.msra.mxu0 %v3514_v34  ;;  %v3966_v34 = vrot.slane %v376_v30, %v384_v31 }
  0x37   : > { %2159 = vmatprep.subr.bf16.mxu0 %v3637_v2 }
  0x38   : > { %1453 = vmatpush1.bf16.msra.mxu1 %v3513_v36 }
  0x39   : > { %3004 = vmatmul.mubr.msk.bf16.gmra.mrb[20].mxu0 %vm568_vm0, %v3474_v29  ;;  %1454 = vmatprep.subr.bf16.mxu1 %v3637_v2  ;;  %v3565_v29 = vld [vmem:[%s3904_s25 + $0xa0] ss:$8 sps:$4 sm:$0xff]  }
  0x3a   : > { %757 = vmatprep.mubr.bf16.mxu0 %v3637_v2  ;;  %2160 = vmatpush1.bf16.msra.mxu0 %v3517_v37 }
  0x3b   : > { %3020 = vmatmul.mubr.msk.bf16.gmra.mrb[20].mxu1 %vm568_vm0, %v3500_v38  ;;  %2161 = vmatprep.subr.bf16.mxu0 %v3637_v2  ;;  %v3568_v38 = vld [vmem:[%s3904_s25 + $0xb0] ss:$8 sps:$4 sm:$0xff]  }
  0x3c   : > { %917 = vmatprep.mubr.bf16.mxu1 %v3637_v2  ;;  %1455 = vmatpush1.bf16.msra.mxu1 %v3516_v39 }
  0x3d   : > { %1456 = vmatprep.subr.bf16.mxu1 %v3637_v2 }
  0x3e   : > { %2162 = vmatpush1.bf16.msra.mxu0 %v3520_v40 }
  0x3f   : > { %2163 = vmatprep.subr.bf16.mxu0 %v3637_v2 }
  0x40   : > { %1457 = vmatpush1.bf16.msra.mxu1 %v3519_v42 }
  0x41   : > { %3005 = vmatmul.mubr.msk.bf16.gmra.mrb[24].mxu0 %vm568_vm0, %v3475_v35  ;;  %1458 = vmatprep.subr.bf16.mxu1 %v3637_v2 }
  0x42   : > { %767 = vmatprep.mubr.bf16.mxu0 %v3637_v2  ;;  %2164 = vmatpush1.bf16.msra.mxu0 %v3523_v44 }
  0x43   : > { %3021 = vmatmul.mubr.msk.bf16.gmra.mrb[24].mxu1 %vm568_vm0, %v3503_v43  ;;  %2165 = vmatprep.subr.bf16.mxu0 %v3637_v2 }
  0x44   : > { %927 = vmatprep.mubr.bf16.mxu1 %v3637_v2  ;;  %1459 = vmatpush1.bf16.msra.mxu1 %v3522_v45 }
  0x45   : > { %1460 = vmatprep.subr.bf16.mxu1 %v3637_v2 }
  0x46   : > { %2166 = vmatpush1.bf16.msra.mxu0 %v3526_v46 }
  0x47   : > { %2167 = vmatprep.subr.bf16.mxu0 %v3637_v2 }
  0x48   : > { %1461 = vmatpush1.bf16.msra.mxu1 %v3525_v48 }
  0x49   : > { %3006 = vmatmul.mubr.msk.bf16.gmra.mrb[28].mxu0 %vm568_vm0, %v3476_v41  ;;  %1462 = vmatprep.subr.bf16.mxu1 %v3637_v2  ;;  %v3569_v41 = vld [vmem:[%s3904_s25 + $0xc4] ss:$8 sps:$4 sm:$0xff]  }
  0x4a   : > { %777 = vmatprep.mubr.bf16.mxu0 %v3637_v2  ;;  %2168 = vmatpush1.bf16.msra.mxu0 %v3529_v49 }
  0x4b   : > { %3022 = vmatmul.mubr.msk.bf16.gmra.mrb[28].mxu1 %vm568_vm0, %v3506_v50  ;;  %2169 = vmatprep.subr.bf16.mxu0 %v3637_v2 }
  0x4c   : > { %937 = vmatprep.mubr.bf16.mxu1 %v3637_v2  ;;  %1463 = vmatpush1.bf16.msra.mxu1 %v3528_v51 }
  0x4d   : > { %1464 = vmatprep.subr.bf16.mxu1 %v3637_v2 }
  0x4e   : > { %2170 = vmatpush1.bf16.msra.mxu0 %v3532_v57  ;;  %v3572_v57 = vld [vmem:[%s3904_s25 + $0xd4] ss:$8 sps:$4 sm:$0xff]  }
  0x50   : > { %1465 = vmatpush1.bf16.msra.mxu1 %v3531_v59 }
  0x51   : > { %3007 = vmatmul.mubr.msk.bf16.gmra.mrb[32].mxu0 %vm568_vm0, %v3477_v47 }
  0x52   : > { %787 = vmatprep.mubr.bf16.mxu0 %v3637_v2 }
  0x53   : > { %3023 = vmatmul.mubr.msk.bf16.gmra.mrb[32].mxu1 %vm568_vm0, %v3509_v53 }
  0x54   : > { %947 = vmatprep.mubr.bf16.mxu1 %v3637_v2 }
  0x59   : > { %3008 = vmatmul.mubr.msk.bf16.gmra.mrb[36].mxu0 %vm568_vm0, %v3478_v52 }
  0x5a   : > { %797 = vmatprep.mubr.bf16.mxu0 %v3637_v2 }
  0x5b   : > { %3024 = vmatmul.mubr.msk.bf16.gmra.mrb[36].mxu1 %vm568_vm0, %v3512_v55 }
  0x5c   : > { %957 = vmatprep.mubr.bf16.mxu1 %v3637_v2 }
  0x61   : > { %3009 = vmatmul.mubr.msk.bf16.gmra.mrb[40].mxu0 %vm568_vm0, %v3479_v54  ;;  %v3571_v54 = vld [vmem:[%s3904_s25 + $0xc0] ss:$8 sps:$4 sm:$0xff]  }
  0x62   : > { %807 = vmatprep.mubr.bf16.mxu0 %v3637_v2 }
  0x63   : > { %3025 = vmatmul.mubr.msk.bf16.gmra.mrb[40].mxu1 %vm568_vm0, %v3515_v58 }
  0x64   : > { %967 = vmatprep.mubr.bf16.mxu1 %v3637_v2 }
  0x69   : > { %3010 = vmatmul.mubr.msk.bf16.gmra.mrb[44].mxu0 %vm568_vm0, %v3480_v56 }
  0x6a   : > { %817 = vmatprep.mubr.bf16.mxu0 %v3637_v2 }
  0x6b   : > { %3026 = vmatmul.mubr.msk.bf16.gmra.mrb[44].mxu1 %vm568_vm0, %v3518_v61 }
  0x6c   : > { %977 = vmatprep.mubr.bf16.mxu1 %v3637_v2 }
  0x71   : > { %3011 = vmatmul.mubr.msk.bf16.gmra.mrb[48].mxu0 %vm568_vm0, %v3484_v60 }
  0x72   : > { %827 = vmatprep.mubr.bf16.mxu0 %v3637_v2 }
  0x73   : > { %3027 = vmatmul.mubr.msk.bf16.gmra.mrb[48].mxu1 %vm568_vm0, %v3521_v63 }
  0x74   : > { %987 = vmatprep.mubr.bf16.mxu1 %v3637_v2 }
  0x79   : > { %3012 = vmatmul.mubr.msk.bf16.gmra.mrb[52].mxu0 %vm568_vm0, %v3488_v62 }
  0x7a   : > { %837 = vmatprep.mubr.bf16.mxu0 %v3637_v2 }
  0x7b   : > { %3028 = vmatmul.mubr.msk.bf16.gmra.mrb[52].mxu1 %vm568_vm0, %v3524_v1 }
  0x7c   : > { %997 = vmatprep.mubr.bf16.mxu1 %v3637_v2 }
  0x81   : > { %3013 = vmatmul.mubr.msk.bf16.gmra.mrb[56].mxu0 %vm568_vm0, %v3492_v0 }
  0x82   : > { %847 = vmatprep.mubr.bf16.mxu0 %v3637_v2 }
  0x83   : > { %3029 = vmatmul.mubr.msk.bf16.gmra.mrb[56].mxu1 %vm568_vm0, %v3527_v5 }
  0x84   : > { %1007 = vmatprep.mubr.bf16.mxu1 %v3637_v2  ;;  %v3544_v2 = vld [vmem:[%s3904_s25 + $0x30] ss:$8 sps:$4 sm:$0xff]  }
  0x89   : > { %3014 = vmatmul.mubr.msk.bf16.gmra.mrb[60].mxu0 %vm568_vm0, %v3496_v3 }
  0x8a   : > { %2171 = vmatprep.mubr.bf16.mxu0 %v3535_v4 }
  0x8b   : > { %3030 = vmatmul.mubr.msk.bf16.gmra.mrb[60].mxu1 %vm568_vm0, %v3530_v8 }
  0x91   : > { %2172 = vmatmul.mubr.bf16.vlgmr.msra.gmra.mrb[64].mxu0 %v3533_v6 }
  0x92   : > { %2179 = vmatprep.mubr.bf16.mxu0 %v3536_v7 }
  0x99   : > { %2180 = vmatmul.mubr.bf16.gmra.mrb[68].mxu0 %v3538_v9 }
  0x9a   : > { %2187 = vmatprep.mubr.bf16.mxu0 %v3539_v10 }
  0xa1   : > { %2188 = vmatmul.mubr.bf16.gmra.mrb[72].mxu0 %v3541_v11 }
  0xa2   : > { %2195 = vmatprep.mubr.bf16.mxu0 %v3542_v12 }
  0xa9   : > { %2196 = vmatmul.mubr.bf16.gmra.mrb[76].mxu0 %v3544_v2 }
  0xaa   : > { %2203 = vmatprep.mubr.bf16.mxu0 %v3545_v13 }
  0xb1   : > { %2204 = vmatmul.mubr.bf16.gmra.mrb[80].mxu0 %v3547_v14 }
  0xb2   : > { %2211 = vmatprep.mubr.bf16.mxu0 %v3548_v15 }
  0xb9   : > { %2212 = vmatmul.mubr.bf16.gmra.mrb[84].mxu0 %v3550_v16 }
  0xba   : > { %2219 = vmatprep.mubr.bf16.mxu0 %v3551_v17 }
  0xc1   : > { %2220 = vmatmul.mubr.bf16.gmra.mrb[88].mxu0 %v3553_v18  ;;  %v3574_v18 = vld [vmem:[%s3904_s25 + $0xd0] ss:$8 sps:$4 sm:$0xff]  }
  0xc2   : > { %2227 = vmatprep.mubr.bf16.mxu0 %v3554_v19 }
  0xc9   : > { %2228 = vmatmul.mubr.bf16.gmra.mrb[92].mxu0 %v3556_v20 }
  0xca   : > { %2235 = vmatprep.mubr.bf16.mxu0 %v3557_v21 }
  0xd1   : > { %2236 = vmatmul.mubr.bf16.gmra.mrb[96].mxu0 %v3559_v22  ;;  %v3575_v22 = vld [vmem:[%s3904_s25 + $0xe4] ss:$8 sps:$4 sm:$0xff]  }
  0xd2   : > { %2243 = vmatprep.mubr.bf16.mxu0 %v3560_v23 }
  0xd9   : > { %2244 = vmatmul.mubr.bf16.gmra.mrb[100].mxu0 %v3562_v25 }
  0xda   : > { %2251 = vmatprep.mubr.bf16.mxu0 %v3563_v26 }
  0xe1   : > { %2252 = vmatmul.mubr.bf16.gmra.mrb[104].mxu0 %v3565_v29 }
  0xe2   : > { %2259 = vmatprep.mubr.bf16.mxu0 %v3566_v32 }
  0xe4   : > { %v699_v35 = vpop.f32.mrb[0].mxu0 }
  0xe5   : > { %v700_v36 = vadd.f32 %v699_v35, %v3964_v33  ;;  %v701_v37 = vpop.f32.mrb[1].mxu0 }
  0xe6   : > { %v702_v39 = vadd.f32 %v701_v37, %v3966_v34  ;;  %v703_v40 = vpop.f32.mrb[2].mxu0  ;;  %v859_v60 = vpop.f32.mrb[0].mxu1 }
  0xe7   : > { %v704_v42 = vadd.f32 %v703_v40, %v3964_v33  ;;  %v705_v43 = vpop.f32.mrb[3].mxu0  ;;  %v1018_v45 = vmax.f32 %v700_v36, 0.0  ;;  %v860_v62 = vadd.f32 %v859_v60, %v3964_v33  ;;  %v861_v63 = vpop.f32.mrb[1].mxu1 }
  0xe8   : > { %v706_v44 = vadd.f32 %v705_v43, %v3966_v34  ;;  %v1019_v47 = vmax.f32 %v702_v39, 0.0  ;;  %v862_v3 = vadd.f32 %v861_v63, %v3966_v34  ;;  %v863_v4 = vpop.f32.mrb[2].mxu1 }
  0xe9   : > { %v1020_v46 = vmax.f32 %v704_v42, 0.0  ;;  %2260 = vmatmul.mubr.bf16.gmra.mrb[108].mxu0 %v3568_v38  ;;  %v1082_v7 = vmax.f32 %v860_v62, 0.0  ;;  %v864_v8 = vadd.f32 %v863_v4, %v3964_v33  ;;  %v865_v9 = vpop.f32.mrb[3].mxu1 }
  0xea   : > { %v1021_v48 = vmax.f32 %v706_v44, 0.0  ;;  %2267 = vmatprep.mubr.bf16.mxu0 %v3569_v41  ;;  %v1083_v11 = vmax.f32 %v862_v3, 0.0  ;;  %v866_v12 = vadd.f32 %v865_v9, %v3966_v34 }
  0xeb   : > { %v1242_v49 = vpack.c.bf16 %v1020_v46, %v1018_v45  ;;  %v1084_v14 = vmax.f32 %v864_v8, 0.0 }
  0xec   : > { %v1243_v50 = vpack.c.bf16 %v1021_v48, %v1019_v47  ;;  %v709_v51 = vpop.f32.mrb[4].mxu0  ;;  %v1085_v17 = vmax.f32 %v866_v12, 0.0 }
  0xed   : > { %v710_v52 = vadd.f32 %v709_v51, %v3964_v33  ;;  %v711_v53 = vpop.f32.mrb[5].mxu0  ;;  %v3987_v21 = vpack.c.bf16 %v1084_v14, %v1082_v7 }
  0xee   : > { %v712_v55 = vadd.f32 %v711_v53, %v3966_v34  ;;  %v713_v56 = vpop.f32.mrb[6].mxu0  ;;  %1466 = vmatprep.mubr.bf16.mxu1 %v1243_v50  ;;  %v3991_v25 = vpack.c.bf16 %v1085_v17, %v1083_v11  ;;  %v869_v26 = vpop.f32.mrb[4].mxu1  ;;  %v3577_v50 = vld [vmem:[%s3904_s25 + $0xe0] ss:$8 sps:$4 sm:$0xff]  }
  0xef   : > { %v714_v58 = vadd.f32 %v713_v56, %v3964_v33  ;;  %v715_v59 = vpop.f32.mrb[7].mxu0  ;;  %1467 = vmatmul.mubr.bf16.vlgmr.msra.gmra.mrb[64].mxu1 %v1242_v49  ;;  %v1022_v0 = vmax.f32 %v710_v52, 0.0  ;;  %v870_v28 = vadd.f32 %v869_v26, %v3964_v33  ;;  %v871_v29 = vpop.f32.mrb[5].mxu1 }
  0xf0   : > { %v716_v61 = vadd.f32 %v715_v59, %v3966_v34  ;;  %v1023_v5 = vmax.f32 %v712_v55, 0.0  ;;  %v872_v32 = vadd.f32 %v871_v29, %v3966_v34  ;;  %v873_v35 = vpop.f32.mrb[6].mxu1 }
  0xf1   : > { %v1024_v1 = vmax.f32 %v714_v58, 0.0  ;;  %2268 = vmatmul.mubr.bf16.gmra.mrb[112].mxu0 %v3571_v54  ;;  %v1086_v38 = vmax.f32 %v870_v28, 0.0  ;;  %v874_v39 = vadd.f32 %v873_v35, %v3964_v33  ;;  %v875_v40 = vpop.f32.mrb[7].mxu1  ;;  %v3578_v54 = vld [vmem:[%s3904_s25 + $0xf4] ss:$8 sps:$4 sm:$0xff]  }
  0xf2   : > { %v1025_v6 = vmax.f32 %v716_v61, 0.0  ;;  %2275 = vmatprep.mubr.bf16.mxu0 %v3572_v57  ;;  %v1087_v42 = vmax.f32 %v872_v32, 0.0  ;;  %v876_v43 = vadd.f32 %v875_v40, %v3966_v34 }
  0xf3   : > { %v1244_v10 = vpack.c.bf16 %v1024_v1, %v1022_v0  ;;  %v1088_v46 = vmax.f32 %v874_v39, 0.0 }
  0xf4   : > { %v1245_v2 = vpack.c.bf16 %v1025_v6, %v1023_v5  ;;  %v719_v13 = vpop.f32.mrb[8].mxu0  ;;  %v1089_v49 = vmax.f32 %v876_v43, 0.0 }
  0xf5   : > { %v720_v15 = vadd.f32 %v719_v13, %v3964_v33  ;;  %v721_v16 = vpop.f32.mrb[9].mxu0  ;;  %v4001_v53 = vpack.c.bf16 %v1088_v46, %v1086_v38 }
  0xf6   : > { %v722_v19 = vadd.f32 %v721_v16, %v3966_v34  ;;  %v723_v20 = vpop.f32.mrb[10].mxu0  ;;  %1474 = vmatprep.mubr.bf16.mxu1 %v1245_v2  ;;  %v4005_v57 = vpack.c.bf16 %v1089_v49, %v1087_v42  ;;  %v879_v58 = vpop.f32.mrb[8].mxu1  ;;  %v3580_v16 = vld [vmem:[%s3904_s25 + $0xf0] ss:$8 sps:$4 sm:$0xff]  }
  0xf7   : > { %v724_v23 = vadd.f32 %v723_v20, %v3964_v33  ;;  %v725_v24 = vpop.f32.mrb[11].mxu0  ;;  %1475 = vmatmul.mubr.bf16.gmra.mrb[68].mxu1 %v1244_v10  ;;  %v1026_v30 = vmax.f32 %v720_v15, 0.0  ;;  %v880_v60 = vadd.f32 %v879_v58, %v3964_v33  ;;  %v881_v61 = vpop.f32.mrb[9].mxu1  ;;  %v3581_v20 = vld [vmem:[%s3904_s25 + $0x104] ss:$8 sps:$4 sm:$0xff]  }
  0xf8   : > { %v726_v27 = vadd.f32 %v725_v24, %v3966_v34  ;;  %v1027_v36 = vmax.f32 %v722_v19, 0.0  ;;  %v882_v0 = vadd.f32 %v881_v61, %v3966_v34  ;;  %v883_v1 = vpop.f32.mrb[10].mxu1 }
  0xf9   : > { %v1028_v31 = vmax.f32 %v724_v23, 0.0  ;;  %2276 = vmatmul.mubr.bf16.gmra.mrb[116].mxu0 %v3574_v18  ;;  %v1090_v5 = vmax.f32 %v880_v60, 0.0  ;;  %v884_v6 = vadd.f32 %v883_v1, %v3964_v33  ;;  %v885_v7 = vpop.f32.mrb[11].mxu1 }
  0xfa   : > { %v1029_v37 = vmax.f32 %v726_v27, 0.0  ;;  %2283 = vmatprep.mubr.bf16.mxu0 %v3575_v22  ;;  %v1091_v9 = vmax.f32 %v882_v0, 0.0  ;;  %v886_v10 = vadd.f32 %v885_v7, %v3966_v34 }
  0xfb   : > { %v1246_v41 = vpack.c.bf16 %v1028_v31, %v1026_v30  ;;  %v1092_v2 = vmax.f32 %v884_v6, 0.0 }
  0xfc   : > { %v1247_v44 = vpack.c.bf16 %v1029_v37, %v1027_v36  ;;  %v729_v45 = vpop.f32.mrb[12].mxu0  ;;  %v1093_v15 = vmax.f32 %v886_v10, 0.0 }
  0xfd   : > { %v730_v47 = vadd.f32 %v729_v45, %v3964_v33  ;;  %v731_v48 = vpop.f32.mrb[13].mxu0  ;;  %v4015_v19 = vpack.c.bf16 %v1092_v2, %v1090_v5 }
  0xfe   : > { %v732_v51 = vadd.f32 %v731_v48, %v3966_v34  ;;  %v733_v52 = vpop.f32.mrb[14].mxu0  ;;  %1482 = vmatprep.mubr.bf16.mxu1 %v1247_v44  ;;  %v4019_v24 = vpack.c.bf16 %v1093_v15, %v1091_v9  ;;  %v889_v26 = vpop.f32.mrb[12].mxu1 }
  0xff   : > { %v734_v55 = vadd.f32 %v733_v52, %v3964_v33  ;;  %v735_v56 = vpop.f32.mrb[15].mxu0  ;;  %1483 = vmatmul.mubr.bf16.gmra.mrb[72].mxu1 %v1246_v41  ;;  %v1030_v62 = vmax.f32 %v730_v47, 0.0  ;;  %v890_v28 = vadd.f32 %v889_v26, %v3964_v33  ;;  %v891_v29 = vpop.f32.mrb[13].mxu1  ;;  %v3587_v26 = vld [vmem:[%s3904_s25 + $0x124] ss:$8 sps:$4 sm:$0xff]  }
 0x100   : > { %v736_v59 = vadd.f32 %v735_v56, %v3966_v34  ;;  %v1031_v3 = vmax.f32 %v732_v51, 0.0  ;;  %v892_v32 = vadd.f32 %v891_v29, %v3966_v34  ;;  %v893_v35 = vpop.f32.mrb[14].mxu1 }
 0x101   : > { %v1032_v63 = vmax.f32 %v734_v55, 0.0  ;;  %2284 = vmatmul.mubr.bf16.gmra.mrb[120].mxu0 %v3577_v50  ;;  %v1094_v38 = vmax.f32 %v890_v28, 0.0  ;;  %v894_v39 = vadd.f32 %v893_v35, %v3964_v33  ;;  %v895_v40 = vpop.f32.mrb[15].mxu1  ;;  %v3583_v50 = vld [vmem:[%s3904_s25 + $0x100] ss:$8 sps:$4 sm:$0xff]  }
 0x102   : > { %v1033_v4 = vmax.f32 %v736_v59, 0.0  ;;  %2291 = vmatprep.mubr.bf16.mxu0 %v3578_v54  ;;  %v1095_v42 = vmax.f32 %v892_v32, 0.0  ;;  %v896_v43 = vadd.f32 %v895_v40, %v3966_v34  ;;  %v3584_v55 = vld [vmem:[%s3904_s25 + $0x114] ss:$8 sps:$4 sm:$0xff]  }
 0x103   : > { %v1248_v8 = vpack.c.bf16 %v1032_v63, %v1030_v62  ;;  %v1096_v46 = vmax.f32 %v894_v39, 0.0 }
 0x104   : > { %v1249_v11 = vpack.c.bf16 %v1033_v4, %v1031_v3  ;;  %v739_v12 = vpop.f32.mrb[16].mxu0  ;;  %v1097_v49 = vmax.f32 %v896_v43, 0.0 }
 0x105   : > { %v740_v13 = vadd.f32 %v739_v12, %v3964_v33  ;;  %v741_v14 = vpop.f32.mrb[17].mxu0  ;;  %v4029_v54 = vpack.c.bf16 %v1096_v46, %v1094_v38 }
 0x106   : > { %v742_v17 = vadd.f32 %v741_v14, %v3966_v34  ;;  %v743_v18 = vpop.f32.mrb[18].mxu0  ;;  %1490 = vmatprep.mubr.bf16.mxu1 %v1249_v11  ;;  %v4033_v59 = vpack.c.bf16 %v1097_v49, %v1095_v42  ;;  %v899_v60 = vpop.f32.mrb[16].mxu1 }
 0x107   : > { %v744_v22 = vadd.f32 %v743_v18, %v3964_v33  ;;  %v745_v23 = vpop.f32.mrb[19].mxu0  ;;  %1491 = vmatmul.mubr.bf16.gmra.mrb[76].mxu1 %v1248_v8  ;;  %v1034_v30 = vmax.f32 %v740_v13, 0.0  ;;  %v900_v62 = vadd.f32 %v899_v60, %v3964_v33  ;;  %v901_v63 = vpop.f32.mrb[17].mxu1  ;;  %v3586_v18 = vld [vmem:[%s3904_s25 + $0x110] ss:$8 sps:$4 sm:$0xff]  }
 0x108   : > { %v746_v27 = vadd.f32 %v745_v23, %v3966_v34  ;;  %v1035_v36 = vmax.f32 %v742_v17, 0.0  ;;  %v902_v3 = vadd.f32 %v901_v63, %v3966_v34  ;;  %v903_v4 = vpop.f32.mrb[18].mxu1 }
 0x109   : > { %v1036_v31 = vmax.f32 %v744_v22, 0.0  ;;  %2292 = vmatmul.mubr.bf16.gmra.mrb[124].mxu0 %v3580_v16  ;;  %v1098_v7 = vmax.f32 %v900_v62, 0.0  ;;  %v904_v8 = vadd.f32 %v903_v4, %v3964_v33  ;;  %v905_v9 = vpop.f32.mrb[19].mxu1  ;;  %v3590_v62 = vld [vmem:[%s3904_s25 + $0x134] ss:$8 sps:$4 sm:$0xff]  }
 0x10a   : > { %v1037_v37 = vmax.f32 %v746_v27, 0.0  ;;  %2299 = vmatprep.mubr.bf16.mxu0 %v3581_v20  ;;  %v1099_v11 = vmax.f32 %v902_v3, 0.0  ;;  %v906_v12 = vadd.f32 %v905_v9, %v3966_v34 }
 0x10b   : > { %v1250_v41 = vpack.c.bf16 %v1036_v31, %v1034_v30  ;;  %v1100_v14 = vmax.f32 %v904_v8, 0.0 }
 0x10c   : > { %v1251_v44 = vpack.c.bf16 %v1037_v37, %v1035_v36  ;;  %v749_v45 = vpop.f32.mrb[20].mxu0  ;;  %v1101_v17 = vmax.f32 %v906_v12, 0.0 }
 0x10d   : > { %v750_v47 = vadd.f32 %v749_v45, %v3964_v33  ;;  %v751_v48 = vpop.f32.mrb[21].mxu0  ;;  %v4043_v23 = vpack.c.bf16 %v1100_v14, %v1098_v7 }
 0x10e   : > { %v752_v51 = vadd.f32 %v751_v48, %v3966_v34  ;;  %v753_v52 = vpop.f32.mrb[22].mxu0  ;;  %1498 = vmatprep.mubr.bf16.mxu1 %v1251_v44  ;;  %v4047_v29 = vpack.c.bf16 %v1101_v17, %v1099_v11  ;;  %v909_v30 = vpop.f32.mrb[20].mxu1 }
 0x10f   : > { %v754_v56 = vadd.f32 %v753_v52, %v3964_v33  ;;  %v755_v58 = vpop.f32.mrb[23].mxu0  ;;  %1499 = vmatmul.mubr.bf16.gmra.mrb[80].mxu1 %v1250_v41  ;;  %v1038_v0 = vmax.f32 %v750_v47, 0.0  ;;  %v910_v32 = vadd.f32 %v909_v30, %v3964_v33  ;;  %v911_v35 = vpop.f32.mrb[21].mxu1  ;;  %v3592_v30 = vld [vmem:[%s3904_s25 + $0x130] ss:$8 sps:$4 sm:$0xff]  }
 0x110   : > { %v756_v61 = vadd.f32 %v755_v58, %v3966_v34  ;;  %v1039_v5 = vmax.f32 %v752_v51, 0.0  ;;  %v912_v38 = vadd.f32 %v911_v35, %v3966_v34  ;;  %v913_v39 = vpop.f32.mrb[22].mxu1 }
 0x111   : > { %v1040_v1 = vmax.f32 %v754_v56, 0.0  ;;  %2300 = vmatmul.mubr.bf16.gmra.mrb[128].mxu0 %v3583_v50  ;;  %v1102_v42 = vmax.f32 %v910_v32, 0.0  ;;  %v914_v43 = vadd.f32 %v913_v39, %v3964_v33  ;;  %v915_v44 = vpop.f32.mrb[23].mxu1  ;;  %v3589_v56 = vld [vmem:[%s3904_s25 + $0x120] ss:$8 sps:$4 sm:$0xff]  }
 0x112   : > { %v1041_v6 = vmax.f32 %v756_v61, 0.0  ;;  %2307 = vmatprep.mubr.bf16.mxu0 %v3584_v55  ;;  %v1103_v46 = vmax.f32 %v912_v38, 0.0  ;;  %v916_v47 = vadd.f32 %v915_v44, %v3966_v34 }
 0x113   : > { %v1252_v10 = vpack.c.bf16 %v1040_v1, %v1038_v0  ;;  %v1104_v50 = vmax.f32 %v914_v43, 0.0 }
 0x114   : > { %v1253_v2 = vpack.c.bf16 %v1041_v6, %v1039_v5  ;;  %v759_v13 = vpop.f32.mrb[24].mxu0  ;;  %v1105_v55 = vmax.f32 %v916_v47, 0.0 }
 0x115   : > { %v760_v15 = vadd.f32 %v759_v13, %v3964_v33  ;;  %v761_v16 = vpop.f32.mrb[25].mxu0  ;;  %v4057_v61 = vpack.c.bf16 %v1104_v50, %v1102_v42 }
 0x116   : > { %v762_v20 = vadd.f32 %v761_v16, %v3966_v34  ;;  %v763_v22 = vpop.f32.mrb[26].mxu0  ;;  %1506 = vmatprep.mubr.bf16.mxu1 %v1253_v2  ;;  %v4061_v1 = vpack.c.bf16 %v1105_v55, %v1103_v46  ;;  %v919_v3 = vpop.f32.mrb[24].mxu1 }
 0x117   : > { %v764_v27 = vadd.f32 %v763_v22, %v3964_v33  ;;  %v765_v28 = vpop.f32.mrb[27].mxu0  ;;  %1507 = vmatmul.mubr.bf16.gmra.mrb[84].mxu1 %v1252_v10  ;;  %v1042_v36 = vmax.f32 %v760_v15, 0.0  ;;  %v920_v5 = vadd.f32 %v919_v3, %v3964_v33  ;;  %v921_v6 = vpop.f32.mrb[25].mxu1 }
 0x118   : > { %v766_v31 = vadd.f32 %v765_v28, %v3966_v34  ;;  %v1043_v40 = vmax.f32 %v762_v20, 0.0  ;;  %v922_v9 = vadd.f32 %v921_v6, %v3966_v34  ;;  %v923_v10 = vpop.f32.mrb[26].mxu1 }
 0x119   : > { %v1044_v37 = vmax.f32 %v764_v27, 0.0  ;;  %2308 = vmatmul.mubr.bf16.gmra.mrb[132].mxu0 %v3586_v18  ;;  %v1106_v2 = vmax.f32 %v920_v5, 0.0  ;;  %v924_v13 = vadd.f32 %v923_v10, %v3964_v33  ;;  %v925_v14 = vpop.f32.mrb[27].mxu1  ;;  %v3595_v5 = vld [vmem:[%s3904_s25 + $0x140] ss:$8 sps:$4 sm:$0xff]  }
 0x11a   : > { %v1045_v41 = vmax.f32 %v766_v31, 0.0  ;;  %2315 = vmatprep.mubr.bf16.mxu0 %v3587_v26  ;;  %v1107_v16 = vmax.f32 %v922_v9, 0.0  ;;  %v926_v17 = vadd.f32 %v925_v14, %v3966_v34  ;;  %v3596_v9 = vld [vmem:[%s3904_s25 + $0x154] ss:$8 sps:$4 sm:$0xff]  }
 0x11b   : > { %v1254_v45 = vpack.c.bf16 %v1044_v37, %v1042_v36  ;;  %v1108_v22 = vmax.f32 %v924_v13, 0.0  ;;  %v3593_v36 = vld [vmem:[%s3904_s25 + $0x144] ss:$8 sps:$4 sm:$0xff]  }
 0x11c   : > { %v1255_v48 = vpack.c.bf16 %v1045_v41, %v1043_v40  ;;  %v769_v49 = vpop.f32.mrb[28].mxu0  ;;  %v1109_v28 = vmax.f32 %v926_v17, 0.0 }
 0x11d   : > { %v770_v51 = vadd.f32 %v769_v49, %v3964_v33  ;;  %v771_v52 = vpop.f32.mrb[29].mxu0  ;;  %v4071_v35 = vpack.c.bf16 %v1108_v22, %v1106_v2 }
 0x11e   : > { %v772_v58 = vadd.f32 %v771_v52, %v3966_v34  ;;  %v773_v60 = vpop.f32.mrb[30].mxu0  ;;  %1514 = vmatprep.mubr.bf16.mxu1 %v1255_v48  ;;  %v4075_v39 = vpack.c.bf16 %v1109_v28, %v1107_v16  ;;  %v929_v40 = vpop.f32.mrb[28].mxu1 }
 0x11f   : > { %v774_v63 = vadd.f32 %v773_v60, %v3964_v33  ;;  %v775_v0 = vpop.f32.mrb[31].mxu0  ;;  %1515 = vmatmul.mubr.bf16.gmra.mrb[88].mxu1 %v1254_v45  ;;  %v1046_v7 = vmax.f32 %v770_v51, 0.0  ;;  %v930_v42 = vadd.f32 %v929_v40, %v3964_v33  ;;  %v931_v43 = vpop.f32.mrb[29].mxu1 }
 0x120   : > { %v776_v4 = vadd.f32 %v775_v0, %v3966_v34  ;;  %v1047_v11 = vmax.f32 %v772_v58, 0.0  ;;  %v932_v46 = vadd.f32 %v931_v43, %v3966_v34  ;;  %v933_v47 = vpop.f32.mrb[30].mxu1 }
 0x121   : > { %v1048_v8 = vmax.f32 %v774_v63, 0.0  ;;  %2316 = vmatmul.mubr.bf16.gmra.mrb[136].mxu0 %v3589_v56  ;;  %v1110_v50 = vmax.f32 %v930_v42, 0.0  ;;  %v934_v51 = vadd.f32 %v933_v47, %v3964_v33  ;;  %v935_v52 = vpop.f32.mrb[31].mxu1 }
 0x122   : > { %v1049_v12 = vmax.f32 %v776_v4, 0.0  ;;  %2323 = vmatprep.mubr.bf16.mxu0 %v3590_v62  ;;  %v1111_v56 = vmax.f32 %v932_v46, 0.0  ;;  %v936_v58 = vadd.f32 %v935_v52, %v3966_v34 }
 0x123   : > { %v1256_v15 = vpack.c.bf16 %v1048_v8, %v1046_v7  ;;  %v1112_v63 = vmax.f32 %v934_v51, 0.0 }
 0x124   : > { %v1257_v18 = vpack.c.bf16 %v1049_v12, %v1047_v11  ;;  %v779_v20 = vpop.f32.mrb[32].mxu0  ;;  %v1113_v4 = vmax.f32 %v936_v58, 0.0 }
 0x125   : > { %v780_v26 = vadd.f32 %v779_v20, %v3964_v33  ;;  %v781_v27 = vpop.f32.mrb[33].mxu0  ;;  %v4085_v8 = vpack.c.bf16 %v1112_v63, %v1110_v50 }
 0x126   : > { %v782_v31 = vadd.f32 %v781_v27, %v3966_v34  ;;  %v783_v32 = vpop.f32.mrb[34].mxu0  ;;  %1522 = vmatprep.mubr.bf16.mxu1 %v1257_v18  ;;  %v4089_v12 = vpack.c.bf16 %v1113_v4, %v1111_v56  ;;  %v939_v2 = vpop.f32.mrb[32].mxu1 }
 0x127   : > { %v784_v37 = vadd.f32 %v783_v32, %v3964_v33  ;;  %v785_v38 = vpop.f32.mrb[35].mxu0  ;;  %1523 = vmatmul.mubr.bf16.gmra.mrb[92].mxu1 %v1256_v15  ;;  %v1050_v44 = vmax.f32 %v780_v26, 0.0  ;;  %v940_v14 = vadd.f32 %v939_v2, %v3964_v33  ;;  %v941_v15 = vpop.f32.mrb[33].mxu1 }
 0x128   : > { %v786_v41 = vadd.f32 %v785_v38, %v3966_v34  ;;  %v1051_v48 = vmax.f32 %v782_v31, 0.0  ;;  %v942_v18 = vadd.f32 %v941_v15, %v3966_v34  ;;  %v943_v20 = vpop.f32.mrb[34].mxu1 }
 0x129   : > { %v1052_v45 = vmax.f32 %v784_v37, 0.0  ;;  %2324 = vmatmul.mubr.bf16.gmra.mrb[140].mxu0 %v3592_v30  ;;  %v1114_v27 = vmax.f32 %v940_v14, 0.0  ;;  %v944_v28 = vadd.f32 %v943_v20, %v3964_v33  ;;  %v945_v30 = vpop.f32.mrb[35].mxu1 }
 0x12a   : > { %v1053_v49 = vmax.f32 %v786_v41, 0.0  ;;  %2331 = vmatprep.mubr.bf16.mxu0 %v3593_v36  ;;  %v1115_v32 = vmax.f32 %v942_v18, 0.0  ;;  %v946_v36 = vadd.f32 %v945_v30, %v3966_v34  ;;  %v3601_v18 = vld [vmem:[%s3904_s25 + $0x160] ss:$8 sps:$4 sm:$0xff]  }
 0x12b   : > { %v1258_v55 = vpack.c.bf16 %v1052_v45, %v1050_v44  ;;  %v1116_v40 = vmax.f32 %v944_v28, 0.0  ;;  %v3598_v44 = vld [vmem:[%s3904_s25 + $0x150] ss:$8 sps:$4 sm:$0xff]  }
 0x12c   : > { %v1259_v60 = vpack.c.bf16 %v1053_v49, %v1051_v48  ;;  %v789_v62 = vpop.f32.mrb[36].mxu0  ;;  %v1117_v43 = vmax.f32 %v946_v36, 0.0  ;;  %v3599_v48 = vld [vmem:[%s3904_s25 + $0x164] ss:$8 sps:$4 sm:$0xff]  }
 0x12d   : > { %v790_v0 = vadd.f32 %v789_v62, %v3964_v33  ;;  %v791_v3 = vpop.f32.mrb[37].mxu0  ;;  %v4099_v47 = vpack.c.bf16 %v1116_v40, %v1114_v27  ;;  %v3602_v27 = vld [vmem:[%s3904_s25 + $0x174] ss:$8 sps:$4 sm:$0xff]  }
 0x12e   : > { %v792_v6 = vadd.f32 %v791_v3, %v3966_v34  ;;  %v793_v7 = vpop.f32.mrb[38].mxu0  ;;  %1530 = vmatprep.mubr.bf16.mxu1 %v1259_v60  ;;  %v4103_v51 = vpack.c.bf16 %v1117_v43, %v1115_v32  ;;  %v949_v52 = vpop.f32.mrb[36].mxu1 }
 0x12f   : > { %v794_v10 = vadd.f32 %v793_v7, %v3964_v33  ;;  %v795_v11 = vpop.f32.mrb[39].mxu0  ;;  %1531 = vmatmul.mubr.bf16.gmra.mrb[96].mxu1 %v1258_v55  ;;  %v1054_v16 = vmax.f32 %v790_v0, 0.0  ;;  %v950_v56 = vadd.f32 %v949_v52, %v3964_v33  ;;  %v951_v58 = vpop.f32.mrb[37].mxu1 }
 0x130   : > { %v796_v13 = vadd.f32 %v795_v11, %v3966_v34  ;;  %v1055_v22 = vmax.f32 %v792_v6, 0.0  ;;  %v952_v63 = vadd.f32 %v951_v58, %v3966_v34  ;;  %v953_v0 = vpop.f32.mrb[38].mxu1 }
 0x131   : > { %v1056_v17 = vmax.f32 %v794_v10, 0.0  ;;  %2332 = vmatmul.mubr.bf16.gmra.mrb[144].mxu0 %v3595_v5  ;;  %v1118_v5 = vmax.f32 %v950_v56, 0.0  ;;  %v954_v6 = vadd.f32 %v953_v0, %v3964_v33  ;;  %v955_v7 = vpop.f32.mrb[39].mxu1 }
 0x132   : > { %v1057_v26 = vmax.f32 %v796_v13, 0.0  ;;  %2339 = vmatprep.mubr.bf16.mxu0 %v3596_v9  ;;  %v1119_v10 = vmax.f32 %v952_v63, 0.0  ;;  %v956_v11 = vadd.f32 %v955_v7, %v3966_v34  ;;  %v3605_v7 = vld [vmem:[%s3904_s25 + $0x184] ss:$8 sps:$4 sm:$0xff]  }
 0x133   : > { %v1260_v31 = vpack.c.bf16 %v1056_v17, %v1054_v16  ;;  %v1120_v14 = vmax.f32 %v954_v6, 0.0 }
 0x134   : > { %v1261_v37 = vpack.c.bf16 %v1057_v26, %v1055_v22  ;;  %v799_v38 = vpop.f32.mrb[40].mxu0  ;;  %v1121_v17 = vmax.f32 %v956_v11, 0.0 }
 0x135   : > { %v800_v41 = vadd.f32 %v799_v38, %v3964_v33  ;;  %v801_v42 = vpop.f32.mrb[41].mxu0  ;;  %v4113_v26 = vpack.c.bf16 %v1120_v14, %v1118_v5 }
 0x136   : > { %v802_v45 = vadd.f32 %v801_v42, %v3966_v34  ;;  %v803_v46 = vpop.f32.mrb[42].mxu0  ;;  %1538 = vmatprep.mubr.bf16.mxu1 %v1261_v37  ;;  %v959_v32 = vpop.f32.mrb[40].mxu1 }
 0x137   : > { %v804_v49 = vadd.f32 %v803_v46, %v3964_v33  ;;  %v805_v50 = vpop.f32.mrb[43].mxu0  ;;  %1539 = vmatmul.mubr.bf16.gmra.mrb[100].mxu1 %v1260_v31  ;;  %v1058_v60 = vmax.f32 %v800_v41, 0.0  ;;  %v4117_v31 = vpack.c.bf16 %v1121_v17, %v1119_v10  ;;  %v960_v37 = vadd.f32 %v959_v32, %v3964_v33  ;;  %v961_v38 = vpop.f32.mrb[41].mxu1 }
 0x138   : > { %v806_v55 = vadd.f32 %v805_v50, %v3966_v34  ;;  %v1059_v3 = vmax.f32 %v802_v45, 0.0  ;;  %v962_v42 = vadd.f32 %v961_v38, %v3966_v34  ;;  %v963_v43 = vpop.f32.mrb[42].mxu1 }
 0x139   : > { %v1060_v62 = vmax.f32 %v804_v49, 0.0  ;;  %2340 = vmatmul.mubr.bf16.gmra.mrb[148].mxu0 %v3598_v44  ;;  %v1122_v46 = vmax.f32 %v960_v37, 0.0  ;;  %v965_v49 = vpop.f32.mrb[43].mxu1 }
 0x13a   : > { %v1061_v4 = vmax.f32 %v806_v55, 0.0  ;;  %2347 = vmatprep.mubr.bf16.mxu0 %v3599_v48  ;;  %v964_v48 = vadd.f32 %v963_v43, %v3964_v33  ;;  %v1123_v52 = vmax.f32 %v962_v42, 0.0  ;;  %v966_v55 = vadd.f32 %v965_v49, %v3966_v34 }
 0x13b   : > { %v1262_v9 = vpack.c.bf16 %v1060_v62, %v1058_v60 }
 0x13c   : > { %v1263_v2 = vpack.c.bf16 %v1061_v4, %v1059_v3  ;;  %v809_v13 = vpop.f32.mrb[44].mxu0  ;;  %v1124_v60 = vmax.f32 %v964_v48, 0.0  ;;  %v1125_v0 = vmax.f32 %v966_v55, 0.0  ;;  %v3604_v3 = vld [vmem:[%s3904_s25 + $0x170] ss:$8 sps:$4 sm:$0xff]  }
 0x13d   : > { %v810_v15 = vadd.f32 %v809_v13, %v3964_v33  ;;  %v811_v16 = vpop.f32.mrb[45].mxu0 }
 0x13e   : > { %v812_v20 = vadd.f32 %v811_v16, %v3966_v34  ;;  %v813_v22 = vpop.f32.mrb[46].mxu0  ;;  %1546 = vmatprep.mubr.bf16.mxu1 %v1263_v2  ;;  %v4127_v6 = vpack.c.bf16 %v1124_v60, %v1122_v46  ;;  %v4131_v11 = vpack.c.bf16 %v1125_v0, %v1123_v52  ;;  %v969_v2 = vpop.f32.mrb[44].mxu1  ;;  %v3607_v46 = vld [vmem:[%s3904_s25 + $0x180] ss:$8 sps:$4 sm:$0xff]   ;;  %v3608_v52 = vld [vmem:[%s3904_s25 + $0x194] ss:$8 sps:$4 sm:$0xff]  }
 0x13f   : > { %v814_v28 = vadd.f32 %v813_v22, %v3964_v33  ;;  %v815_v30 = vpop.f32.mrb[47].mxu0  ;;  %1547 = vmatmul.mubr.bf16.gmra.mrb[104].mxu1 %v1262_v9  ;;  %v1062_v40 = vmax.f32 %v810_v15, 0.0  ;;  %v970_v14 = vadd.f32 %v969_v2, %v3964_v33  ;;  %v971_v15 = vpop.f32.mrb[45].mxu1 }
 0x140   : > { %v816_v36 = vadd.f32 %v815_v30, %v3966_v34  ;;  %v1063_v44 = vmax.f32 %v812_v20, 0.0  ;;  %v973_v20 = vpop.f32.mrb[46].mxu1 }
 0x141   : > { %v1064_v41 = vmax.f32 %v814_v28, 0.0  ;;  %2348 = vmatmul.mubr.bf16.gmra.mrb[152].mxu0 %v3601_v18  ;;  %v972_v18 = vadd.f32 %v971_v15, %v3966_v34  ;;  %v1126_v28 = vmax.f32 %v970_v14, 0.0  ;;  %v974_v30 = vadd.f32 %v973_v20, %v3964_v33  ;;  %v975_v32 = vpop.f32.mrb[47].mxu1 }
 0x142   : > { %v1065_v45 = vmax.f32 %v816_v36, 0.0  ;;  %2355 = vmatprep.mubr.bf16.mxu0 %v3602_v27  ;;  %v976_v38 = vadd.f32 %v975_v32, %v3966_v34  ;;  %v3610_v32 = vld [vmem:[%s3904_s25 + $0x190] ss:$8 sps:$4 sm:$0xff]  }
 0x143   : > { %v1264_v50 = vpack.c.bf16 %v1064_v41, %v1062_v40  ;;  %v1127_v37 = vmax.f32 %v972_v18, 0.0  ;;  %v1128_v42 = vmax.f32 %v974_v30, 0.0 }
 0x144   : > { %v1265_v56 = vpack.c.bf16 %v1065_v45, %v1063_v44  ;;  %v819_v58 = vpop.f32.mrb[48].mxu0  ;;  %v1129_v45 = vmax.f32 %v976_v38, 0.0 }
 0x145   : > { %v820_v62 = vadd.f32 %v819_v58, %v3964_v33  ;;  %v821_v63 = vpop.f32.mrb[49].mxu0 }
 0x146   : > { %v822_v4 = vadd.f32 %v821_v63, %v3966_v34  ;;  %v823_v5 = vpop.f32.mrb[50].mxu0  ;;  %1554 = vmatprep.mubr.bf16.mxu1 %v1265_v56  ;;  %v4145_v58 = vpack.c.bf16 %v1129_v45, %v1127_v37  ;;  %v979_v60 = vpop.f32.mrb[48].mxu1 }
 0x147   : > { %v824_v9 = vadd.f32 %v823_v5, %v3964_v33  ;;  %v825_v10 = vpop.f32.mrb[51].mxu0  ;;  %1555 = vmatmul.mubr.bf16.gmra.mrb[108].mxu1 %v1264_v50  ;;  %v1066_v16 = vmax.f32 %v820_v62, 0.0  ;;  %v4141_v50 = vpack.c.bf16 %v1128_v42, %v1126_v28  ;;  %v980_v63 = vadd.f32 %v979_v60, %v3964_v33  ;;  %v981_v0 = vpop.f32.mrb[49].mxu1 }
 0x148   : > { %v826_v13 = vadd.f32 %v825_v10, %v3966_v34  ;;  %v1067_v22 = vmax.f32 %v822_v4, 0.0  ;;  %v982_v5 = vadd.f32 %v981_v0, %v3966_v34 }
 0x149   : > { %v1068_v17 = vmax.f32 %v824_v9, 0.0  ;;  %2356 = vmatmul.mubr.bf16.gmra.mrb[156].mxu0 %v3604_v3  ;;  %v1130_v2 = vmax.f32 %v980_v63, 0.0 }
 0x14a   : > { %v1069_v27 = vmax.f32 %v826_v13, 0.0  ;;  %2363 = vmatprep.mubr.bf16.mxu0 %v3605_v7  ;;  %v983_v7 = vpop.f32.mrb[50].mxu1 }
 0x14b   : > { %v1266_v36 = vpack.c.bf16 %v1068_v17, %v1066_v16  ;;  %v984_v13 = vadd.f32 %v983_v7, %v3964_v33  ;;  %v985_v14 = vpop.f32.mrb[51].mxu1  ;;  %v1131_v16 = vmax.f32 %v982_v5, 0.0 }
 0x14c   : > { %v1267_v40 = vpack.c.bf16 %v1069_v27, %v1067_v22  ;;  %v829_v41 = vpop.f32.mrb[52].mxu0  ;;  %v986_v17 = vadd.f32 %v985_v14, %v3966_v34 }
 0x14d   : > { %v830_v43 = vadd.f32 %v829_v41, %v3964_v33  ;;  %v831_v44 = vpop.f32.mrb[53].mxu0  ;;  %v1132_v22 = vmax.f32 %v984_v13, 0.0 }
 0x14e   : > { %v832_v48 = vadd.f32 %v831_v44, %v3966_v34  ;;  %v833_v49 = vpop.f32.mrb[54].mxu0  ;;  %1562 = vmatprep.mubr.bf16.mxu1 %v1267_v40  ;;  %v1133_v30 = vmax.f32 %v986_v17, 0.0  ;;  %v3611_v40 = vld [vmem:[%s3904_s25 + $0x1a4] ss:$8 sps:$4 sm:$0xff]   ;;  %v989_v44 = vpop.f32.mrb[52].mxu1 }
 0x14f   : > { %v834_v55 = vadd.f32 %v833_v49, %v3964_v33  ;;  %v835_v56 = vpop.f32.mrb[55].mxu0  ;;  %1563 = vmatmul.mubr.bf16.gmra.mrb[112].mxu1 %v1266_v36  ;;  %v1070_v3 = vmax.f32 %v830_v43, 0.0  ;;  %v4155_v38 = vpack.c.bf16 %v1132_v22, %v1130_v2  ;;  %v3614_v22 = vld [vmem:[%s3904_s25 + $0x1b4] ss:$8 sps:$4 sm:$0xff]  }
 0x150   : > { %v836_v62 = vadd.f32 %v835_v56, %v3966_v34  ;;  %v1071_v9 = vmax.f32 %v832_v48, 0.0  ;;  %v4159_v43 = vpack.c.bf16 %v1133_v30, %v1131_v16  ;;  %v991_v48 = vpop.f32.mrb[53].mxu1  ;;  %v3613_v16 = vld [vmem:[%s3904_s25 + $0x1a0] ss:$8 sps:$4 sm:$0xff]  }
 0x151   : > { %v1072_v4 = vmax.f32 %v834_v55, 0.0  ;;  %2364 = vmatmul.mubr.bf16.gmra.mrb[160].mxu0 %v3607_v46  ;;  %v990_v46 = vadd.f32 %v989_v44, %v3964_v33  ;;  %v992_v55 = vadd.f32 %v991_v48, %v3966_v34  ;;  %v993_v56 = vpop.f32.mrb[54].mxu1 }
 0x152   : > { %v1073_v10 = vmax.f32 %v836_v62, 0.0  ;;  %2371 = vmatprep.mubr.bf16.mxu0 %v3608_v52  ;;  %v994_v0 = vadd.f32 %v993_v56, %v3964_v33 }
 0x153   : > { %v1268_v15 = vpack.c.bf16 %v1072_v4, %v1070_v3  ;;  %v1134_v63 = vmax.f32 %v990_v46, 0.0  ;;  %v995_v3 = vpop.f32.mrb[55].mxu1  ;;  %v1135_v5 = vmax.f32 %v992_v55, 0.0 }
 0x154   : > { %v1269_v18 = vpack.c.bf16 %v1073_v10, %v1071_v9  ;;  %v839_v20 = vpop.f32.mrb[56].mxu0  ;;  %v996_v7 = vadd.f32 %v995_v3, %v3966_v34  ;;  %v1136_v2 = vmax.f32 %v994_v0, 0.0 }
 0x155   : > { %v840_v27 = vadd.f32 %v839_v20, %v3964_v33  ;;  %v841_v28 = vpop.f32.mrb[57].mxu0 }
 0x156   : > { %v842_v36 = vadd.f32 %v841_v28, %v3966_v34  ;;  %v843_v37 = vpop.f32.mrb[58].mxu0  ;;  %1570 = vmatprep.mubr.bf16.mxu1 %v1269_v18  ;;  %v4169_v20 = vpack.c.bf16 %v1136_v2, %v1134_v63  ;;  %v3617_v2 = vld [vmem:[%s3904_s25 + $0x1c4] ss:$8 sps:$4 sm:$0xff]  }
 0x157   : > { %v844_v41 = vadd.f32 %v843_v37, %v3964_v33  ;;  %v845_v42 = vpop.f32.mrb[59].mxu0  ;;  %1571 = vmatmul.mubr.bf16.gmra.mrb[116].mxu1 %v1268_v15  ;;  %v1074_v49 = vmax.f32 %v840_v27, 0.0  ;;  %v1137_v15 = vmax.f32 %v996_v7, 0.0  ;;  %v3616_v7 = vld [vmem:[%s3904_s25 + $0x1b0] ss:$8 sps:$4 sm:$0xff]  }
 0x158   : > { %v846_v45 = vadd.f32 %v845_v42, %v3966_v34  ;;  %v1075_v60 = vmax.f32 %v842_v36, 0.0 }
 0x159   : > { %v1076_v52 = vmax.f32 %v844_v41, 0.0  ;;  %2372 = vmatmul.mubr.bf16.gmra.mrb[164].mxu0 %v3610_v32  ;;  %v4173_v30 = vpack.c.bf16 %v1137_v15, %v1135_v5  ;;  %v999_v32 = vpop.f32.mrb[56].mxu1 }
 0x15a   : > { %v1077_v62 = vmax.f32 %v846_v45, 0.0  ;;  %2379 = vmatprep.mubr.bf16.mxu0 %v3611_v40  ;;  %v1000_v37 = vadd.f32 %v999_v32, %v3964_v33  ;;  %v1001_v40 = vpop.f32.mrb[57].mxu1 }
 0x15b   : > { %v1270_v4 = vpack.c.bf16 %v1076_v52, %v1074_v49  ;;  %v1002_v44 = vadd.f32 %v1001_v40, %v3966_v34  ;;  %v1003_v45 = vpop.f32.mrb[58].mxu1 }
 0x15c   : > { %v1271_v9 = vpack.c.bf16 %v1077_v62, %v1075_v60  ;;  %v849_v10 = vpop.f32.mrb[60].mxu0  ;;  %v1138_v49 = vmax.f32 %v1000_v37, 0.0  ;;  %v1004_v52 = vadd.f32 %v1003_v45, %v3964_v33  ;;  %v1005_v55 = vpop.f32.mrb[59].mxu1 }
 0x15d   : > { %v850_v13 = vadd.f32 %v849_v10, %v3964_v33  ;;  %v851_v14 = vpop.f32.mrb[61].mxu0  ;;  %v1139_v60 = vmax.f32 %v1002_v44, 0.0  ;;  %v1006_v62 = vadd.f32 %v1005_v55, %v3966_v34  ;;  %v3619_v44 = vld [vmem:[%s3904_s25 + $0x1c0] ss:$8 sps:$4 sm:$0xff]   ;;  %v3622_v55 = vld [vmem:[%s3904_s25 + $0x1d0] ss:$8 sps:$4 sm:$0xff]  }
 0x15e   : > { %v852_v17 = vadd.f32 %v851_v14, %v3966_v34  ;;  %v853_v18 = vpop.f32.mrb[62].mxu0  ;;  %1578 = vmatprep.mubr.bf16.mxu1 %v1271_v9  ;;  %v1140_v0 = vmax.f32 %v1004_v52, 0.0  ;;  %v1009_v14 = vpop.f32.mrb[60].mxu1 }
 0x15f   : > { %v854_v27 = vadd.f32 %v853_v18, %v3964_v33  ;;  %v855_v28 = vpop.f32.mrb[63].mxu0  ;;  %1579 = vmatmul.mubr.bf16.gmra.mrb[120].mxu1 %v1270_v4  ;;  %v1078_v41 = vmax.f32 %v850_v13, 0.0  ;;  %v1141_v4 = vmax.f32 %v1006_v62, 0.0 }
 0x160   : > { %v856_v36 = vadd.f32 %v855_v28, %v3966_v34  ;;  %v1079_v46 = vmax.f32 %v852_v17, 0.0  ;;  %v4183_v9 = vpack.c.bf16 %v1140_v0, %v1138_v49  ;;  %v1011_v17 = vpop.f32.mrb[61].mxu1 }
 0x161   : > { %v1080_v42 = vmax.f32 %v854_v27, 0.0  ;;  %2380 = vmatmul.mubr.bf16.gmra.mrb[168].mxu0 %v3613_v16  ;;  %v4188_v13 = vpack.c.bf16 %v1141_v4, %v1139_v60  ;;  %v1010_v16 = vadd.f32 %v1009_v14, %v3964_v33  ;;  %v1012_v18 = vadd.f32 %v1011_v17, %v3966_v34  ;;  %v3623_v60 = vld [vmem:[%s3904_s25 + $0x1e4] ss:$8 sps:$4 sm:$0xff]   ;;  %v3626_v4 = vld [vmem:[%s3904_s25 + $0x1f4] ss:$8 sps:$4 sm:$0xff]  }
 0x162   : > { %v1081_v48 = vmax.f32 %v856_v36, 0.0  ;;  %2387 = vmatprep.mubr.bf16.mxu0 %v3614_v22  ;;  %v1013_v22 = vpop.f32.mrb[62].mxu1 }
 0x163   : > { %v1272_v56 = vpack.c.bf16 %v1080_v42, %v1078_v41  ;;  %v1142_v27 = vmax.f32 %v1010_v16, 0.0  ;;  %v1014_v28 = vadd.f32 %v1013_v22, %v3964_v33  ;;  %v1015_v32 = vpop.f32.mrb[63].mxu1  ;;  %v1143_v36 = vmax.f32 %v1012_v18, 0.0 }
 0x164   : > { %v1273_v63 = vpack.c.bf16 %v1081_v48, %v1079_v46  ;;  %v4180_v3 = vpop.f32.mrb[64].mxu0  ;;  %v1016_v37 = vadd.f32 %v1015_v32, %v3966_v34  ;;  %v3620_v48 = vld [vmem:[%s3904_s25 + $0x1d4] ss:$8 sps:$4 sm:$0xff]  }
 0x165   : > { %v2175_v5 = vpop.f32.mrb[65].mxu0  ;;  %v1144_v40 = vmax.f32 %v1014_v28, 0.0 }
 0x166   : > { %1586 = vmatprep.mubr.bf16.mxu1 %v1273_v63  ;;  %v4185_v10 = vpop.f32.mrb[66].mxu0  ;;  %v1145_v41 = vmax.f32 %v1016_v37, 0.0  ;;  %v3625_v63 = vld [vmem:[%s3904_s25 + $0x1e0] ss:$8 sps:$4 sm:$0xff]  }
 0x167   : > { %1587 = vmatmul.mubr.bf16.gmra.mrb[124].mxu1 %v1272_v56  ;;  %v2178_v15 = vpop.f32.mrb[67].mxu0  ;;  %v4198_v45 = vpack.c.bf16 %v1144_v40, %v1142_v27 }
 0x168   : > { %1594 = vmatprep.mubr.bf16.mxu1 %v3991_v25  ;;  %v4204_v33 = vpack.c.bf16 %v1145_v41, %v1143_v36 }
 0x169   : > { %2388 = vmatmul.mubr.bf16.gmra.mrb[172].mxu0 %v3616_v7 }
 0x16a   : > { %2395 = vmatprep.mubr.bf16.mxu0 %v3617_v2 }
 0x16c   : > { %v4195_v25 = vpop.f32.mrb[68].mxu0 }
 0x16d   : > { %v2183_v42 = vpop.f32.mrb[69].mxu0 }
 0x16e   : > { %v4200_v46 = vpop.f32.mrb[70].mxu0 }
 0x16f   : > { %1595 = vmatmul.mubr.bf16.gmra.mrb[128].mxu1 %v3987_v21  ;;  %v2186_v49 = vpop.f32.mrb[71].mxu0 }
 0x170   : > { %1602 = vmatprep.mubr.bf16.mxu1 %v4005_v57  ;;  %v4275_v49 = vld [vmem:[%s4542_s6] ss:$0 sm:$0xff] }
 0x171   : > { %2396 = vmatmul.mubr.bf16.gmra.mrb[176].mxu0 %v3619_v44 }
 0x172   : > { %2403 = vmatprep.mubr.bf16.mxu0 %v3620_v48 }
 0x174   : > { %v4207_v34 = vpop.f32.mrb[72].mxu0 }
 0x175   : > { %v2191_v52 = vpop.f32.mrb[73].mxu0 }
 0x176   : > { %v4210_v56 = vpop.f32.mrb[74].mxu0 }
 0x177   : > { %1603 = vmatmul.mubr.bf16.gmra.mrb[132].mxu1 %v4001_v53  ;;  %v2194_v62 = vpop.f32.mrb[75].mxu0 }
 0x178   : > { %1610 = vmatprep.mubr.bf16.mxu1 %v4019_v24  ;;  %v3628_v24 = vld [vmem:[%s3904_s25 + $0x1f0] ss:$8 sps:$4 sm:$0xff]  }
 0x179   : > { %2404 = vmatmul.mubr.bf16.gmra.mrb[180].mxu0 %v3622_v55 }
 0x17a   : > { %2411 = vmatprep.mubr.bf16.mxu0 %v3623_v60 }
 0x17c   : > { %v4215_v21 = vpop.f32.mrb[76].mxu0 }
 0x17d   : > { %v2199_v57 = vpop.f32.mrb[77].mxu0 }
 0x17e   : > { %v4218_v0 = vpop.f32.mrb[78].mxu0 }
 0x17f   : > { %1611 = vmatmul.mubr.bf16.gmra.mrb[136].mxu1 %v4015_v19  ;;  %v2202_v5 = vpop.f32.mrb[79].mxu0 }
 0x180   : > { %1618 = vmatprep.mubr.bf16.mxu1 %v4033_v59 }
 0x181   : > { %2412 = vmatmul.mubr.bf16.gmra.mrb[184].mxu0 %v3625_v63 }
 0x182   : > { %2419 = vmatprep.mubr.bf16.mxu0 %v3626_v4 }
 0x184   : > { %v4223_v53 = vpop.f32.mrb[80].mxu0 }
 0x185   : > { %v2207_v7 = vpop.f32.mrb[81].mxu0 }
 0x186   : > { %v4226_v2 = vpop.f32.mrb[82].mxu0 }
 0x187   : > { %1619 = vmatmul.mubr.bf16.gmra.mrb[140].mxu1 %v4029_v54  ;;  %v2210_v14 = vpop.f32.mrb[83].mxu0 }
 0x188   : > { %1626 = vmatprep.mubr.bf16.mxu1 %v4047_v29 }
 0x189   : > { %2420 = vmatmul.mubr.bf16.gmra.mrb[188].mxu0 %v3628_v24 }
 0x18c   : > { %v4230_v15 = vpop.f32.mrb[84].mxu0 }
 0x18d   : > { %v2215_v19 = vpop.f32.mrb[85].mxu0 }
 0x18e   : > { %v4232_v16 = vpop.f32.mrb[86].mxu0 }
 0x18f   : > { %1627 = vmatmul.mubr.bf16.gmra.mrb[144].mxu1 %v4043_v23  ;;  %v2218_v59 = vpop.f32.mrb[87].mxu0 }
 0x190   : > { %1634 = vmatprep.mubr.bf16.mxu1 %v4061_v1 }
 0x194   : > { %v4236_v17 = vpop.f32.mrb[88].mxu0 }
 0x195   : > { %v2223_v18 = vpop.f32.mrb[89].mxu0 }
 0x196   : > { %v4238_v22 = vpop.f32.mrb[90].mxu0 }
 0x197   : > { %1635 = vmatmul.mubr.bf16.gmra.mrb[148].mxu1 %v4057_v61  ;;  %v2226_v54 = vpop.f32.mrb[91].mxu0 }
 0x198   : > { %1642 = vmatprep.mubr.bf16.mxu1 %v4075_v39 }
 0x19c   : > { %v4242_v29 = vpop.f32.mrb[92].mxu0 }
 0x19d   : > { %v2231_v27 = vpop.f32.mrb[93].mxu0 }
 0x19e   : > { %v4244_v28 = vpop.f32.mrb[94].mxu0 }
 0x19f   : > { %1643 = vmatmul.mubr.bf16.gmra.mrb[152].mxu1 %v4071_v35  ;;  %v2234_v23 = vpop.f32.mrb[95].mxu0 }
 0x1a0   : > { %1650 = vmatprep.mubr.bf16.mxu1 %v4089_v12 }
 0x1a4   : > { %v4248_v1 = vpop.f32.mrb[96].mxu0 }
 0x1a5   : > { %v2239_v32 = vpop.f32.mrb[97].mxu0 }
 0x1a6   : > { %v4250_v36 = vpop.f32.mrb[98].mxu0 }
 0x1a7   : > { %1651 = vmatmul.mubr.bf16.gmra.mrb[156].mxu1 %v4085_v8  ;;  %v2242_v61 = vpop.f32.mrb[99].mxu0 }
 0x1a8   : > { %1658 = vmatprep.mubr.bf16.mxu1 %v4103_v51 }
 0x1ac   : > { %v4254_v39 = vpop.f32.mrb[100].mxu0 }
 0x1ad   : > { %v2247_v37 = vpop.f32.mrb[101].mxu0 }
 0x1ae   : > { %v4256_v40 = vpop.f32.mrb[102].mxu0 }
 0x1af   : > { %1659 = vmatmul.mubr.bf16.gmra.mrb[160].mxu1 %v4099_v47  ;;  %v2250_v35 = vpop.f32.mrb[103].mxu0 }
 0x1b0   : > { %1666 = vmatprep.mubr.bf16.mxu1 %v4117_v31 }
 0x1b4   : > { %v4260_v12 = vpop.f32.mrb[104].mxu0 }
 0x1b5   : > { %v2255_v41 = vpop.f32.mrb[105].mxu0 }
 0x1b6   : > { %v4262_v42 = vpop.f32.mrb[106].mxu0 }
 0x1b7   : > { %1667 = vmatmul.mubr.bf16.gmra.mrb[164].mxu1 %v4113_v26  ;;  %v2258_v8 = vpop.f32.mrb[107].mxu0 }
 0x1b8   : > { %1674 = vmatprep.mubr.bf16.mxu1 %v4131_v11 }
 0x1bc   : > { %v4266_v51 = vpop.f32.mrb[108].mxu0 }
 0x1bd   : > { %v2263_v44 = vpop.f32.mrb[109].mxu0 }
 0x1be   : > { %v4268_v48 = vpop.f32.mrb[110].mxu0 }
 0x1bf   : > { %1675 = vmatmul.mubr.bf16.gmra.mrb[168].mxu1 %v4127_v6  ;;  %v2266_v47 = vpop.f32.mrb[111].mxu0 }
 0x1c0   : > { %1682 = vmatprep.mubr.bf16.mxu1 %v4145_v58 }
 0x1c2   : > { %v1468_v31 = vpop.f32.mrb[64].mxu1 }
 0x1c3   : > { %v2174_v26 = vadd.f32 %v4180_v3, %v1468_v31  ;;  %v1470_v11 = vpop.f32.mrb[65].mxu1 }
 0x1c4   : > { %v1471_v52 = vpop.f32.mrb[66].mxu1  ;;  %v4278_v55 = vpop.f32.mrb[112].mxu0 }
 0x1c5   : > { %v2435_v60 = vadd.f32 %v4275_v49, %v2174_v26  ;;  %v2177_v6 = vadd.f32 %v4185_v10, %v1471_v52  ;;  %v1473_v62 = vpop.f32.mrb[67].mxu1  ;;  %v2271_v57 = vpop.f32.mrb[113].mxu0 }
 0x1c6   : > { %v4282_v58 = vpop.f32.mrb[114].mxu0 }
 0x1c7   : > { %v2436_v63 = vadd.f32 %v4275_v49, %v2177_v6  ;;  %1683 = vmatmul.mubr.bf16.gmra.mrb[172].mxu1 %v4141_v50  ;;  %v2274_v4 = vpop.f32.mrb[115].mxu0  ;;  %v2499_v3 = vmax.f32 %v2435_v60, 0.0 }
 0x1c8   : > { %1690 = vmatprep.mubr.bf16.mxu1 %v4159_v43 }
 0x1c9   : > { %v2500_v5 = vmax.f32 %v2436_v63, 0.0 }
 0x1ca   : > { %v1476_v10 = vpop.f32.mrb[68].mxu1 }
 0x1cb   : > { %v3262_v7 = vpack.c.bf16 %v2500_v5, %v2499_v3  ;;  %v2182_v24 = vadd.f32 %v4195_v25, %v1476_v10  ;;  %v1478_v14 = vpop.f32.mrb[69].mxu1 }
 0x1cc   : > { %v1479_v19 = vpop.f32.mrb[70].mxu1  ;;  %v4295_v59 = vpop.f32.mrb[116].mxu0 }
 0x1cd   : > { %3263 = vst [vmem:[%s4292_s11] sm:$0xff] %v3262_v7   ;;  %v2437_v50 = vadd.f32 %v4275_v49, %v2182_v24  ;;  %v2185_v43 = vadd.f32 %v4200_v46, %v1479_v19  ;;  %v1481_v18 = vpop.f32.mrb[71].mxu1  ;;  %v2279_v54 = vpop.f32.mrb[117].mxu0 }
 0x1ce   : > { %v4300_v27 = vpop.f32.mrb[118].mxu0 }
 0x1cf   : > { %v2438_v23 = vadd.f32 %v4275_v49, %v2185_v43  ;;  %1691 = vmatmul.mubr.bf16.gmra.mrb[176].mxu1 %v4155_v38  ;;  %v2282_v32 = vpop.f32.mrb[119].mxu0  ;;  %v2501_v25 = vmax.f32 %v2437_v50, 0.0 }
 0x1d0   : > { %1698 = vmatprep.mubr.bf16.mxu1 %v4173_v30 }
 0x1d1   : > { %v2502_v61 = vmax.f32 %v2438_v23, 0.0 }
 0x1d2   : > { %v1484_v37 = vpop.f32.mrb[72].mxu1 }
 0x1d3   : > { %v3267_v35 = vpack.c.bf16 %v2502_v61, %v2501_v25  ;;  %v2190_v41 = vadd.f32 %v4207_v34, %v1484_v37  ;;  %v1486_v8 = vpop.f32.mrb[73].mxu1 }
 0x1d4   : > { %v1487_v46 = vpop.f32.mrb[74].mxu1  ;;  %v4306_v44 = vpop.f32.mrb[120].mxu0 }
 0x1d5   : > { %3419 = vst [vmem:[%s4292_s11 + $0x8] sm:$0xff] %v3267_v35   ;;  %v2439_v47 = vadd.f32 %v4275_v49, %v2190_v41  ;;  %v2193_v31 = vadd.f32 %v4210_v56, %v1487_v46  ;;  %v1489_v38 = vpop.f32.mrb[75].mxu1  ;;  %v2287_v26 = vpop.f32.mrb[121].mxu0 }
 0x1d6   : > { %v4311_v11 = vpop.f32.mrb[122].mxu0 }
 0x1d7   : > { %v2440_v30 = vadd.f32 %v4275_v49, %v2193_v31  ;;  %1699 = vmatmul.mubr.bf16.gmra.mrb[180].mxu1 %v4169_v20  ;;  %v2290_v52 = vpop.f32.mrb[123].mxu0  ;;  %v2503_v34 = vmax.f32 %v2439_v47, 0.0 }
 0x1d8   : > { %1706 = vmatprep.mubr.bf16.mxu1 %v4188_v13 }
 0x1d9   : > { %v2504_v60 = vmax.f32 %v2440_v30, 0.0 }
 0x1da   : > { %v1492_v6 = vpop.f32.mrb[76].mxu1 }
 0x1db   : > { %v3272_v62 = vpack.c.bf16 %v2504_v60, %v2503_v34  ;;  %v2198_v57 = vadd.f32 %v4215_v21, %v1492_v6  ;;  %v1494_v63 = vpop.f32.mrb[77].mxu1 }
 0x1dc   : > { %v1495_v56 = vpop.f32.mrb[78].mxu1  ;;  %v4317_v4 = vpop.f32.mrb[124].mxu0 }
 0x1dd   : > { %3420 = vst [vmem:[%s4292_s11 + $0x10] sm:$0xff] %v3272_v62   ;;  %v2441_v3 = vadd.f32 %v4275_v49, %v2198_v57  ;;  %v2201_v5 = vadd.f32 %v4218_v0, %v1495_v56  ;;  %v1497_v20 = vpop.f32.mrb[79].mxu1  ;;  %v2295_v10 = vpop.f32.mrb[125].mxu0 }
 0x1de   : > { %v4322_v7 = vpop.f32.mrb[126].mxu0 }
 0x1df   : > { %v2442_v13 = vadd.f32 %v4275_v49, %v2201_v5  ;;  %1707 = vmatmul.mubr.bf16.gmra.mrb[184].mxu1 %v4183_v9  ;;  %v2298_v24 = vpop.f32.mrb[127].mxu0  ;;  %v2505_v21 = vmax.f32 %v2441_v3, 0.0 }
 0x1e0   : > { %1714 = vmatprep.mubr.bf16.mxu1 %v4204_v33 }
 0x1e1   : > { %v2506_v14 = vmax.f32 %v2442_v13, 0.0 }
 0x1e2   : > { %v1500_v19 = vpop.f32.mrb[80].mxu1 }
 0x1e3   : > { %v3277_v50 = vpack.c.bf16 %v2506_v14, %v2505_v21  ;;  %v2206_v43 = vadd.f32 %v4223_v53, %v1500_v19  ;;  %v1502_v18 = vpop.f32.mrb[81].mxu1 }
 0x1e4   : > { %v1503_v0 = vpop.f32.mrb[82].mxu1  ;;  %v4328_v54 = vpop.f32.mrb[128].mxu0 }
 0x1e5   : > { %3421 = vst [vmem:[%s4292_s11 + $0x18] sm:$0xff] %v3277_v50   ;;  %v2443_v23 = vadd.f32 %v4275_v49, %v2206_v43  ;;  %v2209_v32 = vadd.f32 %v4226_v2, %v1503_v0  ;;  %v1505_v9 = vpop.f32.mrb[83].mxu1  ;;  %v2303_v25 = vpop.f32.mrb[129].mxu0 }
 0x1e6   : > { %v4333_v61 = vpop.f32.mrb[130].mxu0 }
 0x1e7   : > { %v2444_v33 = vadd.f32 %v4275_v49, %v2209_v32  ;;  %1715 = vmatmul.mubr.bf16.gmra.mrb[188].mxu1 %v4198_v45  ;;  %v2306_v37 = vpop.f32.mrb[131].mxu0  ;;  %v2507_v53 = vmax.f32 %v2443_v23, 0.0 }
 0x1e9   : > { %v2508_v35 = vmax.f32 %v2444_v33, 0.0 }
 0x1ea   : > { %v1508_v41 = vpop.f32.mrb[84].mxu1 }
 0x1eb   : > { %v3282_v8 = vpack.c.bf16 %v2508_v35, %v2507_v53  ;;  %v2214_v46 = vadd.f32 %v4230_v15, %v1508_v41  ;;  %v1510_v47 = vpop.f32.mrb[85].mxu1 }
 0x1ec   : > { %v1511_v31 = vpop.f32.mrb[86].mxu1  ;;  %v4338_v38 = vpop.f32.mrb[132].mxu0 }
 0x1ed   : > { %3422 = vst [vmem:[%s4292_s11 + $0x20] sm:$0xff] %v3282_v8   ;;  %v2445_v2 = vadd.f32 %v4275_v49, %v2214_v46  ;;  %v2217_v26 = vadd.f32 %v4232_v16, %v1511_v31  ;;  %v1513_v30 = vpop.f32.mrb[87].mxu1  ;;  %v2311_v52 = vpop.f32.mrb[133].mxu0 }
 0x1ee   : > { %v4343_v45 = vpop.f32.mrb[134].mxu0 }
 0x1ef   : > { %v2446_v34 = vadd.f32 %v4275_v49, %v2217_v26  ;;  %v2314_v60 = vpop.f32.mrb[135].mxu0  ;;  %v2509_v6 = vmax.f32 %v2445_v2, 0.0 }
 0x1f1   : > { %v2510_v62 = vmax.f32 %v2446_v34, 0.0 }
 0x1f2   : > { %v1516_v15 = vpop.f32.mrb[88].mxu1 }
 0x1f3   : > { %v3287_v57 = vpack.c.bf16 %v2510_v62, %v2509_v6  ;;  %v2222_v63 = vadd.f32 %v4236_v17, %v1516_v15  ;;  %v1518_v56 = vpop.f32.mrb[89].mxu1 }
 0x1f4   : > { %v1519_v3 = vpop.f32.mrb[90].mxu1  ;;  %v4347_v5 = vpop.f32.mrb[136].mxu0 }
 0x1f5   : > { %3423 = vst [vmem:[%s4292_s11 + $0x28] sm:$0xff] %v3287_v57   ;;  %v2447_v16 = vadd.f32 %v4275_v49, %v2222_v63  ;;  %v2225_v20 = vadd.f32 %v4238_v22, %v1519_v3  ;;  %v1521_v10 = vpop.f32.mrb[91].mxu1  ;;  %v2319_v13 = vpop.f32.mrb[137].mxu0 }
 0x1f6   : > { %v4352_v24 = vpop.f32.mrb[138].mxu0 }
 0x1f7   : > { %v2448_v21 = vadd.f32 %v4275_v49, %v2225_v20  ;;  %v2322_v14 = vpop.f32.mrb[139].mxu0  ;;  %v2511_v19 = vmax.f32 %v2447_v16, 0.0 }
 0x1f9   : > { %v2512_v50 = vmax.f32 %v2448_v21, 0.0 }
 0x1fa   : > { %v1524_v17 = vpop.f32.mrb[92].mxu1 }
 0x1fb   : > { %v3292_v43 = vpack.c.bf16 %v2512_v50, %v2511_v19  ;;  %v2230_v18 = vadd.f32 %v4242_v29, %v1524_v17  ;;  %v1526_v0 = vpop.f32.mrb[93].mxu1 }
 0x1fc   : > { %v1527_v23 = vpop.f32.mrb[94].mxu1  ;;  %v4356_v32 = vpop.f32.mrb[140].mxu0 }
 0x1fd   : > { %3424 = vst [vmem:[%s4292_s11 + $0x30] sm:$0xff] %v3292_v43   ;;  %v2449_v22 = vadd.f32 %v4275_v49, %v2230_v18  ;;  %v2233_v9 = vadd.f32 %v4244_v28, %v1527_v23  ;;  %v1529_v25 = vpop.f32.mrb[95].mxu1  ;;  %v2327_v33 = vpop.f32.mrb[141].mxu0 }
 0x1fe   : > { %v4361_v37 = vpop.f32.mrb[142].mxu0 }
 0x1ff   : > { %v2450_v53 = vadd.f32 %v4275_v49, %v2233_v9  ;;  %v2330_v35 = vpop.f32.mrb[143].mxu0  ;;  %v2513_v41 = vmax.f32 %v2449_v22, 0.0 }
 0x201   : > { %v2514_v8 = vmax.f32 %v2450_v53, 0.0 }
 0x202   : > { %v1532_v29 = vpop.f32.mrb[96].mxu1 }
 0x203   : > { %v3297_v46 = vpack.c.bf16 %v2514_v8, %v2513_v41  ;;  %v2238_v47 = vadd.f32 %v4248_v1, %v1532_v29  ;;  %v1534_v31 = vpop.f32.mrb[97].mxu1 }
 0x204   : > { %v1535_v2 = vpop.f32.mrb[98].mxu1  ;;  %v4365_v26 = vpop.f32.mrb[144].mxu0 }
 0x205   : > { %3425 = vst [vmem:[%s4292_s11 + $0x38] sm:$0xff] %v3297_v46   ;;  %v2451_v28 = vadd.f32 %v4275_v49, %v2238_v47  ;;  %v2241_v30 = vadd.f32 %v4250_v36, %v1535_v2  ;;  %v1537_v52 = vpop.f32.mrb[99].mxu1  ;;  %v2335_v34 = vpop.f32.mrb[145].mxu0 }
 0x206   : > { %v4370_v60 = vpop.f32.mrb[146].mxu0 }
 0x207   : > { %v2452_v6 = vadd.f32 %v4275_v49, %v2241_v30  ;;  %v2338_v62 = vpop.f32.mrb[147].mxu0  ;;  %v2515_v15 = vmax.f32 %v2451_v28, 0.0 }
 0x209   : > { %v2516_v57 = vmax.f32 %v2452_v6, 0.0 }
 0x20a   : > { %v1540_v1 = vpop.f32.mrb[100].mxu1 }
 0x20b   : > { %v3302_v63 = vpack.c.bf16 %v2516_v57, %v2515_v15  ;;  %v2246_v56 = vadd.f32 %v4254_v39, %v1540_v1  ;;  %v1542_v3 = vpop.f32.mrb[101].mxu1 }
 0x20c   : > { %v1543_v16 = vpop.f32.mrb[102].mxu1  ;;  %v4374_v20 = vpop.f32.mrb[148].mxu0 }
 0x20d   : > { %3426 = vst [vmem:[%s4292_s11 + $0x40] sm:$0xff] %v3302_v63   ;;  %v2453_v36 = vadd.f32 %v4275_v49, %v2246_v56  ;;  %v2249_v10 = vadd.f32 %v4256_v40, %v1543_v16  ;;  %v1545_v13 = vpop.f32.mrb[103].mxu1  ;;  %v2343_v21 = vpop.f32.mrb[149].mxu0 }
 0x20e   : > { %v4379_v14 = vpop.f32.mrb[150].mxu0 }
 0x20f   : > { %v2454_v19 = vadd.f32 %v4275_v49, %v2249_v10  ;;  %v2346_v50 = vpop.f32.mrb[151].mxu0  ;;  %v2517_v17 = vmax.f32 %v2453_v36, 0.0 }
 0x211   : > { %v2518_v43 = vmax.f32 %v2454_v19, 0.0 }
 0x212   : > { %v1548_v39 = vpop.f32.mrb[104].mxu1 }
 0x213   : > { %v3307_v18 = vpack.c.bf16 %v2518_v43, %v2517_v17  ;;  %v2254_v0 = vadd.f32 %v4260_v12, %v1548_v39  ;;  %v1550_v23 = vpop.f32.mrb[105].mxu1 }
 0x214   : > { %v1551_v22 = vpop.f32.mrb[106].mxu1  ;;  %v4383_v9 = vpop.f32.mrb[152].mxu0 }
 0x215   : > { %3427 = vst [vmem:[%s4292_s11 + $0x48] sm:$0xff] %v3307_v18   ;;  %v2455_v40 = vadd.f32 %v4275_v49, %v2254_v0  ;;  %v2257_v25 = vadd.f32 %v4262_v42, %v1551_v22  ;;  %v1553_v33 = vpop.f32.mrb[107].mxu1  ;;  %v2351_v53 = vpop.f32.mrb[153].mxu0 }
 0x216   : > { %v4388_v35 = vpop.f32.mrb[154].mxu0 }
 0x217   : > { %v2456_v41 = vadd.f32 %v4275_v49, %v2257_v25  ;;  %v2354_v8 = vpop.f32.mrb[155].mxu0  ;;  %v2519_v29 = vmax.f32 %v2455_v40, 0.0 }
 0x219   : > { %v2520_v46 = vmax.f32 %v2456_v41, 0.0 }
 0x21a   : > { %v1556_v12 = vpop.f32.mrb[108].mxu1 }
 0x21b   : > { %v3312_v47 = vpack.c.bf16 %v2520_v46, %v2519_v29  ;;  %v2262_v31 = vadd.f32 %v4266_v51, %v1556_v12  ;;  %v1558_v2 = vpop.f32.mrb[109].mxu1 }
 0x21c   : > { %v1559_v28 = vpop.f32.mrb[110].mxu1  ;;  %v4392_v30 = vpop.f32.mrb[156].mxu0 }
 0x21d   : > { %3428 = vst [vmem:[%s4292_s11 + $0x50] sm:$0xff] %v3312_v47   ;;  %v2457_v42 = vadd.f32 %v4275_v49, %v2262_v31  ;;  %v2265_v52 = vadd.f32 %v4268_v48, %v1559_v28  ;;  %v1561_v34 = vpop.f32.mrb[111].mxu1  ;;  %v2359_v6 = vpop.f32.mrb[157].mxu0 }
 0x21e   : > { %v4397_v62 = vpop.f32.mrb[158].mxu0 }
 0x21f   : > { %v2458_v15 = vadd.f32 %v4275_v49, %v2265_v52  ;;  %v2362_v57 = vpop.f32.mrb[159].mxu0  ;;  %v2521_v1 = vmax.f32 %v2457_v42, 0.0 }
 0x221   : > { %v2522_v63 = vmax.f32 %v2458_v15, 0.0 }
 0x222   : > { %v1564_v51 = vpop.f32.mrb[112].mxu1 }
 0x223   : > { %v3317_v56 = vpack.c.bf16 %v2522_v63, %v2521_v1  ;;  %v2270_v3 = vadd.f32 %v4278_v55, %v1564_v51  ;;  %v1566_v16 = vpop.f32.mrb[113].mxu1 }
 0x224   : > { %v1567_v36 = vpop.f32.mrb[114].mxu1  ;;  %v4401_v10 = vpop.f32.mrb[160].mxu0 }
 0x225   : > { %3429 = vst [vmem:[%s4292_s11 + $0x58] sm:$0xff] %v3317_v56   ;;  %v2459_v48 = vadd.f32 %v4275_v49, %v2270_v3  ;;  %v2273_v13 = vadd.f32 %v4282_v58, %v1567_v36  ;;  %v1569_v21 = vpop.f32.mrb[115].mxu1  ;;  %v2367_v19 = vpop.f32.mrb[161].mxu0 }
 0x226   : > { %v4406_v50 = vpop.f32.mrb[162].mxu0 }
 0x227   : > { %v2460_v17 = vadd.f32 %v4275_v49, %v2273_v13  ;;  %v2370_v43 = vpop.f32.mrb[163].mxu0  ;;  %v2523_v39 = vmax.f32 %v2459_v48, 0.0 }
 0x229   : > { %v2524_v18 = vmax.f32 %v2460_v17, 0.0 }
 0x22a   : > { %v1572_v55 = vpop.f32.mrb[116].mxu1 }
 0x22b   : > { %v3322_v0 = vpack.c.bf16 %v2524_v18, %v2523_v39  ;;  %v2278_v23 = vadd.f32 %v4295_v59, %v1572_v55  ;;  %v1574_v22 = vpop.f32.mrb[117].mxu1 }
 0x22c   : > { %v1575_v40 = vpop.f32.mrb[118].mxu1  ;;  %v4410_v25 = vpop.f32.mrb[164].mxu0 }
 0x22d   : > { %3430 = vst [vmem:[%s4292_s11 + $0x60] sm:$0xff] %v3322_v0   ;;  %v2461_v58 = vadd.f32 %v4275_v49, %v2278_v23  ;;  %v2281_v33 = vadd.f32 %v4300_v27, %v1575_v40  ;;  %v1577_v53 = vpop.f32.mrb[119].mxu1  ;;  %v2375_v41 = vpop.f32.mrb[165].mxu0 }
 0x22e   : > { %v4415_v8 = vpop.f32.mrb[166].mxu0 }
 0x22f   : > { %v2462_v29 = vadd.f32 %v4275_v49, %v2281_v33  ;;  %v2378_v46 = vpop.f32.mrb[167].mxu0  ;;  %v2525_v12 = vmax.f32 %v2461_v58, 0.0 }
 0x231   : > { %v2526_v47 = vmax.f32 %v2462_v29, 0.0 }
 0x232   : > { %v1580_v59 = vpop.f32.mrb[120].mxu1 }
 0x233   : > { %v3327_v31 = vpack.c.bf16 %v2526_v47, %v2525_v12  ;;  %v2286_v2 = vadd.f32 %v4306_v44, %v1580_v59  ;;  %v1582_v28 = vpop.f32.mrb[121].mxu1 }
 0x234   : > { %v1583_v42 = vpop.f32.mrb[122].mxu1  ;;  %v4419_v52 = vpop.f32.mrb[168].mxu0 }
 0x235   : > { %3431 = vst [vmem:[%s4292_s11 + $0x68] sm:$0xff] %v3327_v31   ;;  %v2463_v27 = vadd.f32 %v4275_v49, %v2286_v2  ;;  %v2289_v34 = vadd.f32 %v4311_v11, %v1583_v42  ;;  %v1585_v6 = vpop.f32.mrb[123].mxu1  ;;  %v2383_v15 = vpop.f32.mrb[169].mxu0 }
 0x236   : > { %v4424_v57 = vpop.f32.mrb[170].mxu0 }
 0x237   : > { %v2464_v1 = vadd.f32 %v4275_v49, %v2289_v34  ;;  %v2386_v63 = vpop.f32.mrb[171].mxu0  ;;  %v2527_v51 = vmax.f32 %v2463_v27, 0.0 }
 0x239   : > { %v2528_v56 = vmax.f32 %v2464_v1, 0.0 }
 0x23a   : > { %v1588_v44 = vpop.f32.mrb[124].mxu1 }
 0x23b   : > { %v3332_v3 = vpack.c.bf16 %v2528_v56, %v2527_v51  ;;  %v2294_v16 = vadd.f32 %v4317_v4, %v1588_v44  ;;  %v1590_v36 = vpop.f32.mrb[125].mxu1 }
 0x23c   : > { %v1591_v48 = vpop.f32.mrb[126].mxu1  ;;  %v4428_v13 = vpop.f32.mrb[172].mxu0 }
 0x23d   : > { %3432 = vst [vmem:[%s4292_s11 + $0x70] sm:$0xff] %v3332_v3   ;;  %v2465_v11 = vadd.f32 %v4275_v49, %v2294_v16  ;;  %v2297_v21 = vadd.f32 %v4322_v7, %v1591_v48  ;;  %v1593_v19 = vpop.f32.mrb[127].mxu1  ;;  %v2391_v17 = vpop.f32.mrb[173].mxu0 }
 0x23e   : > { %v4433_v43 = vpop.f32.mrb[174].mxu0 }
 0x23f   : > { %v2466_v39 = vadd.f32 %v4275_v49, %v2297_v21  ;;  %v2394_v18 = vpop.f32.mrb[175].mxu0  ;;  %v2529_v55 = vmax.f32 %v2465_v11, 0.0 }
 0x241   : > { %v2530_v0 = vmax.f32 %v2466_v39, 0.0 }
 0x242   : > { %v1596_v4 = vpop.f32.mrb[128].mxu1 }
 0x243   : > { %v3337_v23 = vpack.c.bf16 %v2530_v0, %v2529_v55  ;;  %v2302_v22 = vadd.f32 %v4328_v54, %v1596_v4  ;;  %v1598_v40 = vpop.f32.mrb[129].mxu1 }
 0x244   : > { %v1599_v58 = vpop.f32.mrb[130].mxu1  ;;  %v4437_v33 = vpop.f32.mrb[176].mxu0 }
 0x245   : > { %3433 = vst [vmem:[%s4292_s11 + $0x78] sm:$0xff] %v3337_v23   ;;  %v2467_v7 = vadd.f32 %v4275_v49, %v2302_v22  ;;  %v2305_v53 = vadd.f32 %v4333_v61, %v1599_v58  ;;  %v1601_v41 = vpop.f32.mrb[131].mxu1  ;;  %v2399_v29 = vpop.f32.mrb[177].mxu0 }
 0x246   : > { %v4442_v46 = vpop.f32.mrb[178].mxu0 }
 0x247   : > { %v2468_v12 = vadd.f32 %v4275_v49, %v2305_v53  ;;  %v2402_v47 = vpop.f32.mrb[179].mxu0  ;;  %v2531_v59 = vmax.f32 %v2467_v7, 0.0 }
 0x249   : > { %v2532_v31 = vmax.f32 %v2468_v12, 0.0 }
 0x24a   : > { %v1604_v54 = vpop.f32.mrb[132].mxu1 }
 0x24b   : > { %v3342_v2 = vpack.c.bf16 %v2532_v31, %v2531_v59  ;;  %v2310_v28 = vadd.f32 %v4338_v38, %v1604_v54  ;;  %v1606_v42 = vpop.f32.mrb[133].mxu1 }
 0x24c   : > { %v1607_v27 = vpop.f32.mrb[134].mxu1  ;;  %v4446_v34 = vpop.f32.mrb[180].mxu0 }
 0x24d   : > { %3434 = vst [vmem:[%s4292_s11 + $0x80] sm:$0xff] %v3342_v2   ;;  %v2469_v61 = vadd.f32 %v4275_v49, %v2310_v28  ;;  %v2313_v6 = vadd.f32 %v4343_v45, %v1607_v27  ;;  %v1609_v15 = vpop.f32.mrb[135].mxu1  ;;  %v2407_v1 = vpop.f32.mrb[181].mxu0 }
 0x24e   : > { %v4451_v63 = vpop.f32.mrb[182].mxu0 }
 0x24f   : > { %v2470_v51 = vadd.f32 %v4275_v49, %v2313_v6  ;;  %v2410_v56 = vpop.f32.mrb[183].mxu0  ;;  %v2533_v44 = vmax.f32 %v2469_v61, 0.0 }
 0x251   : > { %v2534_v3 = vmax.f32 %v2470_v51, 0.0 }
 0x252   : > { %v1612_v38 = vpop.f32.mrb[136].mxu1 }
 0x253   : > { %v3347_v16 = vpack.c.bf16 %v2534_v3, %v2533_v44  ;;  %v2318_v36 = vadd.f32 %v4347_v5, %v1612_v38  ;;  %v1614_v48 = vpop.f32.mrb[137].mxu1 }
 0x254   : > { %v1615_v11 = vpop.f32.mrb[138].mxu1  ;;  %v4455_v21 = vpop.f32.mrb[184].mxu0 }
 0x255   : > { %3435 = vst [vmem:[%s4292_s11 + $0x88] sm:$0xff] %v3347_v16   ;;  %v2471_v45 = vadd.f32 %v4275_v49, %v2318_v36  ;;  %v2321_v19 = vadd.f32 %v4352_v24, %v1615_v11  ;;  %v1617_v17 = vpop.f32.mrb[139].mxu1  ;;  %v2415_v39 = vpop.f32.mrb[185].mxu0 }
 0x256   : > { %v4460_v18 = vpop.f32.mrb[186].mxu0 }
 0x257   : > { %v2472_v55 = vadd.f32 %v4275_v49, %v2321_v19  ;;  %v2418_v0 = vpop.f32.mrb[187].mxu0  ;;  %v2535_v4 = vmax.f32 %v2471_v45, 0.0 }
 0x259   : > { %v2536_v23 = vmax.f32 %v2472_v55, 0.0 }
 0x25a   : > { %v1620_v5 = vpop.f32.mrb[140].mxu1 }
 0x25b   : > { %v3352_v22 = vpack.c.bf16 %v2536_v23, %v2535_v4  ;;  %v2326_v40 = vadd.f32 %v4356_v32, %v1620_v5  ;;  %v1622_v58 = vpop.f32.mrb[141].mxu1 }
 0x25c   : > { %v1623_v7 = vpop.f32.mrb[142].mxu1  ;;  %v4464_v53 = vpop.f32.mrb[188].mxu0 }
 0x25d   : > { %3436 = vst [vmem:[%s4292_s11 + $0x90] sm:$0xff] %v3352_v22   ;;  %v2473_v24 = vadd.f32 %v4275_v49, %v2326_v40  ;;  %v2329_v41 = vadd.f32 %v4361_v37, %v1623_v7  ;;  %v1625_v29 = vpop.f32.mrb[143].mxu1  ;;  %v2423_v12 = vpop.f32.mrb[189].mxu0 }
 0x25e   : > { %v4469_v47 = vpop.f32.mrb[190].mxu0 }
 0x25f   : > { %v2474_v59 = vadd.f32 %v4275_v49, %v2329_v41  ;;  %v2426_v31 = vpop.f32.mrb[191].mxu0  ;;  %v2537_v54 = vmax.f32 %v2473_v24, 0.0 }
 0x261   : > { %v2538_v2 = vmax.f32 %v2474_v59, 0.0 }
 0x262   : > { %v1628_v32 = vpop.f32.mrb[144].mxu1 }
 0x263   : > { %v3357_v28 = vpack.c.bf16 %v2538_v2, %v2537_v54  ;;  %v2334_v42 = vadd.f32 %v4365_v26, %v1628_v32  ;;  %v1630_v27 = vpop.f32.mrb[145].mxu1 }
 0x264   : > { %v1631_v61 = vpop.f32.mrb[146].mxu1 }
 0x265   : > { %3437 = vst [vmem:[%s4292_s11 + $0x98] sm:$0xff] %v3357_v28   ;;  %v2475_v6 = vadd.f32 %v4275_v49, %v2334_v42  ;;  %v2337_v37 = vadd.f32 %v4370_v60, %v1631_v61  ;;  %v1633_v15 = vpop.f32.mrb[147].mxu1 }
 0x267   : > { %v2476_v1 = vadd.f32 %v4275_v49, %v2337_v37  ;;  %v2539_v51 = vmax.f32 %v2475_v6, 0.0 }
 0x269   : > { %v2540_v56 = vmax.f32 %v2476_v1, 0.0 }
 0x26a   : > { %v1636_v44 = vpop.f32.mrb[148].mxu1 }
 0x26b   : > { %v3362_v3 = vpack.c.bf16 %v2540_v56, %v2539_v51  ;;  %v2342_v38 = vadd.f32 %v4374_v20, %v1636_v44  ;;  %v1638_v16 = vpop.f32.mrb[149].mxu1 }
 0x26c   : > { %v1639_v36 = vpop.f32.mrb[150].mxu1 }
 0x26d   : > { %3438 = vst [vmem:[%s4292_s11 + $0xa0] sm:$0xff] %v3362_v3   ;;  %v2477_v26 = vadd.f32 %v4275_v49, %v2342_v38  ;;  %v2345_v48 = vadd.f32 %v4379_v14, %v1639_v36  ;;  %v1641_v11 = vpop.f32.mrb[151].mxu1 }
 0x26f   : > { %v2478_v60 = vadd.f32 %v4275_v49, %v2345_v48  ;;  %v2541_v45 = vmax.f32 %v2477_v26, 0.0 }
 0x271   : > { %v2542_v19 = vmax.f32 %v2478_v60, 0.0 }
 0x272   : > { %v1644_v17 = vpop.f32.mrb[152].mxu1 }
 0x273   : > { %v3367_v39 = vpack.c.bf16 %v2542_v19, %v2541_v45  ;;  %v2350_v55 = vadd.f32 %v4383_v9, %v1644_v17  ;;  %v1646_v0 = vpop.f32.mrb[153].mxu1 }
 0x274   : > { %v1647_v4 = vpop.f32.mrb[154].mxu1 }
 0x275   : > { %3439 = vst [vmem:[%s4292_s11 + $0xa8] sm:$0xff] %v3367_v39   ;;  %v2479_v20 = vadd.f32 %v4275_v49, %v2350_v55  ;;  %v2353_v23 = vadd.f32 %v4388_v35, %v1647_v4  ;;  %v1649_v5 = vpop.f32.mrb[155].mxu1 }
 0x277   : > { %v2480_v14 = vadd.f32 %v4275_v49, %v2353_v23  ;;  %v2543_v22 = vmax.f32 %v2479_v20, 0.0 }
 0x279   : > { %v2544_v40 = vmax.f32 %v2480_v14, 0.0 }
 0x27a   : > { %v1652_v58 = vpop.f32.mrb[156].mxu1 }
 0x27b   : > { %v3372_v7 = vpack.c.bf16 %v2544_v40, %v2543_v22  ;;  %v2358_v24 = vadd.f32 %v4392_v30, %v1652_v58  ;;  %v1654_v41 = vpop.f32.mrb[157].mxu1 }
 0x27c   : > { %v1655_v29 = vpop.f32.mrb[158].mxu1 }
 0x27d   : > { %3440 = vst [vmem:[%s4292_s11 + $0xb0] sm:$0xff] %v3372_v7   ;;  %v2481_v9 = vadd.f32 %v4275_v49, %v2358_v24  ;;  %v2361_v12 = vadd.f32 %v4397_v62, %v1655_v29  ;;  %v1657_v59 = vpop.f32.mrb[159].mxu1 }
 0x27f   : > { %v2482_v35 = vadd.f32 %v4275_v49, %v2361_v12  ;;  %v2545_v31 = vmax.f32 %v2481_v9, 0.0 }
 0x281   : > { %v2546_v54 = vmax.f32 %v2482_v35, 0.0 }
 0x282   : > { %v1660_v2 = vpop.f32.mrb[160].mxu1 }
 0x283   : > { %v3377_v32 = vpack.c.bf16 %v2546_v54, %v2545_v31  ;;  %v2366_v28 = vadd.f32 %v4401_v10, %v1660_v2  ;;  %v1662_v42 = vpop.f32.mrb[161].mxu1 }
 0x284   : > { %v1663_v27 = vpop.f32.mrb[162].mxu1 }
 0x285   : > { %3441 = vst [vmem:[%s4292_s11 + $0xb8] sm:$0xff] %v3377_v32   ;;  %v2483_v30 = vadd.f32 %v4275_v49, %v2366_v28  ;;  %v2369_v61 = vadd.f32 %v4406_v50, %v1663_v27  ;;  %v1665_v6 = vpop.f32.mrb[163].mxu1 }
 0x287   : > { %v2484_v62 = vadd.f32 %v4275_v49, %v2369_v61  ;;  %v2547_v37 = vmax.f32 %v2483_v30, 0.0 }
 0x289   : > { %v2548_v15 = vmax.f32 %v2484_v62, 0.0 }
 0x28a   : > { %v1668_v1 = vpop.f32.mrb[164].mxu1 }
 0x28b   : > { %v3382_v51 = vpack.c.bf16 %v2548_v15, %v2547_v37  ;;  %v2374_v56 = vadd.f32 %v4410_v25, %v1668_v1  ;;  %v1670_v44 = vpop.f32.mrb[165].mxu1 }
 0x28c   : > { %v1671_v3 = vpop.f32.mrb[166].mxu1 }
 0x28d   : > { %3442 = vst [vmem:[%s4292_s11 + $0xc0] sm:$0xff] %v3382_v51   ;;  %v2485_v10 = vadd.f32 %v4275_v49, %v2374_v56  ;;  %v2377_v38 = vadd.f32 %v4415_v8, %v1671_v3  ;;  %v1673_v16 = vpop.f32.mrb[167].mxu1 }
 0x28f   : > { %v2486_v50 = vadd.f32 %v4275_v49, %v2377_v38  ;;  %v2549_v36 = vmax.f32 %v2485_v10, 0.0 }
 0x291   : > { %v2550_v26 = vmax.f32 %v2486_v50, 0.0 }
 0x292   : > { %v1676_v48 = vpop.f32.mrb[168].mxu1 }
 0x293   : > { %v3387_v11 = vpack.c.bf16 %v2550_v26, %v2549_v36  ;;  %v2382_v60 = vadd.f32 %v4419_v52, %v1676_v48  ;;  %v1678_v45 = vpop.f32.mrb[169].mxu1 }
 0x294   : > { %v1679_v19 = vpop.f32.mrb[170].mxu1 }
 0x295   : > { %3443 = vst [vmem:[%s4292_s11 + $0xc8] sm:$0xff] %v3387_v11   ;;  %v2487_v25 = vadd.f32 %v4275_v49, %v2382_v60  ;;  %v2385_v17 = vadd.f32 %v4424_v57, %v1679_v19  ;;  %v1681_v39 = vpop.f32.mrb[171].mxu1 }
 0x297   : > { %v2488_v8 = vadd.f32 %v4275_v49, %v2385_v17  ;;  %v2551_v55 = vmax.f32 %v2487_v25, 0.0 }
 0x299   : > { %v2552_v0 = vmax.f32 %v2488_v8, 0.0 }
 0x29a   : > { %v1684_v4 = vpop.f32.mrb[172].mxu1 }
 0x29b   : > { %v3392_v20 = vpack.c.bf16 %v2552_v0, %v2551_v55  ;;  %v2390_v23 = vadd.f32 %v4428_v13, %v1684_v4  ;;  %v1686_v5 = vpop.f32.mrb[173].mxu1 }
 0x29c   : > { %v1687_v14 = vpop.f32.mrb[174].mxu1 }
 0x29d   : > { %3444 = vst [vmem:[%s4292_s11 + $0xd0] sm:$0xff] %v3392_v20   ;;  %v2489_v52 = vadd.f32 %v4275_v49, %v2390_v23  ;;  %v2393_v22 = vadd.f32 %v4433_v43, %v1687_v14  ;;  %v1689_v40 = vpop.f32.mrb[175].mxu1 }
 0x29f   : > { %v2490_v57 = vadd.f32 %v4275_v49, %v2393_v22  ;;  %v2553_v58 = vmax.f32 %v2489_v52, 0.0 }
 0x2a1   : > { %v2554_v7 = vmax.f32 %v2490_v57, 0.0 }
 0x2a2   : > { %v1692_v24 = vpop.f32.mrb[176].mxu1 }
 0x2a3   : > { %v3397_v41 = vpack.c.bf16 %v2554_v7, %v2553_v58  ;;  %v2398_v29 = vadd.f32 %v4437_v33, %v1692_v24  ;;  %v1694_v9 = vpop.f32.mrb[177].mxu1 }
 0x2a4   : > { %v1695_v12 = vpop.f32.mrb[178].mxu1 }
 0x2a5   : > { %3445 = vst [vmem:[%s4292_s11 + $0xd8] sm:$0xff] %v3397_v41   ;;  %v2491_v13 = vadd.f32 %v4275_v49, %v2398_v29  ;;  %v2401_v59 = vadd.f32 %v4442_v46, %v1695_v12  ;;  %v1697_v35 = vpop.f32.mrb[179].mxu1 }
 0x2a7   : > { %v2492_v43 = vadd.f32 %v4275_v49, %v2401_v59  ;;  %v2555_v31 = vmax.f32 %v2491_v13, 0.0 }
 0x2a9   : > { %v2556_v54 = vmax.f32 %v2492_v43, 0.0 }
 0x2aa   : > { %v1700_v2 = vpop.f32.mrb[180].mxu1 }
 0x2ab   : > { %v3402_v32 = vpack.c.bf16 %v2556_v54, %v2555_v31  ;;  %v2406_v28 = vadd.f32 %v4446_v34, %v1700_v2  ;;  %v1702_v42 = vpop.f32.mrb[181].mxu1 }
 0x2ac   : > { %v1703_v27 = vpop.f32.mrb[182].mxu1 }
 0x2ad   : > { %3446 = vst [vmem:[%s4292_s11 + $0xe0] sm:$0xff] %v3402_v32   ;;  %v2493_v33 = vadd.f32 %v4275_v49, %v2406_v28  ;;  %v2409_v30 = vadd.f32 %v4451_v63, %v1703_v27  ;;  %v1705_v61 = vpop.f32.mrb[183].mxu1 }
 0x2af   : > { %v2494_v46 = vadd.f32 %v4275_v49, %v2409_v30  ;;  %v2557_v6 = vmax.f32 %v2493_v33, 0.0 }
 0x2b1   : > { %v2558_v62 = vmax.f32 %v2494_v46, 0.0 }
 0x2b2   : > { %v1708_v37 = vpop.f32.mrb[184].mxu1 }
 0x2b3   : > { %v3407_v15 = vpack.c.bf16 %v2558_v62, %v2557_v6  ;;  %v2414_v1 = vadd.f32 %v4455_v21, %v1708_v37  ;;  %v1710_v51 = vpop.f32.mrb[185].mxu1 }
 0x2b4   : > { %v1711_v56 = vpop.f32.mrb[186].mxu1 }
 0x2b5   : > { %3447 = vst [vmem:[%s4292_s11 + $0xe8] sm:$0xff] %v3407_v15   ;;  %v2495_v34 = vadd.f32 %v4275_v49, %v2414_v1  ;;  %v2417_v44 = vadd.f32 %v4460_v18, %v1711_v56  ;;  %v1713_v3 = vpop.f32.mrb[187].mxu1 }
 0x2b7   : > { %v2496_v63 = vadd.f32 %v4275_v49, %v2417_v44  ;;  %v2559_v10 = vmax.f32 %v2495_v34, 0.0 }
 0x2b9   : > { %v2560_v38 = vmax.f32 %v2496_v63, 0.0 }
 0x2ba   : > { %v1716_v16 = vpop.f32.mrb[188].mxu1 }
 0x2bb   : > { %v3412_v50 = vpack.c.bf16 %v2560_v38, %v2559_v10  ;;  %v2422_v36 = vadd.f32 %v4464_v53, %v1716_v16  ;;  %v1718_v26 = vpop.f32.mrb[189].mxu1 }
 0x2bc   : > { %v1719_v48 = vpop.f32.mrb[190].mxu1 }
 0x2bd   : > { %3448 = vst [vmem:[%s4292_s11 + $0xf0] sm:$0xff] %v3412_v50   ;;  %v2497_v21 = vadd.f32 %v4275_v49, %v2422_v36  ;;  %v2425_v11 = vadd.f32 %v4469_v47, %v1719_v48  ;;  %v1721_v60 = vpop.f32.mrb[191].mxu1 }
 0x2bf   : > { %v2498_v18 = vadd.f32 %v4275_v49, %v2425_v11  ;;  %v2561_v45 = vmax.f32 %v2497_v21, 0.0 }
 0x2c1   : > { %v2562_v19 = vmax.f32 %v2498_v18, 0.0 }
 0x2c3   : > { %v3417_v25 = vpack.c.bf16 %v2562_v19, %v2561_v45 }
 0x2c5   : > { %3449 = vst [vmem:[%s4292_s11 + $0xf8] sm:$0xff] %v3417_v25  }
 0x2c6 PF: > { %s17_s24 = sadd.s32 1, %s3635_s24  }
 0x2c7   : > { %p14_p4 = scmp.ge.s32.totalorder %s17_s24, 6  }
 0x2c9   :  { %16 = sbr.rel (!%p14_p4) target bundleno = 1 (0x1), region = 81 }

// kernel: model_forward.3
= control target key start
LH: loop header
LB: loop body
LE: loop exit
PB: predicated region body
PF: predicated region fallthrough
CT: control target
= control target key end

     0   :  { %12 = vsyncpa [#allocation3], 0  ;;  %s4291_s0 = inlined_call_operand.vmem [shape: bf16[2,1024,128], index: 0, kind: input, shape index: {}]   ;;  %s4292_s1 = inlined_call_operand.vmem [shape: bf16[128,128], index: 1, kind: input, shape index: {}]   ;;  %s4293_s2 = inlined_call_operand.vmem [shape: f32[1,128], index: 2, kind: input, shape index: {}]   ;;  %s4294_s3 = inlined_call_operand.vmem [shape: bf16[128,128], index: 3, kind: input, shape index: {}]   ;;  %s4295_s4 = inlined_call_operand.vmem [shape: f32[1,128], index: 4, kind: input, shape index: {}]   ;;  %s4296_s5 = inlined_call_operand.vmem [shape: bf16[128,128], index: 5, kind: input, shape index: {}]   ;;  %s4297_s6 = inlined_call_operand.vmem [shape: f32[1,128], index: 6, kind: input, shape index: {}]   ;;  %s4298_s7 = inlined_call_operand.hbm [shape: f32[2,1024,128], index: 7, kind: output, shape index: {}]  }
   0x1   :  { %14 = vsyncpa [#allocation3 + $0x1], 0  ;;  %s2860_s24 = smov 0   ;;  %s2862_s25 = smov 0  }
   0x2   :  { %s2864_s26 = smov 0   ;;  %s2866_s27 = smov 0  }
   0x3 LB: > { %s2881_s28 = sadd.s32 4294967295, %s2813_s27   ;;  %s2031_s29 = sadd.s32 4294967294, %s2813_s27   ;;  %s2813_s27 = sphi %s2866_s27, %s4630_s27   ;;  %s2809_s26 = sphi %s2864_s26, %s4629_s26   ;;  %s2805_s25 = sphi %s2862_s25, %s4628_s25   ;;  %s2801_s24 = sphi %s2860_s24, %s4627_s24  }
   0x4   : > { %s2885_s30 = sadd.s32 1, %s2813_s27   ;;  %s179_s8 = sadd.s32 1, %s2809_s26 }
   0x5   : > { %s176_s9 = ssub.s32 %s2813_s27, %s2885_s30  ;;  %p189_p0 = scmp.ne.s32.totalorder %s2809_s26, %s2805_s25 }
   0x6   : > { %p177_p1 = scmp.eq.s32.totalorder %s176_s9, 0  ;;  %p190_p2 = scmp.eq.s32.totalorder %s2881_s28, 1 }
   0x7   : > { %p195_p3 = scmp.ne.s32.totalorder %s2805_s25, %s2801_s24  ;;  %p196_p4 = scmp.eq.s32.totalorder %s2031_s29, 1 }
   0x8   : > { %s2896_s10 = scalar_select %p177_p1, %s2809_s26, %s179_s8  }
   0x9   : > { %p2898_p5 = por %p190_p2, %p189_p0  ;;  %p2902_p6 = por %p196_p4, %p195_p3 }
   0xa   : > { %p2034_p7 = scmp.ge.s32.totalorder %s2813_s27, 1  ;;  %p240_p8 = scmp.lt.s32.totalorder %s2813_s27, 3 }
   0xc   : > { %p241_p9 = pnand %p2034_p7, %p240_p8 }
   0xe   : > { %244 = sbr.rel (%p241_p9) target bundleno = 1119 (0x45f), region = 48 }
  0x15   : > { %v2723_v0 = vld [vmem:[%s4292_s1] sm:$0xff]   ;;  %v4398_v1 = vmov 0.0   ;;  %v2724_v2 = vld [vmem:[%s4292_s1 + $0x8] sm:$0xff]   ;;  %vm2816_vm0 = vmmov 0   ;;  %v2725_v3 = vld [vmem:[%s4292_s1 + $0x10] sm:$0xff]   ;;  %p272_p10 = scmp.lt.s32.totalorder %s2881_s28, 1 }
  0x16   : > { %2480 = vmatprep.subr.bf16.mxu0 %v4398_v1  ;;  %2500 = vmatprep.subr.bf16.mxu1 %v4398_v1  ;;  %v2726_v4 = vld [vmem:[%s4292_s1 + $0x18] sm:$0xff]   ;;  %v2727_v5 = vld [vmem:[%s4292_s1 + $0x20] sm:$0xff]   ;;  %v2728_v6 = vld [vmem:[%s4292_s1 + $0x28] sm:$0xff]   ;;  %s269_s14 = sand.u32 1, %s2805_s25   ;;  %s2817_s8 = smov [#allocation2]  }
  0x17   : > { %2481 = vmatpush3.bf16.msra.mxu0 %v2723_v0  ;;  %2496 = vmatprep.mubr.msk.bf16.mxu0 %vm2816_vm0, %v4398_v1  ;;  %v2729_v7 = vld [vmem:[%s4292_s1 + $0x30] sm:$0xff]   ;;  %s273_s13 = scalar_select %p272_p10, %s2881_s28, 1  ;;  %v2730_v8 = vld [vmem:[%s4292_s1 + $0x38] sm:$0xff]  }
  0x18   : > { %2482 = vmatprep.subr.bf16.mxu0 %v4398_v1  ;;  %2516 = vmatprep.mubr.msk.bf16.mxu1 %vm2816_vm0, %v4398_v1  ;;  %s2035_s17 = sshll.u32 %s269_s14, 10  ;;  %s4250_s23 = scalar_lea.sflag [#allocation3], %s269_s14 }
  0x19   : > { %s2069_s16 = sshll.u32 %s273_s13, 9  ;;  %s3989_s18 = scalar_lea.vmem [#allocation2], %s2035_s17 }
  0x1a   : > { %s2948_s19 = scalar_lea.vmem %s4291_s0, %s2069_s16  ;;  %s1969_s20 = sshll.u32 %s3989_s18, 4  ;;  %s4240_s20 = int_to_ptr.vmem [resolvable:$true] %s1969_s20 }
  0x1b   : > { %2483 = vmatpush3.bf16.msra.mxu0 %v2724_v2  ;;  %v2951_v9 = vld [vmem:[%s2948_s19] sm:$0xff]   ;;  %v2954_v10 = vld [vmem:[%s2948_s19 + $0x8] sm:$0xff]   ;;  %v2960_v14 = vld [vmem:[%s2948_s19 + $0x10] sm:$0xff]   ;;  %s2751_s29 = scalar_lea.vmem %s4240_s20, 16384  ;;  %s2755_s9 = sshll.u32 %s2817_s8, 4  ;;  %s2756_s9 = int_to_ptr.vmem [resolvable:$false] %s2755_s9 }
  0x1c   : > { %2484 = vmatprep.subr.bf16.mxu0 %v4398_v1  ;;  %v4395_v11 = vunpack.c.l.bf16 %v2951_v9  ;;  %v4392_v12 = vunpack.c.h.bf16 %v2951_v9  ;;  %v4383_v13 = vunpack.c.l.bf16 %v2954_v10  ;;  %v4380_v15 = vunpack.c.h.bf16 %v2954_v10  ;;  %v2971_v19 = vld [vmem:[%s2948_s19 + $0x18] sm:$0xff]   ;;  %v2980_v24 = vld [vmem:[%s2948_s19 + $0x20] sm:$0xff]   ;;  %v2989_v29 = vld [vmem:[%s2948_s19 + $0x28] sm:$0xff]   ;;  %p2752_p11 = scmp.ne.s32.totalorder %s4240_s20, %s2751_s29  ;;  %s2757_s13 = scalar_lea.vmem %s2756_s9, 32768 }
  0x1d   : > { %v4372_v17 = vunpack.c.l.bf16 %v2960_v14  ;;  %v4370_v20 = vunpack.c.h.bf16 %v2960_v14  ;;  %v4361_v22 = vunpack.c.l.bf16 %v2971_v19  ;;  %v4358_v25 = vunpack.c.h.bf16 %v2971_v19  ;;  %v2998_v34 = vld [vmem:[%s2948_s19 + $0x30] sm:$0xff]   ;;  %v3007_v39 = vld [vmem:[%s2948_s19 + $0x38] sm:$0xff]   ;;  %v3016_v44 = vld [vmem:[%s2948_s19 + $0x40] sm:$0xff]   ;;  %p2758_p0 = scmp.lt.s32.totalorder %s4240_s20, %s2756_s9  ;;  %p2759_p1 = scmp.lt.s32.totalorder %s2757_s13, %s2751_s29 }
  0x1e   : > { %v534_v16 = vadd.f32 %v4392_v12, %v4395_v11  ;;  %v4354_v27 = vunpack.c.l.bf16 %v2980_v24  ;;  %v4353_v30 = vunpack.c.h.bf16 %v2980_v24  ;;  %v4352_v32 = vunpack.c.l.bf16 %v2989_v29  ;;  %v3025_v49 = vld [vmem:[%s2948_s19 + $0x48] sm:$0xff]   ;;  %v3034_v54 = vld [vmem:[%s2948_s19 + $0x50] sm:$0xff]   ;;  %v3043_v59 = vld [vmem:[%s2948_s19 + $0x58] sm:$0xff]   ;;  %p2753_p12 = pnand %p2752_p11, %p2898_p5 }
  0x1f   : > { %2485 = vmatpush3.bf16.msra.mxu0 %v2725_v3  ;;  %v4351_v35 = vunpack.c.h.bf16 %v2989_v29  ;;  %v4350_v37 = vunpack.c.l.bf16 %v2998_v34  ;;  %v4349_v40 = vunpack.c.h.bf16 %v2998_v34  ;;  %v4348_v42 = vunpack.c.l.bf16 %v3007_v39  ;;  %v3052_v0 = vld [vmem:[%s2948_s19 + $0x60] sm:$0xff]   ;;  %p2760_p2 = por %p2759_p1, %p2758_p0 }
  0x20   : > { %2486 = vmatprep.subr.bf16.mxu0 %v4398_v1  ;;  %v535_v18 = vadd.f32 %v4383_v13, %v534_v16  ;;  %v4347_v45 = vunpack.c.h.bf16 %v3007_v39  ;;  %v4345_v47 = vunpack.c.l.bf16 %v3016_v44  ;;  %v4344_v50 = vunpack.c.h.bf16 %v3016_v44  ;;  %p2754_p13 = pneg %p2753_p12 }
  0x21   : > { %v4341_v52 = vunpack.c.l.bf16 %v3025_v49  ;;  %v4338_v55 = vunpack.c.h.bf16 %v3025_v49  ;;  %v4335_v57 = vunpack.c.l.bf16 %v3034_v54  ;;  %v4332_v60 = vunpack.c.h.bf16 %v3034_v54 }
  0x22   : > { %v536_v21 = vadd.f32 %v4380_v15, %v535_v18  ;;  %v4329_v62 = vunpack.c.l.bf16 %v3043_v59  ;;  %v4326_v2 = vunpack.c.h.bf16 %v3043_v59  ;;  %p2761_p3 = pnand %p2760_p2, %p2754_p13 }
  0x23   : > { %2487 = vmatpush3.bf16.msra.mxu0 %v2726_v4  ;;  %v4323_v4 = vunpack.c.l.bf16 %v3052_v0 }
  0x24   : > { %2488 = vmatprep.subr.bf16.mxu0 %v4398_v1  ;;  %v537_v23 = vadd.f32 %v4372_v17, %v536_v21  ;;  %v3070_v21 = vld [vmem:[%s2948_s19 + $0x70] sm:$0xff]   ;;  %v3364_v17 = vld [vmem:[%s2948_s19 + $0x160] sm:$0xff]  }
  0x26   : > { %v538_v26 = vadd.f32 %v4370_v20, %v537_v23 }
  0x27   : > { %2489 = vmatpush3.bf16.msra.mxu0 %v2727_v5 }
  0x28   : > { %2490 = vmatprep.subr.bf16.mxu0 %v4398_v1  ;;  %v539_v28 = vadd.f32 %v4361_v22, %v538_v26 }
  0x2a   : > { %v540_v31 = vadd.f32 %v4358_v25, %v539_v28  ;;  %v4311_v28 = vunpack.c.l.bf16 %v3070_v21 }
  0x2b   : > { %2491 = vmatpush3.bf16.msra.mxu0 %v2728_v6  ;;  %v3061_v6 = vld [vmem:[%s2948_s19 + $0x68] sm:$0xff]  }
  0x2c   : > { %2492 = vmatprep.subr.bf16.mxu0 %v4398_v1  ;;  %v541_v33 = vadd.f32 %v4354_v27, %v540_v31  ;;  %v4317_v16 = vunpack.c.l.bf16 %v3061_v6  ;;  %v4314_v23 = vunpack.c.h.bf16 %v3061_v6  ;;  %v3289_v27 = vld [vmem:[%s2948_s19 + $0x130] sm:$0xff]  }
  0x2d   : > { %v4365_v25 = vunpack.c.h.bf16 %v3289_v27 }
  0x2e   : > { %v542_v36 = vadd.f32 %v4353_v30, %v541_v33  ;;  %v3079_v33 = vld [vmem:[%s2948_s19 + $0x78] sm:$0xff]  }
  0x2f   : > { %2493 = vmatpush3.bf16.msra.mxu0 %v2729_v7  ;;  %v4320_v7 = vunpack.c.h.bf16 %v3052_v0 }
  0x30   : > { %2494 = vmatprep.subr.bf16.mxu0 %v4398_v1  ;;  %v543_v38 = vadd.f32 %v4352_v32, %v542_v36  ;;  %v4308_v36 = vunpack.c.h.bf16 %v3070_v21 }
  0x32   : > { %v544_v41 = vadd.f32 %v4351_v35, %v543_v38  ;;  %v3277_v35 = vld [vmem:[%s2948_s19 + $0x128] sm:$0xff]  }
  0x33   : > { %2495 = vmatpush3.bf16.msra.mxu0 %v2730_v8  ;;  %v4360_v32 = vunpack.c.l.bf16 %v3277_v35 }
  0x34   : > { %v545_v43 = vadd.f32 %v4350_v37, %v544_v41  ;;  %v4305_v41 = vunpack.c.l.bf16 %v3079_v33 }
  0x36   : > { %v546_v46 = vadd.f32 %v4349_v40, %v545_v43 }
  0x38   : > { %v547_v48 = vadd.f32 %v4348_v42, %v546_v46  ;;  %v3088_v46 = vld [vmem:[%s2948_s19 + $0x80] sm:$0xff]  }
  0x39   : > { %v3268_v42 = vld [vmem:[%s2948_s19 + $0x120] sm:$0xff]  }
  0x3a   : > { %v548_v51 = vadd.f32 %v4347_v45, %v547_v48  ;;  %v4302_v48 = vunpack.c.h.bf16 %v3079_v33  ;;  %v4356_v40 = vunpack.c.l.bf16 %v3268_v42 }
  0x3c   : > { %v549_v53 = vadd.f32 %v4345_v47, %v548_v51  ;;  %v3259_v47 = vld [vmem:[%s2948_s19 + $0x118] sm:$0xff]  }
  0x3e   : > { %v550_v56 = vadd.f32 %v4344_v50, %v549_v53  ;;  %v4299_v53 = vunpack.c.l.bf16 %v3088_v46 }
  0x40   : > { %v551_v58 = vadd.f32 %v4341_v52, %v550_v56 }
  0x42   : > { %v552_v61 = vadd.f32 %v4338_v55, %v551_v58  ;;  %v3097_v58 = vld [vmem:[%s2948_s19 + $0x88] sm:$0xff]  }
  0x44   : > { %v553_v63 = vadd.f32 %v4335_v57, %v552_v61  ;;  %v4300_v61 = vunpack.c.h.bf16 %v3088_v46 }
  0x46   : > { %v554_v3 = vadd.f32 %v4332_v60, %v553_v63 }
  0x48   : > { %v555_v5 = vadd.f32 %v4329_v62, %v554_v3  ;;  %v4301_v3 = vunpack.c.l.bf16 %v3097_v58 }
  0x4a   : > { %v556_v8 = vadd.f32 %v4326_v2, %v555_v5 }
  0x4c   : > { %v557_v18 = vadd.f32 %v4323_v4, %v556_v8  ;;  %v3106_v8 = vld [vmem:[%s2948_s19 + $0x90] sm:$0xff]  }
  0x4e   : > { %v558_v26 = vadd.f32 %v4320_v7, %v557_v18  ;;  %v4303_v18 = vunpack.c.h.bf16 %v3097_v58 }
  0x50   : > { %v559_v31 = vadd.f32 %v4317_v16, %v558_v26 }
  0x52   : > { %v560_v38 = vadd.f32 %v4314_v23, %v559_v31  ;;  %v4304_v31 = vunpack.c.l.bf16 %v3106_v8 }
  0x54   : > { %v561_v43 = vadd.f32 %v4311_v28, %v560_v38 }
  0x56   : > { %v562_v51 = vadd.f32 %v4308_v36, %v561_v43  ;;  %v3115_v43 = vld [vmem:[%s2948_s19 + $0x98] sm:$0xff]  }
  0x58   : > { %v563_v56 = vadd.f32 %v4305_v41, %v562_v51  ;;  %v4306_v51 = vunpack.c.h.bf16 %v3106_v8 }
  0x5a   : > { %v564_v63 = vadd.f32 %v4302_v48, %v563_v56 }
  0x5c   : > { %v565_v5 = vadd.f32 %v4299_v53, %v564_v63  ;;  %v4307_v63 = vunpack.c.l.bf16 %v3115_v43 }
  0x5e   : > { %v566_v26 = vadd.f32 %v4300_v61, %v565_v5  ;;  %v3124_v5 = vld [vmem:[%s2948_s19 + $0xa0] sm:$0xff]   ;;  %v4309_v61 = vunpack.c.h.bf16 %v3115_v43 }
  0x60   : > { %v567_v38 = vadd.f32 %v4301_v3, %v566_v26  ;;  %v4310_v3 = vunpack.c.l.bf16 %v3124_v5 }
  0x62   : > { %v568_v56 = vadd.f32 %v4303_v18, %v567_v38  ;;  %v3133_v38 = vld [vmem:[%s2948_s19 + $0xa8] sm:$0xff]   ;;  %v4312_v18 = vunpack.c.h.bf16 %v3124_v5 }
  0x64   : > { %v569_v53 = vadd.f32 %v4304_v31, %v568_v56  ;;  %v4313_v31 = vunpack.c.l.bf16 %v3133_v38 }
  0x66   : > { %v570_v26 = vadd.f32 %v4306_v51, %v569_v53  ;;  %v3142_v53 = vld [vmem:[%s2948_s19 + $0xb0] sm:$0xff]   ;;  %v4315_v51 = vunpack.c.h.bf16 %v3133_v38 }
  0x68   : > { %v571_v48 = vadd.f32 %v4307_v63, %v570_v26  ;;  %v4316_v63 = vunpack.c.l.bf16 %v3142_v53 }
  0x6a   : > { %v572_v56 = vadd.f32 %v4309_v61, %v571_v48  ;;  %v3151_v48 = vld [vmem:[%s2948_s19 + $0xb8] sm:$0xff]   ;;  %v4318_v61 = vunpack.c.h.bf16 %v3142_v53 }
  0x6b   : > { %4464 = vst [vmem:[#allocation5_spill] sm:$0xff] %v3151_v48 }
  0x6c   : > { %v573_v41 = vadd.f32 %v4310_v3, %v572_v56  ;;  %v4319_v3 = vunpack.c.l.bf16 %v3151_v48 }
  0x6e   : > { %v574_v26 = vadd.f32 %v4312_v18, %v573_v41  ;;  %v3160_v41 = vld [vmem:[%s2948_s19 + $0xc0] sm:$0xff]   ;;  %v4321_v18 = vunpack.c.h.bf16 %v3151_v48 }
  0x6f   : > { %4465 = vst [vmem:[#allocation6_spill] sm:$0xff] %v3160_v41 }
  0x70   : > { %v575_v36 = vadd.f32 %v4313_v31, %v574_v26  ;;  %v4322_v31 = vunpack.c.l.bf16 %v3160_v41 }
  0x72   : > { %v576_v56 = vadd.f32 %v4315_v51, %v575_v36  ;;  %v3169_v36 = vld [vmem:[%s2948_s19 + $0xc8] sm:$0xff]   ;;  %v4324_v51 = vunpack.c.h.bf16 %v3160_v41  ;;  %v3526_v41 = vld [vmem:[%s2948_s19 + $0x1f0] sm:$0xff]  }
  0x73   : > { %4466 = vst [vmem:[#allocation7_spill] sm:$0xff] %v3169_v36 }
  0x74   : > { %v577_v28 = vadd.f32 %v4316_v63, %v576_v56  ;;  %v4325_v63 = vunpack.c.l.bf16 %v3169_v36 }
  0x76   : > { %v578_v26 = vadd.f32 %v4318_v61, %v577_v28  ;;  %v3178_v28 = vld [vmem:[%s2948_s19 + $0xd0] sm:$0xff]   ;;  %v4327_v61 = vunpack.c.h.bf16 %v3169_v36 }
  0x77   : > { %4467 = vst [vmem:[#allocation8_spill] sm:$0xff] %v3178_v28 }
  0x78   : > { %v579_v23 = vadd.f32 %v4319_v3, %v578_v26  ;;  %v4328_v3 = vunpack.c.l.bf16 %v3178_v28 }
  0x7a   : > { %v580_v56 = vadd.f32 %v4321_v18, %v579_v23  ;;  %v3187_v23 = vld [vmem:[%s2948_s19 + $0xd8] sm:$0xff]   ;;  %v4330_v18 = vunpack.c.h.bf16 %v3178_v28 }
  0x7b   : > { %4468 = vst [vmem:[#allocation9_spill] sm:$0xff] %v3187_v23 }
  0x7c   : > { %v581_v16 = vadd.f32 %v4322_v31, %v580_v56  ;;  %v4331_v31 = vunpack.c.l.bf16 %v3187_v23 }
  0x7e   : > { %v582_v26 = vadd.f32 %v4324_v51, %v581_v16  ;;  %v3196_v16 = vld [vmem:[%s2948_s19 + $0xe0] sm:$0xff]   ;;  %v4333_v51 = vunpack.c.h.bf16 %v3187_v23 }
  0x7f   : > { %4469 = vst [vmem:[#allocation10_spill] sm:$0xff] %v3196_v16 }
  0x80   : > { %v583_v7 = vadd.f32 %v4325_v63, %v582_v26  ;;  %v4334_v63 = vunpack.c.l.bf16 %v3196_v16 }
  0x82   : > { %v584_v56 = vadd.f32 %v4327_v61, %v583_v7  ;;  %v3205_v7 = vld [vmem:[%s2948_s19 + $0xe8] sm:$0xff]   ;;  %v4336_v61 = vunpack.c.h.bf16 %v3196_v16 }
  0x83   : > { %4470 = vst [vmem:[#allocation11_spill] sm:$0xff] %v3205_v7 }
  0x84   : > { %v585_v4 = vadd.f32 %v4328_v3, %v584_v56  ;;  %v4337_v3 = vunpack.c.l.bf16 %v3205_v7 }
  0x86   : > { %v586_v26 = vadd.f32 %v4330_v18, %v585_v4  ;;  %v3214_v4 = vld [vmem:[%s2948_s19 + $0xf0] sm:$0xff]   ;;  %v4339_v18 = vunpack.c.h.bf16 %v3205_v7 }
  0x87   : > { %4471 = vst [vmem:[#allocation12_spill] sm:$0xff] %v3214_v4 }
  0x88   : > { %v587_v2 = vadd.f32 %v4331_v31, %v586_v26  ;;  %v4340_v31 = vunpack.c.l.bf16 %v3214_v4 }
  0x8a   : > { %v588_v56 = vadd.f32 %v4333_v51, %v587_v2  ;;  %v3223_v2 = vld [vmem:[%s2948_s19 + $0xf8] sm:$0xff]   ;;  %v4342_v51 = vunpack.c.h.bf16 %v3214_v4 }
  0x8b   : > { %4472 = vst [vmem:[#allocation13_spill] sm:$0xff] %v3223_v2 }
  0x8c   : > { %v589_v62 = vadd.f32 %v4334_v63, %v588_v56  ;;  %v4343_v63 = vunpack.c.l.bf16 %v3223_v2 }
  0x8e   : > { %v590_v26 = vadd.f32 %v4336_v61, %v589_v62  ;;  %v3232_v62 = vld [vmem:[%s2948_s19 + $0x100] sm:$0xff]   ;;  %v4346_v61 = vunpack.c.h.bf16 %v3223_v2 }
  0x90   : > { %v591_v60 = vadd.f32 %v4337_v3, %v590_v26  ;;  %v4389_v3 = vunpack.c.l.bf16 %v3232_v62 }
  0x92   : > { %v592_v56 = vadd.f32 %v4339_v18, %v591_v60  ;;  %v3241_v60 = vld [vmem:[%s2948_s19 + $0x108] sm:$0xff]   ;;  %v4386_v18 = vunpack.c.h.bf16 %v3232_v62 }
  0x94   : > { %v593_v57 = vadd.f32 %v4340_v31, %v592_v56  ;;  %v4377_v31 = vunpack.c.l.bf16 %v3241_v60 }
  0x96   : > { %v594_v26 = vadd.f32 %v4342_v51, %v593_v57  ;;  %v3250_v57 = vld [vmem:[%s2948_s19 + $0x110] sm:$0xff]   ;;  %v4374_v51 = vunpack.c.h.bf16 %v3241_v60 }
  0x98   : > { %v595_v55 = vadd.f32 %v4343_v63, %v594_v26  ;;  %v4367_v63 = vunpack.c.l.bf16 %v3250_v57 }
  0x9a   : > { %v596_v56 = vadd.f32 %v4346_v61, %v595_v55  ;;  %v4364_v55 = vunpack.c.h.bf16 %v3250_v57  ;;  %v4355_v61 = vunpack.c.l.bf16 %v3259_v47 }
  0x9c   : > { %v597_v52 = vadd.f32 %v4389_v3, %v596_v56 }
  0x9e   : > { %v598_v26 = vadd.f32 %v4386_v18, %v597_v52  ;;  %v4357_v52 = vunpack.c.h.bf16 %v3259_v47 }
  0xa0   : > { %v599_v50 = vadd.f32 %v4377_v31, %v598_v26 }
  0xa2   : > { %v600_v56 = vadd.f32 %v4374_v51, %v599_v50  ;;  %v4359_v50 = vunpack.c.h.bf16 %v3268_v42  ;;  %v4382_v51 = vunpack.c.l.bf16 %v3364_v17 }
  0xa4   : > { %v601_v45 = vadd.f32 %v4367_v63, %v600_v56 }
  0xa6   : > { %v602_v26 = vadd.f32 %v4364_v55, %v601_v45  ;;  %v2731_v45 = vld [vmem:[%s4294_s3] sm:$0xff]  }
  0xa7   : > { %2501 = vmatpush3.bf16.msra.mxu1 %v2731_v45  ;;  %v2733_v45 = vld [vmem:[%s4294_s3 + $0x10] sm:$0xff]  }
  0xa8   : > { %v603_v37 = vadd.f32 %v4355_v61, %v602_v26  ;;  %v4362_v26 = vunpack.c.h.bf16 %v3277_v35  ;;  %2502 = vmatprep.subr.bf16.mxu1 %v4398_v1 }
  0xaa   : > { %v604_v56 = vadd.f32 %v4357_v52, %v603_v37  ;;  %v2732_v37 = vld [vmem:[%s4294_s3 + $0x8] sm:$0xff]   ;;  %v3302_v52 = vld [vmem:[%s2948_s19 + $0x138] sm:$0xff]  }
  0xab   : > { %2503 = vmatpush3.bf16.msra.mxu1 %v2732_v37  ;;  %v4368_v22 = vunpack.c.h.bf16 %v3302_v52  ;;  %v2734_v37 = vld [vmem:[%s4294_s3 + $0x18] sm:$0xff]  }
  0xac   : > { %v605_v30 = vadd.f32 %v4356_v40, %v604_v56  ;;  %v4363_v56 = vunpack.c.l.bf16 %v3289_v27  ;;  %2504 = vmatprep.subr.bf16.mxu1 %v4398_v1 }
  0xae   : > { %v606_v61 = vadd.f32 %v4359_v50, %v605_v30  ;;  %v4366_v50 = vunpack.c.l.bf16 %v3302_v52 }
  0xaf   : > { %2505 = vmatpush3.bf16.msra.mxu1 %v2733_v45  ;;  %v2735_v45 = vld [vmem:[%s4294_s3 + $0x20] sm:$0xff]  }
  0xb0   : > { %v607_v40 = vadd.f32 %v4360_v32, %v606_v61  ;;  %v3315_v32 = vld [vmem:[%s2948_s19 + $0x140] sm:$0xff]   ;;  %2506 = vmatprep.subr.bf16.mxu1 %v4398_v1 }
  0xb1   : > { %v4371_v55 = vunpack.c.h.bf16 %v3315_v32 }
  0xb2   : > { %v608_v30 = vadd.f32 %v4362_v26, %v607_v40  ;;  %v4369_v26 = vunpack.c.l.bf16 %v3315_v32 }
  0xb3   : > { %2507 = vmatpush3.bf16.msra.mxu1 %v2734_v37  ;;  %v2736_v37 = vld [vmem:[%s4294_s3 + $0x28] sm:$0xff]  }
  0xb4   : > { %v609_v61 = vadd.f32 %v4363_v56, %v608_v30  ;;  %v3328_v56 = vld [vmem:[%s2948_s19 + $0x148] sm:$0xff]   ;;  %2508 = vmatprep.subr.bf16.mxu1 %v4398_v1 }
  0xb5   : > { %v4375_v63 = vunpack.c.h.bf16 %v3328_v56 }
  0xb6   : > { %v610_v40 = vadd.f32 %v4365_v25, %v609_v61  ;;  %v4373_v25 = vunpack.c.l.bf16 %v3328_v56 }
  0xb7   : > { %2509 = vmatpush3.bf16.msra.mxu1 %v2735_v45 }
  0xb8   : > { %v611_v30 = vadd.f32 %v4366_v50, %v610_v40  ;;  %v3341_v50 = vld [vmem:[%s2948_s19 + $0x150] sm:$0xff]   ;;  %2510 = vmatprep.subr.bf16.mxu1 %v4398_v1 }
  0xb9   : > { %v4378_v20 = vunpack.c.h.bf16 %v3341_v50 }
  0xba   : > { %v612_v61 = vadd.f32 %v4368_v22, %v611_v30  ;;  %v4376_v22 = vunpack.c.l.bf16 %v3341_v50 }
  0xbb   : > { %2511 = vmatpush3.bf16.msra.mxu1 %v2736_v37 }
  0xbc   : > { %v613_v40 = vadd.f32 %v4369_v26, %v612_v61  ;;  %v3354_v26 = vld [vmem:[%s2948_s19 + $0x158] sm:$0xff]   ;;  %2512 = vmatprep.subr.bf16.mxu1 %v4398_v1 }
  0xbe   : > { %v614_v30 = vadd.f32 %v4371_v55, %v613_v40  ;;  %v4379_v40 = vunpack.c.l.bf16 %v3354_v26 }
  0xc0   : > { %v615_v61 = vadd.f32 %v4373_v25, %v614_v30  ;;  %v4381_v30 = vunpack.c.h.bf16 %v3354_v26 }
  0xc2   : > { %v616_v45 = vadd.f32 %v4375_v63, %v615_v61  ;;  %v3373_v61 = vld [vmem:[%s2948_s19 + $0x168] sm:$0xff]   ;;  %v4384_v63 = vunpack.c.h.bf16 %v3364_v17 }
  0xc4   : > { %v617_v55 = vadd.f32 %v4376_v22, %v616_v45  ;;  %v4385_v22 = vunpack.c.l.bf16 %v3373_v61 }
  0xc6   : > { %v618_v25 = vadd.f32 %v4378_v20, %v617_v55  ;;  %v3382_v55 = vld [vmem:[%s2948_s19 + $0x170] sm:$0xff]   ;;  %v4387_v20 = vunpack.c.h.bf16 %v3373_v61 }
  0xc8   : > { %v619_v37 = vadd.f32 %v4379_v40, %v618_v25  ;;  %v4388_v40 = vunpack.c.l.bf16 %v3382_v55 }
  0xca   : > { %v620_v45 = vadd.f32 %v4381_v30, %v619_v37  ;;  %v3391_v37 = vld [vmem:[%s2948_s19 + $0x178] sm:$0xff]   ;;  %v4390_v30 = vunpack.c.h.bf16 %v3382_v55 }
  0xcc   : > { %v621_v31 = vadd.f32 %v4382_v51, %v620_v45  ;;  %v4391_v51 = vunpack.c.l.bf16 %v3391_v37 }
  0xce   : > { %v622_v25 = vadd.f32 %v4384_v63, %v621_v31  ;;  %v3400_v31 = vld [vmem:[%s2948_s19 + $0x180] sm:$0xff]   ;;  %v4393_v63 = vunpack.c.h.bf16 %v3391_v37 }
  0xd0   : > { %v623_v15 = vadd.f32 %v4385_v22, %v622_v25  ;;  %v4394_v22 = vunpack.c.l.bf16 %v3400_v31 }
  0xd2   : > { %v624_v45 = vadd.f32 %v4387_v20, %v623_v15  ;;  %v3409_v15 = vld [vmem:[%s2948_s19 + $0x188] sm:$0xff]   ;;  %v4396_v20 = vunpack.c.h.bf16 %v3400_v31 }
  0xd4   : > { %v625_v13 = vadd.f32 %v4388_v40, %v624_v45  ;;  %v4397_v40 = vunpack.c.l.bf16 %v3409_v15 }
  0xd6   : > { %v626_v25 = vadd.f32 %v4390_v30, %v625_v13  ;;  %v3418_v13 = vld [vmem:[%s2948_s19 + $0x190] sm:$0xff]   ;;  %v4399_v30 = vunpack.c.h.bf16 %v3409_v15 }
  0xd8   : > { %v627_v18 = vadd.f32 %v4391_v51, %v626_v25  ;;  %v4400_v51 = vunpack.c.l.bf16 %v3418_v13 }
  0xda   : > { %v628_v45 = vadd.f32 %v4393_v63, %v627_v18  ;;  %v3427_v18 = vld [vmem:[%s2948_s19 + $0x198] sm:$0xff]   ;;  %v4403_v63 = vunpack.c.h.bf16 %v3418_v13 }
  0xdc   : > { %v629_v3 = vadd.f32 %v4394_v22, %v628_v45  ;;  %v4404_v22 = vunpack.c.l.bf16 %v3427_v18 }
  0xde   : > { %v630_v25 = vadd.f32 %v4396_v20, %v629_v3  ;;  %v3436_v3 = vld [vmem:[%s2948_s19 + $0x1a0] sm:$0xff]   ;;  %v4407_v20 = vunpack.c.h.bf16 %v3427_v18 }
  0xe0   : > { %v631_v12 = vadd.f32 %v4397_v40, %v630_v25  ;;  %v4408_v40 = vunpack.c.l.bf16 %v3436_v3 }
  0xe2   : > { %v632_v45 = vadd.f32 %v4399_v30, %v631_v12  ;;  %v3445_v12 = vld [vmem:[%s2948_s19 + $0x1a8] sm:$0xff]   ;;  %v4411_v30 = vunpack.c.h.bf16 %v3436_v3 }
  0xe4   : > { %v633_v11 = vadd.f32 %v4400_v51, %v632_v45  ;;  %v4412_v51 = vunpack.c.l.bf16 %v3445_v12 }
  0xe6   : > { %v634_v25 = vadd.f32 %v4403_v63, %v633_v11  ;;  %v3454_v11 = vld [vmem:[%s2948_s19 + $0x1b0] sm:$0xff]   ;;  %v4415_v63 = vunpack.c.h.bf16 %v3445_v12 }
  0xe7   : > { %4473 = vst [vmem:[#allocation14_spill] sm:$0xff] %v3454_v11 }
  0xe8   : > { %v635_v1 = vadd.f32 %v4404_v22, %v634_v25  ;;  %v4416_v22 = vunpack.c.l.bf16 %v3454_v11 }
  0xea   : > { %v636_v45 = vadd.f32 %v4407_v20, %v635_v1  ;;  %v3463_v1 = vld [vmem:[%s2948_s19 + $0x1b8] sm:$0xff]   ;;  %v4419_v20 = vunpack.c.h.bf16 %v3454_v11 }
  0xeb   : > { %4474 = vst [vmem:[#allocation15_spill] sm:$0xff] %v3463_v1 }
  0xec   : > { %v637_v2 = vadd.f32 %v4408_v40, %v636_v45  ;;  %v4420_v40 = vunpack.c.l.bf16 %v3463_v1 }
  0xee   : > { %v638_v25 = vadd.f32 %v4411_v30, %v637_v2  ;;  %v3472_v2 = vld [vmem:[%s2948_s19 + $0x1c0] sm:$0xff]   ;;  %v4423_v30 = vunpack.c.h.bf16 %v3463_v1 }
  0xef   : > { %4475 = vst [vmem:[#allocation16_spill] sm:$0xff] %v3472_v2 }
  0xf0   : > { %v639_v4 = vadd.f32 %v4412_v51, %v638_v25  ;;  %v4424_v51 = vunpack.c.l.bf16 %v3472_v2 }
  0xf2   : > { %v640_v45 = vadd.f32 %v4415_v63, %v639_v4  ;;  %v3481_v4 = vld [vmem:[%s2948_s19 + $0x1c8] sm:$0xff]   ;;  %v4427_v63 = vunpack.c.h.bf16 %v3472_v2 }
  0xf3   : > { %4476 = vst [vmem:[#allocation17_spill] sm:$0xff] %v3481_v4 }
  0xf4   : > { %v641_v7 = vadd.f32 %v4416_v22, %v640_v45  ;;  %v4428_v22 = vunpack.c.l.bf16 %v3481_v4 }
  0xf6   : > { %v642_v25 = vadd.f32 %v4419_v20, %v641_v7  ;;  %v3490_v7 = vld [vmem:[%s2948_s19 + $0x1d0] sm:$0xff]   ;;  %v4434_v20 = vunpack.c.h.bf16 %v3481_v4  ;;  %v3517_v4 = vld [vmem:[%s2948_s19 + $0x1e8] sm:$0xff]  }
  0xf7   : > { %4477 = vst [vmem:[#allocation18_spill] sm:$0xff] %v3490_v7  ;;  %4480 = vst [vmem:[#allocation21_spill] sm:$0xff] %v3517_v4 }
  0xf8   : > { %v643_v16 = vadd.f32 %v4420_v40, %v642_v25  ;;  %v4433_v40 = vunpack.c.l.bf16 %v3490_v7 }
  0xfa   : > { %v644_v45 = vadd.f32 %v4423_v30, %v643_v16  ;;  %v3499_v16 = vld [vmem:[%s2948_s19 + $0x1d8] sm:$0xff]   ;;  %v4437_v30 = vunpack.c.h.bf16 %v3490_v7 }
  0xfb   : > { %4478 = vst [vmem:[#allocation19_spill] sm:$0xff] %v3499_v16  ;;  %v3535_v7 = vld [vmem:[%s2948_s19 + $0x1f8] sm:$0xff]  }
  0xfc   : > { %v645_v23 = vadd.f32 %v4424_v51, %v644_v45  ;;  %v4438_v51 = vunpack.c.l.bf16 %v3499_v16 }
  0xfe   : > { %v646_v25 = vadd.f32 %v4427_v63, %v645_v23  ;;  %v3508_v23 = vld [vmem:[%s2948_s19 + $0x1e0] sm:$0xff]   ;;  %v4441_v63 = vunpack.c.h.bf16 %v3499_v16  ;;  %s2070_s19 = sshll.u32 %s2881_s28, 14 }
  0xff   : > { %4479 = vst [vmem:[#allocation20_spill] sm:$0xff] %v3508_v23  ;;  %s4238_s22 = scalar_lea.hbm %s4298_s7, %s2070_s19 }
 0x100   : > { %v647_v28 = vadd.f32 %v4428_v22, %v646_v25  ;;  %v4442_v22 = vunpack.c.l.bf16 %v3508_v23 }
 0x102   : > { %v648_v45 = vadd.f32 %v4434_v20, %v647_v28  ;;  %v4446_v28 = vunpack.c.h.bf16 %v3508_v23  ;;  %v4458_v23 = vunpack.c.h.bf16 %v3535_v7 }
 0x104   : > { %v649_v36 = vadd.f32 %v4433_v40, %v648_v45  ;;  %v4445_v40 = vunpack.c.l.bf16 %v3517_v4 }
 0x106   : > { %v650_v25 = vadd.f32 %v4437_v30, %v649_v36  ;;  %v4451_v36 = vunpack.c.h.bf16 %v3517_v4 }
 0x108   : > { %v651_v2 = vadd.f32 %v4438_v51, %v650_v25  ;;  %v4461_v25 = vunpack.c.l.bf16 %v3526_v41 }
 0x10a   : > { %v652_v45 = vadd.f32 %v4441_v63, %v651_v2  ;;  %v4460_v2 = vunpack.c.h.bf16 %v3526_v41 }
 0x10c   : > { %v653_v20 = vadd.f32 %v4442_v22, %v652_v45  ;;  %v4459_v45 = vunpack.c.l.bf16 %v3535_v7 }
 0x10e   : > { %v654_v30 = vadd.f32 %v4446_v28, %v653_v20 }
 0x110   : > { %v655_v51 = vadd.f32 %v4445_v40, %v654_v30 }
 0x112   : > { %v656_v63 = vadd.f32 %v4451_v36, %v655_v51 }
 0x114   : > { %v657_v22 = vadd.f32 %v4461_v25, %v656_v63  ;;  %v2737_v63 = vld [vmem:[%s4294_s3 + $0x30] sm:$0xff]   ;;  %v4492_v25 = vunpack.c.l.bf16 %v3250_v57 }
 0x115   : > { %2513 = vmatpush3.bf16.msra.mxu1 %v2737_v63  ;;  %v2741_v63 = vld [vmem:[%s4296_s5 + $0x10] sm:$0xff]  }
 0x116   : > { %v658_v20 = vadd.f32 %v4460_v2, %v657_v22  ;;  %v4481_v22 = vmov 0.0  }
 0x117   : > { %2514 = vmatprep.subr.bf16.mxu1 %v4481_v22  ;;  %v2742_v22 = vld [vmem:[%s4296_s5 + $0x18] sm:$0xff]  }
 0x118   : > { %v659_v30 = vadd.f32 %v4459_v45, %v658_v20  ;;  %v2738_v20 = vld [vmem:[%s4294_s3 + $0x38] sm:$0xff]  }
 0x119   : > { %2515 = vmatpush3.bf16.msra.mxu1 %v2738_v20  ;;  %v2743_v20 = vld [vmem:[%s4296_s5 + $0x20] sm:$0xff]  }
 0x11a   : > { %v660_v40 = vadd.f32 %v4458_v23, %v659_v30  ;;  %v2739_v30 = vld [vmem:[%s4296_s5] sm:$0xff]  }
 0x11b   : > { %2520 = vmatprep.subr.bf16.mxu0 %v2739_v30  ;;  %2664 = vmatprep.subr.bf16.mxu1 %v2739_v30 }
 0x11c   : > { %v661_v28 = vrot.slane %v660_v40, 4 }
 0x11e   : > { %v662_v16 = vadd.f32 %v661_v28, %v660_v40  ;;  %v685_v40 = vld [vmem:[%s4293_s2] sm:$0x1] }
 0x120   : > { %v663_v4 = vrot.slane %v662_v16, 2 }
 0x122   : > { %v664_v51 = vadd.f32 %v663_v4, %v662_v16 }
 0x124   : > { %v665_v36 = vrot.slane %v664_v51, 1 }
 0x126   : > { %v666_v1 = vadd.f32 %v665_v36, %v664_v51  ;;  %v2740_v51 = vld [vmem:[%s4296_s5 + $0x8] sm:$0xff]  }
 0x128   : > { %v667_v48 = vmul.f32 0.0009765625, %v666_v1 }
 0x12a   : > { %v668_v11 = vpack.c.bf16 %v667_v48, %v667_v48 }
 0x12c   : > { %2497 = vmatmul.mubr.bf16.vlgmr.msra.gmra.mrb[0].mxu0 %v668_v11 }
 0x12d   : > { %2521 = vmatpush3.bf16.msra.mxu0 %v2739_v30 }
 0x12e   : > { %2522 = vmatprep.subr.bf16.mxu0 %v2740_v51 }
 0x131   : > { %2523 = vmatpush3.bf16.msra.mxu0 %v2740_v51 }
 0x132   : > { %2524 = vmatprep.subr.bf16.mxu0 %v2741_v63 }
 0x135   : > { %2525 = vmatpush3.bf16.msra.mxu0 %v2741_v63 }
 0x136   : > { %2526 = vmatprep.subr.bf16.mxu0 %v2742_v22 }
 0x139   : > { %2527 = vmatpush3.bf16.msra.mxu0 %v2742_v22 }
 0x13a   : > { %2528 = vmatprep.subr.bf16.mxu0 %v2743_v20 }
 0x13d   : > { %2529 = vmatpush3.bf16.msra.mxu0 %v2743_v20 }
 0x1ff   : > { %v768_v4 = vpop.f32.mrb[0].mxu0 }
 0x200   : > { %v769_v1 = vadd.f32 %v768_v4, %v685_v40  ;;  %v2498_v48 = vpop.f32.mrb[1].mxu0  ;;  %v2744_v40 = vld [vmem:[%s4296_s5 + $0x28] sm:$0xff]   ;;  %v2745_v4 = vld [vmem:[%s4296_s5 + $0x30] sm:$0xff]  }
 0x201   : > { %v771_v11 = vpop.f32.mrb[2].mxu0  ;;  %2530 = vmatprep.subr.bf16.mxu0 %v2744_v40  ;;  %v792_v48 = vld [vmem:[%s4295_s4] sm:$0x1] }
 0x202   : > { %v774_v16 = vmax.f32 %v769_v1, 0.0  ;;  %v2499_v28 = vpop.f32.mrb[3].mxu0  ;;  %2531 = vmatpush3.bf16.msra.mxu0 %v2744_v40  ;;  %v2746_v1 = vld [vmem:[%s4296_s5 + $0x38] sm:$0xff]  }
 0x203   : > { %2532 = vmatprep.subr.bf16.mxu0 %v2745_v4 }
 0x204   : > { %v775_v36 = vpack.c.bf16 %v774_v16, %v774_v16 }
 0x206   : > { %2517 = vmatmul.mubr.bf16.vlgmr.msra.gmra.mrb[0].mxu1 %v775_v36  ;;  %2533 = vmatpush3.bf16.msra.mxu0 %v2745_v4 }
 0x207   : > { %2672 = vmatpush3.bf16.msra.mxu1 %v2739_v30  ;;  %2534 = vmatprep.subr.bf16.mxu0 %v2746_v1 }
 0x208   : > { %2665 = vmatprep.subr.bf16.mxu1 %v2740_v51 }
 0x20a   : > { %2535 = vmatpush3.bf16.msra.mxu0 %v2746_v1 }
 0x20b   : > { %2673 = vmatpush3.bf16.msra.mxu1 %v2740_v51 }
 0x20c   : > { %2666 = vmatprep.subr.bf16.mxu1 %v2741_v63 }
 0x20f   : > { %2674 = vmatpush3.bf16.msra.mxu1 %v2741_v63 }
 0x210   : > { %2667 = vmatprep.subr.bf16.mxu1 %v2742_v22 }
 0x213   : > { %2675 = vmatpush3.bf16.msra.mxu1 %v2742_v22 }
 0x214   : > { %2668 = vmatprep.subr.bf16.mxu1 %v2743_v20 }
 0x217   : > { %2676 = vmatpush3.bf16.msra.mxu1 %v2743_v20  ;;  %v887_v20 = vlaneseq }
 0x218   : > { %2669 = vmatprep.subr.bf16.mxu1 %v2744_v40 }
 0x21b   : > { %2677 = vmatpush3.bf16.msra.mxu1 %v2744_v40  ;;  %v888_v40 = vshrl.u32 %v887_v20, 7 }
 0x21c   : > { %2670 = vmatprep.subr.bf16.mxu1 %v2745_v4 }
 0x21f   : > { %2678 = vmatpush3.bf16.msra.mxu1 %v2745_v4  ;;  %v889_v4 = vsub.s32 0, %v888_v40  ;;  %v4489_v40 = vunpack.c.h.bf16 %v3241_v60 }
 0x220   : > { %2671 = vmatprep.subr.bf16.mxu1 %v2746_v1 }
 0x223   : > { %2679 = vmatpush3.bf16.msra.mxu1 %v2746_v1  ;;  %v4482_v1 = vunpack.c.l.bf16 %v2951_v9 }
 0x2d9   : > { %v875_v11 = vpop.f32.mrb[0].mxu1 }
 0x2da   : > { %v876_v16 = vadd.f32 %v875_v11, %v792_v48  ;;  %v2518_v28 = vpop.f32.mrb[1].mxu1  ;;  %v4483_v48 = vunpack.c.h.bf16 %v2951_v9  ;;  %v4488_v9 = vunpack.c.l.bf16 %v3241_v60  ;;  %v4493_v60 = vunpack.c.h.bf16 %v3250_v57 }
 0x2db   : > { %v878_v36 = vpop.f32.mrb[2].mxu1  ;;  %v4496_v57 = vunpack.c.l.bf16 %v3259_v47 }
 0x2dc   : > { %v2054_v30 = vmul.f32 -1.442695, %v876_v16  ;;  %v2519_v51 = vpop.f32.mrb[3].mxu1  ;;  %v4484_v16 = vunpack.c.l.bf16 %v3232_v62  ;;  %v4485_v36 = vunpack.c.h.bf16 %v3232_v62  ;;  %v4490_v62 = vunpack.c.l.bf16 %v2960_v14 }
 0x2de   : > { %2747 = vpow2.f32 %v2054_v30 }
 0x2e8   : > { %v2748_v63 = vpop.eup %2747 }
 0x2e9   : > { %v884_v22 = vadd.f32 1.0, %v2748_v63  ;;  %v4487_v63 = vunpack.c.h.bf16 %v2954_v10 }
 0x2eb   : > { %2749 = vrcp.f32 %v884_v22 }
 0x2f5   : > { %v2750_v23 = vpop.eup %2749 }
 0x2f6   : > { %v3587_v45 = vrot.slane %v2750_v23, %v889_v4  ;;  %v4486_v23 = vunpack.c.l.bf16 %v2954_v10 }
 0x2f8   : > { %v891_v2 = vmul.f32 %v4482_v1, %v3587_v45  ;;  %v892_v11 = vmul.f32 %v4483_v48, %v3587_v45  ;;  %v955_v28 = vmul.f32 %v4484_v16, %v3587_v45  ;;  %v956_v30 = vmul.f32 %v4485_v36, %v3587_v45 }
 0x2f9   : > { %v893_v51 = vmul.f32 %v4486_v23, %v3587_v45  ;;  %v894_v22 = vmul.f32 %v4487_v63, %v3587_v45  ;;  %v957_v20 = vmul.f32 %v4488_v9, %v3587_v45  ;;  %v958_v4 = vmul.f32 %v4489_v40, %v3587_v45 }
 0x2fa   : > { %v1019_v1 = vpack.c.bf16 %v892_v11, %v891_v2  ;;  %v1051_v48 = vpack.c.bf16 %v956_v30, %v955_v28  ;;  %v895_v16 = vmul.f32 %v4490_v62, %v3587_v45  ;;  %v4491_v36 = vunpack.c.h.bf16 %v2960_v14 }
 0x2fb   : > { %v1020_v10 = vpack.c.bf16 %v894_v22, %v893_v51  ;;  %v1052_v63 = vpack.c.bf16 %v958_v4, %v957_v20  ;;  %v959_v9 = vmul.f32 %v4492_v25, %v3587_v45  ;;  %v960_v40 = vmul.f32 %v4493_v60, %v3587_v45 }
 0x2fc   : > { %v896_v23 = vmul.f32 %v4491_v36, %v3587_v45  ;;  %2536 = vmatprep.mubr.bf16.mxu0 %v1019_v1  ;;  %2600 = vmatprep.mubr.bf16.mxu1 %v1051_v48  ;;  %v4494_v14 = vunpack.c.l.bf16 %v2971_v19  ;;  %v4495_v30 = vunpack.c.h.bf16 %v2971_v19  ;;  %v961_v51 = vmul.f32 %v4496_v57, %v3587_v45 }
 0x2fd   : > { %2537 = vmatmul.mubr.bf16.vlgmr.msra.gmra.mrb[4].mxu0 %v1020_v10  ;;  %2601 = vmatmul.mubr.bf16.vlgmr.msra.gmra.mrb[4].mxu1 %v1052_v63  ;;  %v1053_v11 = vpack.c.bf16 %v960_v40, %v959_v9  ;;  %v4497_v22 = vunpack.c.h.bf16 %v3259_v47  ;;  %v4498_v4 = vunpack.c.l.bf16 %v2980_v24  ;;  %v4499_v48 = vunpack.c.h.bf16 %v2980_v24 }
 0x2fe   : > { %v1021_v2 = vpack.c.bf16 %v896_v23, %v895_v16  ;;  %v897_v28 = vmul.f32 %v4494_v14, %v3587_v45  ;;  %v898_v25 = vmul.f32 %v4495_v30, %v3587_v45  ;;  %v4500_v19 = vunpack.c.l.bf16 %v3268_v42 }
 0x2ff   : > { %2604 = vmatprep.mubr.bf16.mxu1 %v1053_v11  ;;  %v962_v20 = vmul.f32 %v4497_v22, %v3587_v45  ;;  %v899_v1 = vmul.f32 %v4498_v4, %v3587_v45  ;;  %v900_v62 = vmul.f32 %v4499_v48, %v3587_v45  ;;  %v4501_v36 = vunpack.c.h.bf16 %v3268_v42 }
 0x300   : > { %2540 = vmatprep.mubr.bf16.mxu0 %v1021_v2  ;;  %v963_v16 = vmul.f32 %v4500_v19, %v3587_v45  ;;  %v1022_v10 = vpack.c.bf16 %v898_v25, %v897_v28  ;;  %v4502_v24 = vunpack.c.l.bf16 %v2989_v29  ;;  %v4503_v40 = vunpack.c.h.bf16 %v2989_v29 }
 0x301   : > { %v964_v23 = vmul.f32 %v4501_v36, %v3587_v45  ;;  %v1054_v63 = vpack.c.bf16 %v962_v20, %v961_v51  ;;  %v1023_v47 = vpack.c.bf16 %v900_v62, %v899_v1  ;;  %v4504_v42 = vunpack.c.l.bf16 %v3277_v35 }
 0x302   : > { %v901_v60 = vmul.f32 %v4502_v24, %v3587_v45  ;;  %v902_v2 = vmul.f32 %v4503_v40, %v3587_v45  ;;  %v4505_v14 = vunpack.c.h.bf16 %v3277_v35  ;;  %v4506_v30 = vunpack.c.l.bf16 %v2998_v34 }
 0x303   : > { %v1055_v9 = vpack.c.bf16 %v964_v23, %v963_v16  ;;  %v965_v11 = vmul.f32 %v4504_v42, %v3587_v45  ;;  %v4507_v57 = vunpack.c.h.bf16 %v2998_v34  ;;  %v4508_v29 = vunpack.c.l.bf16 %v3289_v27 }
 0x304   : > { %v966_v28 = vmul.f32 %v4505_v14, %v3587_v45  ;;  %v903_v25 = vmul.f32 %v4506_v30, %v3587_v45  ;;  %v4509_v20 = vunpack.c.h.bf16 %v3289_v27  ;;  %v1024_v1 = vpack.c.bf16 %v902_v2, %v901_v60 }
 0x305   : > { %2541 = vmatmul.mubr.bf16.gmra.mrb[8].mxu0 %v1022_v10  ;;  %2605 = vmatmul.mubr.bf16.gmra.mrb[8].mxu1 %v1054_v63  ;;  %v904_v51 = vmul.f32 %v4507_v57, %v3587_v45  ;;  %v967_v22 = vmul.f32 %v4508_v29, %v3587_v45  ;;  %v4510_v34 = vunpack.c.l.bf16 %v3007_v39  ;;  %v4511_v16 = vunpack.c.h.bf16 %v3007_v39 }
 0x306   : > { %2544 = vmatprep.mubr.bf16.mxu0 %v1023_v47  ;;  %2608 = vmatprep.mubr.bf16.mxu1 %v1055_v9  ;;  %v968_v4 = vmul.f32 %v4509_v20, %v3587_v45  ;;  %v1056_v48 = vpack.c.bf16 %v966_v28, %v965_v11  ;;  %v4512_v27 = vunpack.c.l.bf16 %v3302_v52  ;;  %v4513_v10 = vunpack.c.h.bf16 %v3302_v52 }
 0x307   : > { %v1025_v35 = vpack.c.bf16 %v904_v51, %v903_v25  ;;  %v905_v19 = vmul.f32 %v4510_v34, %v3587_v45  ;;  %v906_v36 = vmul.f32 %v4511_v16, %v3587_v45  ;;  %v4514_v47 = vunpack.c.l.bf16 %v3016_v44 }
 0x308   : > { %v1057_v62 = vpack.c.bf16 %v968_v4, %v967_v22  ;;  %v969_v23 = vmul.f32 %v4512_v27, %v3587_v45  ;;  %v970_v63 = vmul.f32 %v4513_v10, %v3587_v45  ;;  %v4515_v24 = vunpack.c.h.bf16 %v3016_v44 }
 0x309   : > { %v907_v9 = vmul.f32 %v4514_v47, %v3587_v45  ;;  %v4516_v39 = vunpack.c.l.bf16 %v3315_v32  ;;  %v4517_v2 = vunpack.c.h.bf16 %v3315_v32  ;;  %v1026_v11 = vpack.c.bf16 %v906_v36, %v905_v19 }
 0x30a   : > { %v908_v60 = vmul.f32 %v4515_v24, %v3587_v45  ;;  %v1058_v14 = vpack.c.bf16 %v970_v63, %v969_v23  ;;  %v4518_v44 = vunpack.c.l.bf16 %v3025_v49  ;;  %v4519_v25 = vunpack.c.h.bf16 %v3025_v49 }
 0x30b   : > { %v971_v40 = vmul.f32 %v4516_v39, %v3587_v45  ;;  %v972_v42 = vmul.f32 %v4517_v2, %v3587_v45  ;;  %v4520_v32 = vunpack.c.l.bf16 %v3328_v56  ;;  %v4521_v29 = vunpack.c.h.bf16 %v3328_v56 }
 0x30c   : > { %v1027_v52 = vpack.c.bf16 %v908_v60, %v907_v9  ;;  %v909_v30 = vmul.f32 %v4518_v44, %v3587_v45  ;;  %v910_v57 = vmul.f32 %v4519_v25, %v3587_v45  ;;  %v4522_v20 = vunpack.c.l.bf16 %v3034_v54 }
 0x30d   : > { %2545 = vmatmul.mubr.bf16.gmra.mrb[12].mxu0 %v1024_v1  ;;  %2609 = vmatmul.mubr.bf16.gmra.mrb[12].mxu1 %v1056_v48  ;;  %v1059_v28 = vpack.c.bf16 %v972_v42, %v971_v40  ;;  %v973_v51 = vmul.f32 %v4520_v32, %v3587_v45  ;;  %v974_v22 = vmul.f32 %v4521_v29, %v3587_v45  ;;  %v4523_v1 = vunpack.c.h.bf16 %v3034_v54 }
 0x30e   : > { %2548 = vmatprep.mubr.bf16.mxu0 %v1025_v35  ;;  %2612 = vmatprep.mubr.bf16.mxu1 %v1057_v62  ;;  %v911_v4 = vmul.f32 %v4522_v20, %v3587_v45  ;;  %v4524_v49 = vunpack.c.l.bf16 %v3341_v50  ;;  %v4525_v62 = vunpack.c.h.bf16 %v3341_v50  ;;  %v1028_v19 = vpack.c.bf16 %v910_v57, %v909_v30 }
 0x30f   : > { %v912_v48 = vmul.f32 %v4523_v1, %v3587_v45  ;;  %v1060_v16 = vpack.c.bf16 %v974_v22, %v973_v51  ;;  %v4526_v54 = vunpack.c.l.bf16 %v3043_v59  ;;  %v4527_v23 = vunpack.c.h.bf16 %v3043_v59 }
 0x310   : > { %v975_v35 = vmul.f32 %v4524_v49, %v3587_v45  ;;  %v976_v34 = vmul.f32 %v4525_v62, %v3587_v45  ;;  %v4528_v50 = vunpack.c.l.bf16 %v3354_v26  ;;  %v4529_v47 = vunpack.c.h.bf16 %v3354_v26 }
 0x311   : > { %v1029_v56 = vpack.c.bf16 %v912_v48, %v911_v4  ;;  %v913_v27 = vmul.f32 %v4526_v54, %v3587_v45  ;;  %v914_v10 = vmul.f32 %v4527_v23, %v3587_v45  ;;  %v4530_v24 = vunpack.c.l.bf16 %v3052_v0 }
 0x312   : > { %v1061_v36 = vpack.c.bf16 %v976_v34, %v975_v35  ;;  %v977_v63 = vmul.f32 %v4528_v50, %v3587_v45  ;;  %v978_v9 = vmul.f32 %v4529_v47, %v3587_v45  ;;  %v4531_v39 = vunpack.c.h.bf16 %v3052_v0 }
 0x313   : > { %v915_v60 = vmul.f32 %v4530_v24, %v3587_v45  ;;  %v4532_v59 = vunpack.c.l.bf16 %v3364_v17  ;;  %v4533_v42 = vunpack.c.h.bf16 %v3364_v17  ;;  %v4534_v0 = vunpack.c.l.bf16 %v3061_v6 }
 0x314   : > { %v916_v40 = vmul.f32 %v4531_v39, %v3587_v45  ;;  %v4535_v30 = vunpack.c.h.bf16 %v3061_v6  ;;  %v4536_v17 = vunpack.c.l.bf16 %v3373_v61  ;;  %v4537_v32 = vunpack.c.h.bf16 %v3373_v61 }
 0x315   : > { %2549 = vmatmul.mubr.bf16.gmra.mrb[16].mxu0 %v1026_v11  ;;  %2613 = vmatmul.mubr.bf16.gmra.mrb[16].mxu1 %v1058_v14  ;;  %v979_v2 = vmul.f32 %v4532_v59, %v3587_v45  ;;  %v980_v11 = vmul.f32 %v4533_v42, %v3587_v45  ;;  %v1030_v14 = vpack.c.bf16 %v914_v10, %v913_v27  ;;  %v4538_v29 = vunpack.c.l.bf16 %v3070_v21 }
 0x316   : > { %2552 = vmatprep.mubr.bf16.mxu0 %v1027_v52  ;;  %2616 = vmatprep.mubr.bf16.mxu1 %v1059_v28  ;;  %v1062_v52 = vpack.c.bf16 %v978_v9, %v977_v63  ;;  %v1031_v26 = vpack.c.bf16 %v916_v40, %v915_v60  ;;  %v917_v44 = vmul.f32 %v4534_v0, %v3587_v45  ;;  %v4539_v20 = vunpack.c.h.bf16 %v3070_v21 }
 0x317   : > { %v1063_v28 = vpack.c.bf16 %v980_v11, %v979_v2  ;;  %v918_v25 = vmul.f32 %v4535_v30, %v3587_v45  ;;  %v981_v57 = vmul.f32 %v4536_v17, %v3587_v45  ;;  %v982_v51 = vmul.f32 %v4537_v32, %v3587_v45 }
 0x318   : > { %v919_v22 = vmul.f32 %v4538_v29, %v3587_v45  ;;  %v920_v4 = vmul.f32 %v4539_v20, %v3587_v45  ;;  %v4540_v6 = vunpack.c.l.bf16 %v3382_v55  ;;  %v4541_v48 = vunpack.c.h.bf16 %v3382_v55 }
 0x319   : > { %v1032_v35 = vpack.c.bf16 %v918_v25, %v917_v44  ;;  %v1064_v62 = vpack.c.bf16 %v982_v51, %v981_v57  ;;  %v4542_v21 = vunpack.c.l.bf16 %v3079_v33  ;;  %v4544_v55 = vunpack.c.l.bf16 %v3391_v37 }
 0x31a   : > { %v983_v1 = vmul.f32 %v4540_v6, %v3587_v45  ;;  %v984_v49 = vmul.f32 %v4541_v48, %v3587_v45  ;;  %v1033_v61 = vpack.c.bf16 %v920_v4, %v919_v22  ;;  %v4545_v54 = vunpack.c.h.bf16 %v3391_v37 }
 0x31b   : > { %v4546_v23 = vunpack.c.l.bf16 %v3088_v46  ;;  %v4547_v50 = vunpack.c.h.bf16 %v3088_v46  ;;  %v4549_v9 = vunpack.c.h.bf16 %v3400_v31  ;;  %v4550_v46 = vunpack.c.l.bf16 %v3097_v58 }
 0x31c   : > { %v1065_v34 = vpack.c.bf16 %v984_v49, %v983_v1  ;;  %v986_v27 = vmul.f32 %v4545_v54, %v3587_v45  ;;  %v4551_v2 = vunpack.c.h.bf16 %v3097_v58  ;;  %v4555_v0 = vunpack.c.h.bf16 %v3106_v8 }
 0x31d   : > { %2553 = vmatmul.mubr.bf16.gmra.mrb[20].mxu0 %v1028_v19  ;;  %2617 = vmatmul.mubr.bf16.gmra.mrb[20].mxu1 %v1060_v16  ;;  %v921_v19 = vmul.f32 %v4542_v21, %v3587_v45  ;;  %v4543_v16 = vunpack.c.h.bf16 %v3079_v33  ;;  %v923_v10 = vmul.f32 %v4546_v23, %v3587_v45  ;;  %v924_v63 = vmul.f32 %v4547_v50, %v3587_v45 }
 0x31e   : > { %2556 = vmatprep.mubr.bf16.mxu0 %v1029_v56  ;;  %2620 = vmatprep.mubr.bf16.mxu1 %v1061_v36  ;;  %v985_v36 = vmul.f32 %v4544_v55, %v3587_v45  ;;  %v4548_v33 = vunpack.c.l.bf16 %v3400_v31  ;;  %v988_v24 = vmul.f32 %v4549_v9, %v3587_v45  ;;  %v925_v59 = vmul.f32 %v4550_v46, %v3587_v45  ;;  %v4572_v9 = vld [vmem:[#allocation14_spill] sm:$0xff] }
 0x31f   : > { %v922_v56 = vmul.f32 %v4543_v16, %v3587_v45  ;;  %v1035_v37 = vpack.c.bf16 %v924_v63, %v923_v10  ;;  %v926_v42 = vmul.f32 %v4551_v2, %v3587_v45  ;;  %v4552_v31 = vunpack.c.l.bf16 %v3409_v15 }
 0x320   : > { %v987_v47 = vmul.f32 %v4548_v33, %v3587_v45  ;;  %v1066_v39 = vpack.c.bf16 %v986_v27, %v985_v36  ;;  %v928_v44 = vmul.f32 %v4555_v0, %v3587_v45  ;;  %v4556_v58 = vunpack.c.l.bf16 %v3418_v13  ;;  %v4581_v0 = vld [vmem:[#allocation6_spill] sm:$0xff] }
 0x321   : > { %v1034_v60 = vpack.c.bf16 %v922_v56, %v921_v19  ;;  %v989_v11 = vmul.f32 %v4552_v31, %v3587_v45  ;;  %v4557_v25 = vunpack.c.h.bf16 %v3418_v13  ;;  %v1036_v57 = vpack.c.bf16 %v926_v42, %v925_v59  ;;  %v4575_v59 = vld [vmem:[#allocation5_spill] sm:$0xff] }
 0x322   : > { %v1067_v40 = vpack.c.bf16 %v988_v24, %v987_v47  ;;  %v991_v30 = vmul.f32 %v4556_v58, %v3587_v45  ;;  %v4559_v22 = vunpack.c.h.bf16 %v3115_v43  ;;  %v4560_v13 = vunpack.c.l.bf16 %v3427_v18 }
 0x323   : > { %v992_v17 = vmul.f32 %v4557_v25, %v3587_v45  ;;  %v4561_v6 = vunpack.c.h.bf16 %v3427_v18  ;;  %v4562_v48 = vunpack.c.l.bf16 %v3124_v5  ;;  %v4567_v36 = vunpack.c.h.bf16 %v3133_v38 }
 0x324   : > { %v930_v20 = vmul.f32 %v4559_v22, %v3587_v45  ;;  %v993_v4 = vmul.f32 %v4560_v13, %v3587_v45  ;;  %v4569_v23 = vunpack.c.h.bf16 %v3445_v12  ;;  %v4570_v50 = vunpack.c.l.bf16 %v3142_v53  ;;  %v4587_v13 = vld [vmem:[#allocation7_spill] sm:$0xff] }
 0x325   : > { %2557 = vmatmul.mubr.bf16.gmra.mrb[24].mxu0 %v1030_v14  ;;  %2621 = vmatmul.mubr.bf16.gmra.mrb[24].mxu1 %v1062_v52  ;;  %v4553_v14 = vunpack.c.h.bf16 %v3409_v15  ;;  %v1069_v51 = vpack.c.bf16 %v992_v17, %v991_v30  ;;  %v994_v1 = vmul.f32 %v4561_v6, %v3587_v45  ;;  %v931_v49 = vmul.f32 %v4562_v48, %v3587_v45  ;;  %v4584_v17 = vld [vmem:[#allocation16_spill] sm:$0xff] }
 0x326   : > { %2560 = vmatprep.mubr.bf16.mxu0 %v1031_v26  ;;  %2624 = vmatprep.mubr.bf16.mxu1 %v1063_v28  ;;  %v4554_v26 = vunpack.c.l.bf16 %v3106_v8  ;;  %v4558_v8 = vunpack.c.l.bf16 %v3115_v43  ;;  %v4564_v43 = vunpack.c.l.bf16 %v3436_v3  ;;  %v934_v54 = vmul.f32 %v4567_v36, %v3587_v45 }
 0x327   : > { %v990_v52 = vmul.f32 %v4553_v14, %v3587_v45  ;;  %v1070_v16 = vpack.c.bf16 %v994_v1, %v993_v4  ;;  %v998_v10 = vmul.f32 %v4569_v23, %v3587_v45  ;;  %v935_v63 = vmul.f32 %v4570_v50, %v3587_v45  ;;  %v4599_v50 = vld [vmem:[#allocation9_spill] sm:$0xff] }
 0x328   : > { %v927_v28 = vmul.f32 %v4554_v26, %v3587_v45  ;;  %v929_v29 = vmul.f32 %v4558_v8, %v3587_v45  ;;  %v4571_v33 = vunpack.c.h.bf16 %v3142_v53  ;;  %v4576_v53 = vunpack.c.l.bf16 %v4575_v59 }
 0x329   : > { %v1068_v32 = vpack.c.bf16 %v990_v52, %v989_v11  ;;  %v4577_v42 = vunpack.c.h.bf16 %v4575_v59  ;;  %v4578_v11 = vld [vmem:[#allocation15_spill] sm:$0xff]  ;;  %v4583_v30 = vunpack.c.h.bf16 %v4581_v0  ;;  %v4588_v4 = vunpack.c.l.bf16 %v4587_v13 }
 0x32a   : > { %v1037_v15 = vpack.c.bf16 %v928_v44, %v927_v28  ;;  %v1038_v19 = vpack.c.bf16 %v930_v20, %v929_v29  ;;  %v936_v47 = vmul.f32 %v4571_v33, %v3587_v45  ;;  %v937_v2 = vmul.f32 %v4576_v53, %v3587_v45 }
 0x32b   : > { %v938_v31 = vmul.f32 %v4577_v42, %v3587_v45  ;;  %v4579_v14 = vunpack.c.l.bf16 %v4578_v11  ;;  %v4580_v26 = vunpack.c.h.bf16 %v4578_v11  ;;  %v4582_v44 = vunpack.c.l.bf16 %v4581_v0 }
 0x32c   : > { %v940_v25 = vmul.f32 %v4583_v30, %v3587_v45  ;;  %v941_v6 = vmul.f32 %v4588_v4, %v3587_v45  ;;  %v4589_v1 = vunpack.c.h.bf16 %v4587_v13 }
 0x32d   : > { %2561 = vmatmul.mubr.bf16.gmra.mrb[28].mxu0 %v1032_v35  ;;  %2625 = vmatmul.mubr.bf16.gmra.mrb[28].mxu1 %v1064_v62  ;;  %v4563_v35 = vunpack.c.h.bf16 %v3124_v5  ;;  %v4566_v5 = vunpack.c.l.bf16 %v3133_v38  ;;  %v4573_v38 = vunpack.c.l.bf16 %v4572_v9  ;;  %v1001_v52 = vmul.f32 %v4579_v14, %v3587_v45 }
 0x32e   : > { %2564 = vmatprep.mubr.bf16.mxu0 %v1033_v61  ;;  %2628 = vmatprep.mubr.bf16.mxu1 %v1065_v34  ;;  %v995_v61 = vmul.f32 %v4564_v43, %v3587_v45  ;;  %v4565_v34 = vunpack.c.h.bf16 %v3436_v3  ;;  %v4568_v3 = vunpack.c.l.bf16 %v3445_v12  ;;  %v1041_v12 = vpack.c.bf16 %v936_v47, %v935_v63 }
 0x32f   : > { %v932_v62 = vmul.f32 %v4563_v35, %v3587_v45  ;;  %v933_v55 = vmul.f32 %v4566_v5, %v3587_v45  ;;  %v999_v24 = vmul.f32 %v4573_v38, %v3587_v45  ;;  %v1002_v28 = vmul.f32 %v4580_v26, %v3587_v45  ;;  %v4602_v38 = vld [vmem:[#allocation19_spill] sm:$0xff] }
 0x330   : > { %v996_v21 = vmul.f32 %v4565_v34, %v3587_v45  ;;  %v997_v27 = vmul.f32 %v4568_v3, %v3587_v45  ;;  %v939_v58 = vmul.f32 %v4582_v44, %v3587_v45  ;;  %v1042_v8 = vpack.c.bf16 %v938_v31, %v937_v2  ;;  %v4593_v34 = vld [vmem:[#allocation8_spill] sm:$0xff]  ;;  %v4611_v44 = vld [vmem:[#allocation11_spill] sm:$0xff] }
 0x331   : > { %v1039_v18 = vpack.c.bf16 %v932_v62, %v931_v49  ;;  %v1074_v29 = vpack.c.bf16 %v1002_v28, %v1001_v52  ;;  %v942_v48 = vmul.f32 %v4589_v1, %v3587_v45  ;;  %v4590_v49 = vld [vmem:[#allocation17_spill] sm:$0xff]  ;;  %v4600_v63 = vunpack.c.l.bf16 %v4599_v50  ;;  %v4608_v2 = vld [vmem:[#allocation20_spill] sm:$0xff] }
 0x332   : > { %v1071_v56 = vpack.c.bf16 %v996_v21, %v995_v61  ;;  %v1043_v22 = vpack.c.bf16 %v940_v25, %v939_v58  ;;  %v4591_v35 = vunpack.c.l.bf16 %v4590_v49  ;;  %v4592_v43 = vunpack.c.h.bf16 %v4590_v49 }
 0x333   : > { %v4594_v21 = vunpack.c.l.bf16 %v4593_v34  ;;  %v1044_v3 = vpack.c.bf16 %v942_v48, %v941_v6  ;;  %v945_v33 = vmul.f32 %v4600_v63, %v3587_v45  ;;  %v4601_v47 = vunpack.c.h.bf16 %v4599_v50 }
 0x334   : > { %v1005_v62 = vmul.f32 %v4591_v35, %v3587_v45  ;;  %v1006_v61 = vmul.f32 %v4592_v43, %v3587_v45  ;;  %v4609_v42 = vunpack.c.l.bf16 %v4608_v2  ;;  %v4610_v11 = vunpack.c.h.bf16 %v4608_v2 }
 0x335   : > { %2565 = vmatmul.mubr.bf16.gmra.mrb[32].mxu0 %v1034_v60  ;;  %2629 = vmatmul.mubr.bf16.gmra.mrb[32].mxu1 %v1066_v39  ;;  %v4574_v60 = vunpack.c.h.bf16 %v4572_v9  ;;  %v946_v9 = vmul.f32 %v4601_v47, %v3587_v45  ;;  %v4612_v58 = vunpack.c.l.bf16 %v4611_v44  ;;  %v4613_v25 = vunpack.c.h.bf16 %v4611_v44 }
 0x336   : > { %2568 = vmatprep.mubr.bf16.mxu0 %v1035_v37  ;;  %2632 = vmatprep.mubr.bf16.mxu1 %v1067_v40  ;;  %v1040_v37 = vpack.c.bf16 %v934_v54, %v933_v55  ;;  %v1072_v40 = vpack.c.bf16 %v998_v10, %v997_v27  ;;  %v1076_v27 = vpack.c.bf16 %v1006_v61, %v1005_v62  ;;  %v4620_v6 = vunpack.c.l.bf16 %v3526_v41 }
 0x337   : > { %v1000_v39 = vmul.f32 %v4574_v60, %v3587_v45  ;;  %v1011_v31 = vmul.f32 %v4609_v42, %v3587_v45  ;;  %v1012_v14 = vmul.f32 %v4610_v11, %v3587_v45  ;;  %v1046_v52 = vpack.c.bf16 %v946_v9, %v945_v33 }
 0x338   : > { %v949_v30 = vmul.f32 %v4612_v58, %v3587_v45  ;;  %v1015_v1 = vmul.f32 %v4620_v6, %v3587_v45  ;;  %v4621_v48 = vunpack.c.h.bf16 %v3526_v41  ;;  %v4625_v41 = vunpack.c.l.bf16 %v3535_v7 }
 0x339   : > { %v1073_v46 = vpack.c.bf16 %v1000_v39, %v999_v24  ;;  %v4603_v24 = vunpack.c.l.bf16 %v4602_v38  ;;  %v4604_v39 = vunpack.c.h.bf16 %v4602_v38  ;;  %v1079_v0 = vpack.c.bf16 %v1012_v14, %v1011_v31 }
 0x33a   : > { %v1016_v49 = vmul.f32 %v4621_v48, %v3587_v45 }
 0x33b   : > { %v1009_v60 = vmul.f32 %v4603_v24, %v3587_v45 }
 0x33c   : > { %v1081_v61 = vpack.c.bf16 %v1016_v49, %v1015_v1 }
 0x33d   : > { %2569 = vmatmul.mubr.bf16.gmra.mrb[36].mxu0 %v1036_v57  ;;  %2633 = vmatmul.mubr.bf16.gmra.mrb[36].mxu1 %v1068_v32  ;;  %v4585_v57 = vunpack.c.l.bf16 %v4584_v17 }
 0x33e   : > { %2572 = vmatprep.mubr.bf16.mxu0 %v1037_v15  ;;  %2636 = vmatprep.mubr.bf16.mxu1 %v1069_v51  ;;  %v4586_v15 = vunpack.c.h.bf16 %v4584_v17  ;;  %v950_v17 = vmul.f32 %v4613_v25, %v3587_v45 }
 0x33f   : > { %v1003_v32 = vmul.f32 %v4585_v57, %v3587_v45  ;;  %v4614_v57 = vld [vmem:[#allocation21_spill] sm:$0xff] }
 0x340   : > { %v1004_v51 = vmul.f32 %v4586_v15, %v3587_v45  ;;  %v1048_v35 = vpack.c.bf16 %v950_v17, %v949_v30 }
 0x342   : > { %v1075_v20 = vpack.c.bf16 %v1004_v51, %v1003_v32  ;;  %v4615_v32 = vunpack.c.l.bf16 %v4614_v57  ;;  %v4616_v51 = vunpack.c.h.bf16 %v4614_v57 }
 0x344   : > { %v1013_v15 = vmul.f32 %v4615_v32, %v3587_v45 }
 0x345   : > { %2573 = vmatmul.mubr.bf16.gmra.mrb[40].mxu0 %v1038_v19  ;;  %2637 = vmatmul.mubr.bf16.gmra.mrb[40].mxu1 %v1070_v16  ;;  %v943_v19 = vmul.f32 %v4594_v21, %v3587_v45  ;;  %v4595_v16 = vunpack.c.h.bf16 %v4593_v34  ;;  %v4622_v34 = vld [vmem:[#allocation13_spill] sm:$0xff] }
 0x346   : > { %2576 = vmatprep.mubr.bf16.mxu0 %v1039_v18  ;;  %2640 = vmatprep.mubr.bf16.mxu1 %v1071_v56  ;;  %v4596_v56 = vld [vmem:[#allocation18_spill] sm:$0xff]  ;;  %v4623_v21 = vunpack.c.l.bf16 %v4622_v34 }
 0x347   : > { %v944_v18 = vmul.f32 %v4595_v16, %v3587_v45  ;;  %v4597_v5 = vunpack.c.l.bf16 %v4596_v56  ;;  %v4598_v36 = vunpack.c.h.bf16 %v4596_v56  ;;  %v4624_v16 = vunpack.c.h.bf16 %v4622_v34 }
 0x348   : > { %v1017_v56 = vmul.f32 %v4625_v41, %v3587_v45 }
 0x349   : > { %v1007_v55 = vmul.f32 %v4597_v5, %v3587_v45  ;;  %v1008_v54 = vmul.f32 %v4598_v36, %v3587_v45  ;;  %v1045_v23 = vpack.c.bf16 %v944_v18, %v943_v19  ;;  %v953_v19 = vmul.f32 %v4623_v21, %v3587_v45 }
 0x34a   : > { %v954_v18 = vmul.f32 %v4624_v16, %v3587_v45  ;;  %v4626_v5 = vunpack.c.h.bf16 %v3535_v7 }
 0x34b   : > { %v1077_v10 = vpack.c.bf16 %v1008_v54, %v1007_v55 }
 0x34c   : > { %v1018_v55 = vmul.f32 %v4626_v5, %v3587_v45  ;;  %v1050_v36 = vpack.c.bf16 %v954_v18, %v953_v19 }
 0x34d   : > { %2577 = vmatmul.mubr.bf16.gmra.mrb[44].mxu0 %v1040_v37  ;;  %2641 = vmatmul.mubr.bf16.gmra.mrb[44].mxu1 %v1072_v40  ;;  %v1010_v37 = vmul.f32 %v4604_v39, %v3587_v45  ;;  %v4605_v40 = vld [vmem:[#allocation10_spill] sm:$0xff] }
 0x34e   : > { %2580 = vmatprep.mubr.bf16.mxu0 %v1041_v12  ;;  %2644 = vmatprep.mubr.bf16.mxu1 %v1073_v46  ;;  %v4606_v12 = vunpack.c.l.bf16 %v4605_v40  ;;  %v4607_v59 = vunpack.c.h.bf16 %v4605_v40  ;;  %v1082_v54 = vpack.c.bf16 %v1018_v55, %v1017_v56 }
 0x34f   : > { %v1078_v26 = vpack.c.bf16 %v1010_v37, %v1009_v60 }
 0x350   : > { %v947_v46 = vmul.f32 %v4606_v12, %v3587_v45  ;;  %v948_v53 = vmul.f32 %v4607_v59, %v3587_v45 }
 0x352   : > { %v1047_v28 = vpack.c.bf16 %v948_v53, %v947_v46 }
 0x355   : > { %2581 = vmatmul.mubr.bf16.gmra.mrb[48].mxu0 %v1042_v8  ;;  %2645 = vmatmul.mubr.bf16.gmra.mrb[48].mxu1 %v1074_v29  ;;  %v1014_v8 = vmul.f32 %v4616_v51, %v3587_v45  ;;  %v4617_v29 = vld [vmem:[#allocation12_spill] sm:$0xff] }
 0x356   : > { %2584 = vmatprep.mubr.bf16.mxu0 %v1043_v22  ;;  %2648 = vmatprep.mubr.bf16.mxu1 %v1075_v20  ;;  %v4618_v22 = vunpack.c.l.bf16 %v4617_v29  ;;  %v4619_v13 = vunpack.c.h.bf16 %v4617_v29 }
 0x357   : > { %v1080_v62 = vpack.c.bf16 %v1014_v8, %v1013_v15 }
 0x358   : > { %v951_v20 = vmul.f32 %v4618_v22, %v3587_v45  ;;  %v952_v4 = vmul.f32 %v4619_v13, %v3587_v45 }
 0x35a   : > { %v1049_v43 = vpack.c.bf16 %v952_v4, %v951_v20 }
 0x35d   : > { %2585 = vmatmul.mubr.bf16.gmra.mrb[52].mxu0 %v1044_v3  ;;  %2649 = vmatmul.mubr.bf16.gmra.mrb[52].mxu1 %v1076_v27  ;;  %v3977_v3 = vld [vmem:[%s4297_s6] ss:$0 sm:$0xff] }
 0x35e   : > { %2588 = vmatprep.mubr.bf16.mxu0 %v1045_v23  ;;  %2652 = vmatprep.mubr.bf16.mxu1 %v1077_v10 }
 0x365   : > { %2589 = vmatmul.mubr.bf16.gmra.mrb[56].mxu0 %v1046_v52  ;;  %2653 = vmatmul.mubr.bf16.gmra.mrb[56].mxu1 %v1078_v26 }
 0x366   : > { %2592 = vmatprep.mubr.bf16.mxu0 %v1047_v28  ;;  %2656 = vmatprep.mubr.bf16.mxu1 %v1079_v0 }
 0x36d   : > { %2593 = vmatmul.mubr.bf16.gmra.mrb[60].mxu0 %v1048_v35  ;;  %2657 = vmatmul.mubr.bf16.gmra.mrb[60].mxu1 %v1080_v62 }
 0x36e   : > { %2596 = vmatprep.mubr.bf16.mxu0 %v1049_v43  ;;  %2660 = vmatprep.mubr.bf16.mxu1 %v1081_v61 }
 0x375   : > { %2597 = vmatmul.mubr.bf16.gmra.mrb[64].mxu0 %v1050_v36  ;;  %2661 = vmatmul.mubr.bf16.gmra.mrb[64].mxu1 %v1082_v54 }
 0x3d0   : > { %v2538_v27 = vpop.f32.mrb[4].mxu0  ;;  %v2602_v23 = vpop.f32.mrb[4].mxu1 }
 0x3d1   : > { %v1197_v10 = vadd.f32 %v2538_v27, %v3977_v3  ;;  %v1453_v50 = vadd.f32 %v2602_v23, %v3977_v3  ;;  %v1188_v7 = vpop.f32.mrb[5].mxu0  ;;  %v1444_v45 = vpop.f32.mrb[5].mxu1 }
 0x3d2   : > { %v1189_v63 = vadd.f32 %v3977_v3, %v1188_v7  ;;  %v1445_v33 = vadd.f32 %v3977_v3, %v1444_v45  ;;  %v2539_v47 = vpop.f32.mrb[6].mxu0  ;;  %v2603_v9 = vpop.f32.mrb[6].mxu1 }
 0x3d3   : > { %v1701_v38 = vmax.f32 %v1197_v10, 0.0  ;;  %v1765_v24 = vmax.f32 %v1453_v50, 0.0  ;;  %v1200_v60 = vadd.f32 %v2539_v47, %v3977_v3  ;;  %v1456_v39 = vadd.f32 %v2603_v9, %v3977_v3  ;;  %v1191_v37 = vpop.f32.mrb[7].mxu0  ;;  %v1447_v40 = vpop.f32.mrb[7].mxu1 }
 0x3d4   : > { %v1699_v12 = vmax.f32 %v1189_v63, 0.0  ;;  %v1763_v46 = vmax.f32 %v1445_v33, 0.0  ;;  %v1192_v59 = vadd.f32 %v3977_v3, %v1191_v37  ;;  %v1448_v53 = vadd.f32 %v3977_v3, %v1447_v40 }
 0x3d5   : > { %1829 = vst [vmem:[%s3989_s18 + $0x10] sm:$0xff] %v1701_v38  ;;  %1893 = vst [vmem:[%s3989_s18 + $0x210] sm:$0xff] %v1765_v24  ;;  %v1702_v2 = vmax.f32 %v1200_v60, 0.0  ;;  %v1766_v42 = vmax.f32 %v1456_v39, 0.0 }
 0x3d6   : > { %1827 = vst [vmem:[%s3989_s18] sm:$0xff] %v1699_v12  ;;  %1891 = vst [vmem:[%s3989_s18 + $0x200] sm:$0xff] %v1763_v46  ;;  %v1700_v31 = vmax.f32 %v1192_v59, 0.0  ;;  %v1764_v11 = vmax.f32 %v1448_v53, 0.0 }
 0x3d7   : > { %1830 = vst [vmem:[%s3989_s18 + $0x18] sm:$0xff] %v1702_v2  ;;  %1894 = vst [vmem:[%s3989_s18 + $0x218] sm:$0xff] %v1766_v42 }
 0x3d8   : > { %1828 = vst [vmem:[%s3989_s18 + $0x8] sm:$0xff] %v1700_v31  ;;  %1892 = vst [vmem:[%s3989_s18 + $0x208] sm:$0xff] %v1764_v11  ;;  %v2542_v14 = vpop.f32.mrb[8].mxu0  ;;  %v2606_v52 = vpop.f32.mrb[8].mxu1 }
 0x3d9   : > { %v1213_v26 = vadd.f32 %v2542_v14, %v3977_v3  ;;  %v1469_v28 = vadd.f32 %v2606_v52, %v3977_v3  ;;  %v1204_v0 = vpop.f32.mrb[9].mxu0  ;;  %v1460_v44 = vpop.f32.mrb[9].mxu1 }
 0x3da   : > { %v1205_v58 = vadd.f32 %v3977_v3, %v1204_v0  ;;  %v1461_v30 = vadd.f32 %v3977_v3, %v1460_v44  ;;  %v2543_v25 = vpop.f32.mrb[10].mxu0  ;;  %v2607_v17 = vpop.f32.mrb[10].mxu1 }
 0x3db   : > { %v1705_v57 = vmax.f32 %v1213_v26, 0.0  ;;  %v1769_v32 = vmax.f32 %v1469_v28, 0.0  ;;  %v1216_v15 = vadd.f32 %v2543_v25, %v3977_v3  ;;  %v1472_v51 = vadd.f32 %v2607_v17, %v3977_v3  ;;  %v1207_v8 = vpop.f32.mrb[11].mxu0  ;;  %v1463_v29 = vpop.f32.mrb[11].mxu1 }
 0x3dc   : > { %v1703_v22 = vmax.f32 %v1205_v58, 0.0  ;;  %v1767_v20 = vmax.f32 %v1461_v30, 0.0  ;;  %v1208_v13 = vadd.f32 %v3977_v3, %v1207_v8  ;;  %v1464_v4 = vadd.f32 %v3977_v3, %v1463_v29 }
 0x3dd   : > { %1833 = vst [vmem:[%s3989_s18 + $0x30] sm:$0xff] %v1705_v57  ;;  %1897 = vst [vmem:[%s3989_s18 + $0x230] sm:$0xff] %v1769_v32  ;;  %v1706_v6 = vmax.f32 %v1216_v15, 0.0  ;;  %v1770_v1 = vmax.f32 %v1472_v51, 0.0 }
 0x3de   : > { %1831 = vst [vmem:[%s3989_s18 + $0x20] sm:$0xff] %v1703_v22  ;;  %1895 = vst [vmem:[%s3989_s18 + $0x220] sm:$0xff] %v1767_v20  ;;  %v1704_v48 = vmax.f32 %v1208_v13, 0.0  ;;  %v1768_v49 = vmax.f32 %v1464_v4, 0.0 }
 0x3df   : > { %1834 = vst [vmem:[%s3989_s18 + $0x38] sm:$0xff] %v1706_v6  ;;  %1898 = vst [vmem:[%s3989_s18 + $0x238] sm:$0xff] %v1770_v1 }
 0x3e0   : > { %1832 = vst [vmem:[%s3989_s18 + $0x28] sm:$0xff] %v1704_v48  ;;  %1896 = vst [vmem:[%s3989_s18 + $0x228] sm:$0xff] %v1768_v49  ;;  %v2546_v35 = vpop.f32.mrb[12].mxu0  ;;  %v2610_v62 = vpop.f32.mrb[12].mxu1 }
 0x3e1   : > { %v1229_v43 = vadd.f32 %v2546_v35, %v3977_v3  ;;  %v1485_v61 = vadd.f32 %v2610_v62, %v3977_v3  ;;  %v1220_v34 = vpop.f32.mrb[13].mxu0  ;;  %v1476_v21 = vpop.f32.mrb[13].mxu1 }
 0x3e2   : > { %v1221_v19 = vadd.f32 %v3977_v3, %v1220_v34  ;;  %v1477_v16 = vadd.f32 %v3977_v3, %v1476_v21  ;;  %v2547_v18 = vpop.f32.mrb[14].mxu0  ;;  %v2611_v41 = vpop.f32.mrb[14].mxu1 }
 0x3e3   : > { %v1709_v56 = vmax.f32 %v1229_v43, 0.0  ;;  %v1773_v5 = vmax.f32 %v1485_v61, 0.0  ;;  %v1232_v55 = vadd.f32 %v2547_v18, %v3977_v3  ;;  %v1488_v36 = vadd.f32 %v2611_v41, %v3977_v3  ;;  %v1223_v54 = vpop.f32.mrb[15].mxu0  ;;  %v1479_v27 = vpop.f32.mrb[15].mxu1 }
 0x3e4   : > { %v1707_v23 = vmax.f32 %v1221_v19, 0.0  ;;  %v1771_v10 = vmax.f32 %v1477_v16, 0.0  ;;  %v1224_v50 = vadd.f32 %v3977_v3, %v1223_v54  ;;  %v1480_v7 = vadd.f32 %v3977_v3, %v1479_v27 }
 0x3e5   : > { %1837 = vst [vmem:[%s3989_s18 + $0x50] sm:$0xff] %v1709_v56  ;;  %1901 = vst [vmem:[%s3989_s18 + $0x250] sm:$0xff] %v1773_v5  ;;  %v1710_v45 = vmax.f32 %v1232_v55, 0.0  ;;  %v1774_v63 = vmax.f32 %v1488_v36, 0.0 }
 0x3e6   : > { %1835 = vst [vmem:[%s3989_s18 + $0x40] sm:$0xff] %v1707_v23  ;;  %1899 = vst [vmem:[%s3989_s18 + $0x240] sm:$0xff] %v1771_v10  ;;  %v1708_v33 = vmax.f32 %v1224_v50, 0.0  ;;  %v1772_v47 = vmax.f32 %v1480_v7, 0.0 }
 0x3e7   : > { %1838 = vst [vmem:[%s3989_s18 + $0x58] sm:$0xff] %v1710_v45  ;;  %1902 = vst [vmem:[%s3989_s18 + $0x258] sm:$0xff] %v1774_v63 }
 0x3e8   : > { %1836 = vst [vmem:[%s3989_s18 + $0x48] sm:$0xff] %v1708_v33  ;;  %1900 = vst [vmem:[%s3989_s18 + $0x248] sm:$0xff] %v1772_v47  ;;  %v2550_v9 = vpop.f32.mrb[16].mxu0  ;;  %v2614_v38 = vpop.f32.mrb[16].mxu1 }
 0x3e9   : > { %v1245_v24 = vadd.f32 %v2550_v9, %v3977_v3  ;;  %v1501_v60 = vadd.f32 %v2614_v38, %v3977_v3  ;;  %v1236_v39 = vpop.f32.mrb[17].mxu0  ;;  %v1492_v37 = vpop.f32.mrb[17].mxu1 }
 0x3ea   : > { %v1237_v40 = vadd.f32 %v3977_v3, %v1236_v39  ;;  %v1493_v12 = vadd.f32 %v3977_v3, %v1492_v37  ;;  %v2551_v46 = vpop.f32.mrb[18].mxu0  ;;  %v2615_v59 = vpop.f32.mrb[18].mxu1 }
 0x3eb   : > { %v1713_v53 = vmax.f32 %v1245_v24, 0.0  ;;  %v1777_v2 = vmax.f32 %v1501_v60, 0.0  ;;  %v1248_v42 = vadd.f32 %v2551_v46, %v3977_v3  ;;  %v1504_v31 = vadd.f32 %v2615_v59, %v3977_v3  ;;  %v1239_v11 = vpop.f32.mrb[19].mxu0  ;;  %v1495_v14 = vpop.f32.mrb[19].mxu1 }
 0x3ec   : > { %v1711_v52 = vmax.f32 %v1237_v40, 0.0  ;;  %v1775_v26 = vmax.f32 %v1493_v12, 0.0  ;;  %v1240_v28 = vadd.f32 %v3977_v3, %v1239_v11  ;;  %v1496_v0 = vadd.f32 %v3977_v3, %v1495_v14 }
 0x3ed   : > { %1841 = vst [vmem:[%s3989_s18 + $0x70] sm:$0xff] %v1713_v53  ;;  %1905 = vst [vmem:[%s3989_s18 + $0x270] sm:$0xff] %v1777_v2  ;;  %v1714_v44 = vmax.f32 %v1248_v42, 0.0  ;;  %v1778_v58 = vmax.f32 %v1504_v31, 0.0 }
 0x3ee   : > { %1839 = vst [vmem:[%s3989_s18 + $0x60] sm:$0xff] %v1711_v52  ;;  %1903 = vst [vmem:[%s3989_s18 + $0x260] sm:$0xff] %v1775_v26  ;;  %v1712_v30 = vmax.f32 %v1240_v28, 0.0  ;;  %v1776_v25 = vmax.f32 %v1496_v0, 0.0 }
 0x3ef   : > { %1842 = vst [vmem:[%s3989_s18 + $0x78] sm:$0xff] %v1714_v44  ;;  %1906 = vst [vmem:[%s3989_s18 + $0x278] sm:$0xff] %v1778_v58 }
 0x3f0   : > { %1840 = vst [vmem:[%s3989_s18 + $0x68] sm:$0xff] %v1712_v30  ;;  %1904 = vst [vmem:[%s3989_s18 + $0x268] sm:$0xff] %v1776_v25  ;;  %v2554_v17 = vpop.f32.mrb[20].mxu0  ;;  %v2618_v57 = vpop.f32.mrb[20].mxu1 }
 0x3f1   : > { %v1261_v32 = vadd.f32 %v2554_v17, %v3977_v3  ;;  %v1517_v15 = vadd.f32 %v2618_v57, %v3977_v3  ;;  %v1252_v51 = vpop.f32.mrb[21].mxu0  ;;  %v1508_v8 = vpop.f32.mrb[21].mxu1 }
 0x3f2   : > { %v1253_v29 = vadd.f32 %v3977_v3, %v1252_v51  ;;  %v1509_v22 = vadd.f32 %v3977_v3, %v1508_v8  ;;  %v2555_v20 = vpop.f32.mrb[22].mxu0  ;;  %v2619_v13 = vpop.f32.mrb[22].mxu1 }
 0x3f3   : > { %v1717_v4 = vmax.f32 %v1261_v32, 0.0  ;;  %v1781_v6 = vmax.f32 %v1517_v15, 0.0  ;;  %v1264_v1 = vadd.f32 %v2555_v20, %v3977_v3  ;;  %v1520_v48 = vadd.f32 %v2619_v13, %v3977_v3  ;;  %v1255_v49 = vpop.f32.mrb[23].mxu0  ;;  %v1511_v35 = vpop.f32.mrb[23].mxu1 }
 0x3f4   : > { %v1715_v62 = vmax.f32 %v1253_v29, 0.0  ;;  %v1779_v43 = vmax.f32 %v1509_v22, 0.0  ;;  %v1256_v61 = vadd.f32 %v3977_v3, %v1255_v49  ;;  %v1512_v34 = vadd.f32 %v3977_v3, %v1511_v35 }
 0x3f5   : > { %1845 = vst [vmem:[%s3989_s18 + $0x90] sm:$0xff] %v1717_v4  ;;  %1909 = vst [vmem:[%s3989_s18 + $0x290] sm:$0xff] %v1781_v6  ;;  %v1718_v21 = vmax.f32 %v1264_v1, 0.0  ;;  %v1782_v19 = vmax.f32 %v1520_v48, 0.0 }
 0x3f6   : > { %1843 = vst [vmem:[%s3989_s18 + $0x80] sm:$0xff] %v1715_v62  ;;  %1907 = vst [vmem:[%s3989_s18 + $0x280] sm:$0xff] %v1779_v43  ;;  %v1716_v16 = vmax.f32 %v1256_v61, 0.0  ;;  %v1780_v18 = vmax.f32 %v1512_v34, 0.0 }
 0x3f7   : > { %1846 = vst [vmem:[%s3989_s18 + $0x98] sm:$0xff] %v1718_v21  ;;  %1910 = vst [vmem:[%s3989_s18 + $0x298] sm:$0xff] %v1782_v19 }
 0x3f8   : > { %1844 = vst [vmem:[%s3989_s18 + $0x88] sm:$0xff] %v1716_v16  ;;  %1908 = vst [vmem:[%s3989_s18 + $0x288] sm:$0xff] %v1780_v18  ;;  %v2558_v41 = vpop.f32.mrb[24].mxu0  ;;  %v2622_v56 = vpop.f32.mrb[24].mxu1 }
 0x3f9   : > { %v1277_v5 = vadd.f32 %v2558_v41, %v3977_v3  ;;  %v1533_v55 = vadd.f32 %v2622_v56, %v3977_v3  ;;  %v1268_v36 = vpop.f32.mrb[25].mxu0  ;;  %v1524_v54 = vpop.f32.mrb[25].mxu1 }
 0x3fa   : > { %v1269_v27 = vadd.f32 %v3977_v3, %v1268_v36  ;;  %v1525_v23 = vadd.f32 %v3977_v3, %v1524_v54  ;;  %v2559_v10 = vpop.f32.mrb[26].mxu0  ;;  %v2623_v50 = vpop.f32.mrb[26].mxu1 }
 0x3fb   : > { %v1721_v7 = vmax.f32 %v1277_v5, 0.0  ;;  %v1785_v45 = vmax.f32 %v1533_v55, 0.0  ;;  %v1280_v63 = vadd.f32 %v2559_v10, %v3977_v3  ;;  %v1536_v33 = vadd.f32 %v2623_v50, %v3977_v3  ;;  %v1271_v47 = vpop.f32.mrb[27].mxu0  ;;  %v1527_v9 = vpop.f32.mrb[27].mxu1 }
 0x3fc   : > { %v1719_v38 = vmax.f32 %v1269_v27, 0.0  ;;  %v1783_v24 = vmax.f32 %v1525_v23, 0.0  ;;  %v1272_v60 = vadd.f32 %v3977_v3, %v1271_v47  ;;  %v1528_v39 = vadd.f32 %v3977_v3, %v1527_v9 }
 0x3fd   : > { %1849 = vst [vmem:[%s3989_s18 + $0xb0] sm:$0xff] %v1721_v7  ;;  %1913 = vst [vmem:[%s3989_s18 + $0x2b0] sm:$0xff] %v1785_v45  ;;  %v1722_v37 = vmax.f32 %v1280_v63, 0.0  ;;  %v1786_v40 = vmax.f32 %v1536_v33, 0.0 }
 0x3fe   : > { %1847 = vst [vmem:[%s3989_s18 + $0xa0] sm:$0xff] %v1719_v38  ;;  %1911 = vst [vmem:[%s3989_s18 + $0x2a0] sm:$0xff] %v1783_v24  ;;  %v1720_v12 = vmax.f32 %v1272_v60, 0.0  ;;  %v1784_v46 = vmax.f32 %v1528_v39, 0.0 }
 0x3ff   : > { %1850 = vst [vmem:[%s3989_s18 + $0xb8] sm:$0xff] %v1722_v37  ;;  %1914 = vst [vmem:[%s3989_s18 + $0x2b8] sm:$0xff] %v1786_v40 }
 0x400   : > { %1848 = vst [vmem:[%s3989_s18 + $0xa8] sm:$0xff] %v1720_v12  ;;  %1912 = vst [vmem:[%s3989_s18 + $0x2a8] sm:$0xff] %v1784_v46  ;;  %v2562_v59 = vpop.f32.mrb[28].mxu0  ;;  %v2626_v53 = vpop.f32.mrb[28].mxu1 }
 0x401   : > { %v1293_v2 = vadd.f32 %v2562_v59, %v3977_v3  ;;  %v1549_v42 = vadd.f32 %v2626_v53, %v3977_v3  ;;  %v1284_v31 = vpop.f32.mrb[29].mxu0  ;;  %v1540_v11 = vpop.f32.mrb[29].mxu1 }
 0x402   : > { %v1285_v14 = vadd.f32 %v3977_v3, %v1284_v31  ;;  %v1541_v52 = vadd.f32 %v3977_v3, %v1540_v11  ;;  %v2563_v26 = vpop.f32.mrb[30].mxu0  ;;  %v2627_v28 = vpop.f32.mrb[30].mxu1 }
 0x403   : > { %v1725_v0 = vmax.f32 %v1293_v2, 0.0  ;;  %v1789_v44 = vmax.f32 %v1549_v42, 0.0  ;;  %v1296_v58 = vadd.f32 %v2563_v26, %v3977_v3  ;;  %v1552_v30 = vadd.f32 %v2627_v28, %v3977_v3  ;;  %v1287_v25 = vpop.f32.mrb[31].mxu0  ;;  %v1543_v17 = vpop.f32.mrb[31].mxu1 }
 0x404   : > { %v1723_v57 = vmax.f32 %v1285_v14, 0.0  ;;  %v1787_v32 = vmax.f32 %v1541_v52, 0.0  ;;  %v1288_v15 = vadd.f32 %v3977_v3, %v1287_v25  ;;  %v1544_v51 = vadd.f32 %v3977_v3, %v1543_v17 }
 0x405   : > { %1853 = vst [vmem:[%s3989_s18 + $0xd0] sm:$0xff] %v1725_v0  ;;  %1917 = vst [vmem:[%s3989_s18 + $0x2d0] sm:$0xff] %v1789_v44  ;;  %v1726_v8 = vmax.f32 %v1296_v58, 0.0  ;;  %v1790_v29 = vmax.f32 %v1552_v30, 0.0 }
 0x406   : > { %1851 = vst [vmem:[%s3989_s18 + $0xc0] sm:$0xff] %v1723_v57  ;;  %1915 = vst [vmem:[%s3989_s18 + $0x2c0] sm:$0xff] %v1787_v32  ;;  %v1724_v22 = vmax.f32 %v1288_v15, 0.0  ;;  %v1788_v20 = vmax.f32 %v1544_v51, 0.0 }
 0x407   : > { %1854 = vst [vmem:[%s3989_s18 + $0xd8] sm:$0xff] %v1726_v8  ;;  %1918 = vst [vmem:[%s3989_s18 + $0x2d8] sm:$0xff] %v1790_v29 }
 0x408   : > { %1852 = vst [vmem:[%s3989_s18 + $0xc8] sm:$0xff] %v1724_v22  ;;  %1916 = vst [vmem:[%s3989_s18 + $0x2c8] sm:$0xff] %v1788_v20  ;;  %v2566_v13 = vpop.f32.mrb[32].mxu0  ;;  %v2630_v4 = vpop.f32.mrb[32].mxu1 }
 0x409   : > { %v1309_v6 = vadd.f32 %v2566_v13, %v3977_v3  ;;  %v1565_v1 = vadd.f32 %v2630_v4, %v3977_v3  ;;  %v1300_v48 = vpop.f32.mrb[33].mxu0  ;;  %v1556_v49 = vpop.f32.mrb[33].mxu1 }
 0x40a   : > { %v1301_v35 = vadd.f32 %v3977_v3, %v1300_v48  ;;  %v1557_v62 = vadd.f32 %v3977_v3, %v1556_v49  ;;  %v2567_v43 = vpop.f32.mrb[34].mxu0  ;;  %v2631_v61 = vpop.f32.mrb[34].mxu1 }
 0x40b   : > { %v1729_v34 = vmax.f32 %v1309_v6, 0.0  ;;  %v1793_v21 = vmax.f32 %v1565_v1, 0.0  ;;  %v1312_v19 = vadd.f32 %v2567_v43, %v3977_v3  ;;  %v1568_v16 = vadd.f32 %v2631_v61, %v3977_v3  ;;  %v1303_v18 = vpop.f32.mrb[35].mxu0  ;;  %v1559_v41 = vpop.f32.mrb[35].mxu1 }
 0x40c   : > { %v1727_v56 = vmax.f32 %v1301_v35, 0.0  ;;  %v1791_v5 = vmax.f32 %v1557_v62, 0.0  ;;  %v1304_v55 = vadd.f32 %v3977_v3, %v1303_v18  ;;  %v1560_v36 = vadd.f32 %v3977_v3, %v1559_v41 }
 0x40d   : > { %1857 = vst [vmem:[%s3989_s18 + $0xf0] sm:$0xff] %v1729_v34  ;;  %1921 = vst [vmem:[%s3989_s18 + $0x2f0] sm:$0xff] %v1793_v21  ;;  %v1730_v54 = vmax.f32 %v1312_v19, 0.0  ;;  %v1794_v27 = vmax.f32 %v1568_v16, 0.0 }
 0x40e   : > { %1855 = vst [vmem:[%s3989_s18 + $0xe0] sm:$0xff] %v1727_v56  ;;  %1919 = vst [vmem:[%s3989_s18 + $0x2e0] sm:$0xff] %v1791_v5  ;;  %v1728_v23 = vmax.f32 %v1304_v55, 0.0  ;;  %v1792_v10 = vmax.f32 %v1560_v36, 0.0 }
 0x40f   : > { %1858 = vst [vmem:[%s3989_s18 + $0xf8] sm:$0xff] %v1730_v54  ;;  %1922 = vst [vmem:[%s3989_s18 + $0x2f8] sm:$0xff] %v1794_v27 }
 0x410   : > { %1856 = vst [vmem:[%s3989_s18 + $0xe8] sm:$0xff] %v1728_v23  ;;  %1920 = vst [vmem:[%s3989_s18 + $0x2e8] sm:$0xff] %v1792_v10  ;;  %v2570_v50 = vpop.f32.mrb[36].mxu0  ;;  %v2634_v7 = vpop.f32.mrb[36].mxu1 }
 0x411   : > { %v1325_v45 = vadd.f32 %v2570_v50, %v3977_v3  ;;  %v1581_v63 = vadd.f32 %v2634_v7, %v3977_v3  ;;  %v1316_v33 = vpop.f32.mrb[37].mxu0  ;;  %v1572_v47 = vpop.f32.mrb[37].mxu1 }
 0x412   : > { %v1317_v9 = vadd.f32 %v3977_v3, %v1316_v33  ;;  %v1573_v38 = vadd.f32 %v3977_v3, %v1572_v47  ;;  %v2571_v24 = vpop.f32.mrb[38].mxu0  ;;  %v2635_v60 = vpop.f32.mrb[38].mxu1 }
 0x413   : > { %v1733_v39 = vmax.f32 %v1325_v45, 0.0  ;;  %v1797_v37 = vmax.f32 %v1581_v63, 0.0  ;;  %v1328_v40 = vadd.f32 %v2571_v24, %v3977_v3  ;;  %v1584_v12 = vadd.f32 %v2635_v60, %v3977_v3  ;;  %v1319_v46 = vpop.f32.mrb[39].mxu0  ;;  %v1575_v59 = vpop.f32.mrb[39].mxu1 }
 0x414   : > { %v1731_v53 = vmax.f32 %v1317_v9, 0.0  ;;  %v1795_v2 = vmax.f32 %v1573_v38, 0.0  ;;  %v1320_v42 = vadd.f32 %v3977_v3, %v1319_v46  ;;  %v1576_v31 = vadd.f32 %v3977_v3, %v1575_v59 }
 0x415   : > { %1861 = vst [vmem:[%s3989_s18 + $0x110] sm:$0xff] %v1733_v39  ;;  %1925 = vst [vmem:[%s3989_s18 + $0x310] sm:$0xff] %v1797_v37  ;;  %v1734_v11 = vmax.f32 %v1328_v40, 0.0  ;;  %v1798_v14 = vmax.f32 %v1584_v12, 0.0 }
 0x416   : > { %1859 = vst [vmem:[%s3989_s18 + $0x100] sm:$0xff] %v1731_v53  ;;  %1923 = vst [vmem:[%s3989_s18 + $0x300] sm:$0xff] %v1795_v2  ;;  %v1732_v52 = vmax.f32 %v1320_v42, 0.0  ;;  %v1796_v26 = vmax.f32 %v1576_v31, 0.0 }
 0x417   : > { %1862 = vst [vmem:[%s3989_s18 + $0x118] sm:$0xff] %v1734_v11  ;;  %1926 = vst [vmem:[%s3989_s18 + $0x318] sm:$0xff] %v1798_v14 }
 0x418   : > { %1860 = vst [vmem:[%s3989_s18 + $0x108] sm:$0xff] %v1732_v52  ;;  %1924 = vst [vmem:[%s3989_s18 + $0x308] sm:$0xff] %v1796_v26  ;;  %v2574_v28 = vpop.f32.mrb[40].mxu0  ;;  %v2638_v0 = vpop.f32.mrb[40].mxu1 }
 0x419   : > { %v1341_v44 = vadd.f32 %v2574_v28, %v3977_v3  ;;  %v1597_v58 = vadd.f32 %v2638_v0, %v3977_v3  ;;  %v1332_v30 = vpop.f32.mrb[41].mxu0  ;;  %v1588_v25 = vpop.f32.mrb[41].mxu1 }
 0x41a   : > { %v1333_v17 = vadd.f32 %v3977_v3, %v1332_v30  ;;  %v1589_v57 = vadd.f32 %v3977_v3, %v1588_v25  ;;  %v2575_v32 = vpop.f32.mrb[42].mxu0  ;;  %v2639_v15 = vpop.f32.mrb[42].mxu1 }
 0x41b   : > { %v1737_v51 = vmax.f32 %v1341_v44, 0.0  ;;  %v1801_v8 = vmax.f32 %v1597_v58, 0.0  ;;  %v1344_v29 = vadd.f32 %v2575_v32, %v3977_v3  ;;  %v1600_v22 = vadd.f32 %v2639_v15, %v3977_v3  ;;  %v1335_v20 = vpop.f32.mrb[43].mxu0  ;;  %v1591_v13 = vpop.f32.mrb[43].mxu1 }
 0x41c   : > { %v1735_v4 = vmax.f32 %v1333_v17, 0.0  ;;  %v1799_v6 = vmax.f32 %v1589_v57, 0.0  ;;  %v1336_v1 = vadd.f32 %v3977_v3, %v1335_v20  ;;  %v1592_v48 = vadd.f32 %v3977_v3, %v1591_v13 }
 0x41d   : > { %1865 = vst [vmem:[%s3989_s18 + $0x130] sm:$0xff] %v1737_v51  ;;  %1929 = vst [vmem:[%s3989_s18 + $0x330] sm:$0xff] %v1801_v8  ;;  %v1738_v49 = vmax.f32 %v1344_v29, 0.0  ;;  %v1802_v35 = vmax.f32 %v1600_v22, 0.0 }
 0x41e   : > { %1863 = vst [vmem:[%s3989_s18 + $0x120] sm:$0xff] %v1735_v4  ;;  %1927 = vst [vmem:[%s3989_s18 + $0x320] sm:$0xff] %v1799_v6  ;;  %v1736_v62 = vmax.f32 %v1336_v1, 0.0  ;;  %v1800_v43 = vmax.f32 %v1592_v48, 0.0 }
 0x41f   : > { %1866 = vst [vmem:[%s3989_s18 + $0x138] sm:$0xff] %v1738_v49  ;;  %1930 = vst [vmem:[%s3989_s18 + $0x338] sm:$0xff] %v1802_v35 }
 0x420   : > { %1864 = vst [vmem:[%s3989_s18 + $0x128] sm:$0xff] %v1736_v62  ;;  %1928 = vst [vmem:[%s3989_s18 + $0x328] sm:$0xff] %v1800_v43  ;;  %v2578_v61 = vpop.f32.mrb[44].mxu0  ;;  %v2642_v34 = vpop.f32.mrb[44].mxu1 }
 0x421   : > { %v1357_v21 = vadd.f32 %v2578_v61, %v3977_v3  ;;  %v1613_v19 = vadd.f32 %v2642_v34, %v3977_v3  ;;  %v1348_v16 = vpop.f32.mrb[45].mxu0  ;;  %v1604_v18 = vpop.f32.mrb[45].mxu1 }
 0x422   : > { %v1349_v41 = vadd.f32 %v3977_v3, %v1348_v16  ;;  %v1605_v56 = vadd.f32 %v3977_v3, %v1604_v18  ;;  %v2579_v5 = vpop.f32.mrb[46].mxu0  ;;  %v2643_v55 = vpop.f32.mrb[46].mxu1 }
 0x423   : > { %v1741_v36 = vmax.f32 %v1357_v21, 0.0  ;;  %v1805_v54 = vmax.f32 %v1613_v19, 0.0  ;;  %v1360_v27 = vadd.f32 %v2579_v5, %v3977_v3  ;;  %v1616_v23 = vadd.f32 %v2643_v55, %v3977_v3  ;;  %v1351_v10 = vpop.f32.mrb[47].mxu0  ;;  %v1607_v50 = vpop.f32.mrb[47].mxu1 }
 0x424   : > { %v1739_v7 = vmax.f32 %v1349_v41, 0.0  ;;  %v1803_v45 = vmax.f32 %v1605_v56, 0.0  ;;  %v1352_v63 = vadd.f32 %v3977_v3, %v1351_v10  ;;  %v1608_v33 = vadd.f32 %v3977_v3, %v1607_v50 }
 0x425   : > { %1869 = vst [vmem:[%s3989_s18 + $0x150] sm:$0xff] %v1741_v36  ;;  %1933 = vst [vmem:[%s3989_s18 + $0x350] sm:$0xff] %v1805_v54  ;;  %v1742_v47 = vmax.f32 %v1360_v27, 0.0  ;;  %v1806_v9 = vmax.f32 %v1616_v23, 0.0 }
 0x426   : > { %1867 = vst [vmem:[%s3989_s18 + $0x140] sm:$0xff] %v1739_v7  ;;  %1931 = vst [vmem:[%s3989_s18 + $0x340] sm:$0xff] %v1803_v45  ;;  %v1740_v38 = vmax.f32 %v1352_v63, 0.0  ;;  %v1804_v24 = vmax.f32 %v1608_v33, 0.0 }
 0x427   : > { %1870 = vst [vmem:[%s3989_s18 + $0x158] sm:$0xff] %v1742_v47  ;;  %1934 = vst [vmem:[%s3989_s18 + $0x358] sm:$0xff] %v1806_v9 }
 0x428   : > { %1868 = vst [vmem:[%s3989_s18 + $0x148] sm:$0xff] %v1740_v38  ;;  %1932 = vst [vmem:[%s3989_s18 + $0x348] sm:$0xff] %v1804_v24  ;;  %v2582_v60 = vpop.f32.mrb[48].mxu0  ;;  %v2646_v39 = vpop.f32.mrb[48].mxu1 }
 0x429   : > { %v1373_v37 = vadd.f32 %v2582_v60, %v3977_v3  ;;  %v1629_v40 = vadd.f32 %v2646_v39, %v3977_v3  ;;  %v1364_v12 = vpop.f32.mrb[49].mxu0  ;;  %v1620_v46 = vpop.f32.mrb[49].mxu1 }
 0x42a   : > { %v1365_v59 = vadd.f32 %v3977_v3, %v1364_v12  ;;  %v1621_v53 = vadd.f32 %v3977_v3, %v1620_v46  ;;  %v2583_v2 = vpop.f32.mrb[50].mxu0  ;;  %v2647_v42 = vpop.f32.mrb[50].mxu1 }
 0x42b   : > { %v1745_v31 = vmax.f32 %v1373_v37, 0.0  ;;  %v1809_v11 = vmax.f32 %v1629_v40, 0.0  ;;  %v1376_v14 = vadd.f32 %v2583_v2, %v3977_v3  ;;  %v1632_v52 = vadd.f32 %v2647_v42, %v3977_v3  ;;  %v1367_v26 = vpop.f32.mrb[51].mxu0  ;;  %v1623_v28 = vpop.f32.mrb[51].mxu1 }
 0x42c   : > { %v1743_v0 = vmax.f32 %v1365_v59, 0.0  ;;  %v1807_v44 = vmax.f32 %v1621_v53, 0.0  ;;  %v1368_v58 = vadd.f32 %v3977_v3, %v1367_v26  ;;  %v1624_v30 = vadd.f32 %v3977_v3, %v1623_v28 }
 0x42d   : > { %1873 = vst [vmem:[%s3989_s18 + $0x170] sm:$0xff] %v1745_v31  ;;  %1937 = vst [vmem:[%s3989_s18 + $0x370] sm:$0xff] %v1809_v11  ;;  %v1746_v25 = vmax.f32 %v1376_v14, 0.0  ;;  %v1810_v17 = vmax.f32 %v1632_v52, 0.0 }
 0x42e   : > { %1871 = vst [vmem:[%s3989_s18 + $0x160] sm:$0xff] %v1743_v0  ;;  %1935 = vst [vmem:[%s3989_s18 + $0x360] sm:$0xff] %v1807_v44  ;;  %v1744_v57 = vmax.f32 %v1368_v58, 0.0  ;;  %v1808_v32 = vmax.f32 %v1624_v30, 0.0 }
 0x42f   : > { %1874 = vst [vmem:[%s3989_s18 + $0x178] sm:$0xff] %v1746_v25  ;;  %1938 = vst [vmem:[%s3989_s18 + $0x378] sm:$0xff] %v1810_v17 }
 0x430   : > { %1872 = vst [vmem:[%s3989_s18 + $0x168] sm:$0xff] %v1744_v57  ;;  %1936 = vst [vmem:[%s3989_s18 + $0x368] sm:$0xff] %v1808_v32  ;;  %v2586_v15 = vpop.f32.mrb[52].mxu0  ;;  %v2650_v51 = vpop.f32.mrb[52].mxu1 }
 0x431   : > { %v1389_v8 = vadd.f32 %v2586_v15, %v3977_v3  ;;  %v1645_v29 = vadd.f32 %v2650_v51, %v3977_v3  ;;  %v1380_v22 = vpop.f32.mrb[53].mxu0  ;;  %v1636_v20 = vpop.f32.mrb[53].mxu1 }
 0x432   : > { %v1381_v13 = vadd.f32 %v3977_v3, %v1380_v22  ;;  %v1637_v4 = vadd.f32 %v3977_v3, %v1636_v20  ;;  %v2587_v6 = vpop.f32.mrb[54].mxu0  ;;  %v2651_v1 = vpop.f32.mrb[54].mxu1 }
 0x433   : > { %v1749_v48 = vmax.f32 %v1389_v8, 0.0  ;;  %v1813_v49 = vmax.f32 %v1645_v29, 0.0  ;;  %v1392_v35 = vadd.f32 %v2587_v6, %v3977_v3  ;;  %v1648_v62 = vadd.f32 %v2651_v1, %v3977_v3  ;;  %v1383_v43 = vpop.f32.mrb[55].mxu0  ;;  %v1639_v61 = vpop.f32.mrb[55].mxu1 }
 0x434   : > { %v1747_v34 = vmax.f32 %v1381_v13, 0.0  ;;  %v1811_v21 = vmax.f32 %v1637_v4, 0.0  ;;  %v1384_v19 = vadd.f32 %v3977_v3, %v1383_v43  ;;  %v1640_v16 = vadd.f32 %v3977_v3, %v1639_v61 }
 0x435   : > { %1877 = vst [vmem:[%s3989_s18 + $0x190] sm:$0xff] %v1749_v48  ;;  %1941 = vst [vmem:[%s3989_s18 + $0x390] sm:$0xff] %v1813_v49  ;;  %v1750_v18 = vmax.f32 %v1392_v35, 0.0  ;;  %v1814_v41 = vmax.f32 %v1648_v62, 0.0 }
 0x436   : > { %1875 = vst [vmem:[%s3989_s18 + $0x180] sm:$0xff] %v1747_v34  ;;  %1939 = vst [vmem:[%s3989_s18 + $0x380] sm:$0xff] %v1811_v21  ;;  %v1748_v56 = vmax.f32 %v1384_v19, 0.0  ;;  %v1812_v5 = vmax.f32 %v1640_v16, 0.0 }
 0x437   : > { %1878 = vst [vmem:[%s3989_s18 + $0x198] sm:$0xff] %v1750_v18  ;;  %1942 = vst [vmem:[%s3989_s18 + $0x398] sm:$0xff] %v1814_v41 }
 0x438   : > { %1876 = vst [vmem:[%s3989_s18 + $0x188] sm:$0xff] %v1748_v56  ;;  %1940 = vst [vmem:[%s3989_s18 + $0x388] sm:$0xff] %v1812_v5  ;;  %v2590_v55 = vpop.f32.mrb[56].mxu0  ;;  %v2654_v36 = vpop.f32.mrb[56].mxu1 }
 0x439   : > { %v1405_v54 = vadd.f32 %v2590_v55, %v3977_v3  ;;  %v1661_v27 = vadd.f32 %v2654_v36, %v3977_v3  ;;  %v1396_v23 = vpop.f32.mrb[57].mxu0  ;;  %v1652_v10 = vpop.f32.mrb[57].mxu1 }
 0x43a   : > { %v1397_v50 = vadd.f32 %v3977_v3, %v1396_v23  ;;  %v1653_v7 = vadd.f32 %v3977_v3, %v1652_v10  ;;  %v2591_v45 = vpop.f32.mrb[58].mxu0  ;;  %v2655_v63 = vpop.f32.mrb[58].mxu1 }
 0x43b   : > { %v1753_v33 = vmax.f32 %v1405_v54, 0.0  ;;  %v1817_v47 = vmax.f32 %v1661_v27, 0.0  ;;  %v1408_v9 = vadd.f32 %v2591_v45, %v3977_v3  ;;  %v1664_v38 = vadd.f32 %v2655_v63, %v3977_v3  ;;  %v1399_v24 = vpop.f32.mrb[59].mxu0  ;;  %v1655_v60 = vpop.f32.mrb[59].mxu1 }
 0x43c   : > { %v1751_v39 = vmax.f32 %v1397_v50, 0.0  ;;  %v1815_v37 = vmax.f32 %v1653_v7, 0.0  ;;  %v1400_v40 = vadd.f32 %v3977_v3, %v1399_v24  ;;  %v1656_v12 = vadd.f32 %v3977_v3, %v1655_v60 }
 0x43d   : > { %1881 = vst [vmem:[%s3989_s18 + $0x1b0] sm:$0xff] %v1753_v33  ;;  %1945 = vst [vmem:[%s3989_s18 + $0x3b0] sm:$0xff] %v1817_v47  ;;  %v1754_v46 = vmax.f32 %v1408_v9, 0.0  ;;  %v1818_v59 = vmax.f32 %v1664_v38, 0.0 }
 0x43e   : > { %1879 = vst [vmem:[%s3989_s18 + $0x1a0] sm:$0xff] %v1751_v39  ;;  %1943 = vst [vmem:[%s3989_s18 + $0x3a0] sm:$0xff] %v1815_v37  ;;  %v1752_v53 = vmax.f32 %v1400_v40, 0.0  ;;  %v1816_v2 = vmax.f32 %v1656_v12, 0.0 }
 0x43f   : > { %1882 = vst [vmem:[%s3989_s18 + $0x1b8] sm:$0xff] %v1754_v46  ;;  %1946 = vst [vmem:[%s3989_s18 + $0x3b8] sm:$0xff] %v1818_v59 }
 0x440   : > { %1880 = vst [vmem:[%s3989_s18 + $0x1a8] sm:$0xff] %v1752_v53  ;;  %1944 = vst [vmem:[%s3989_s18 + $0x3a8] sm:$0xff] %v1816_v2  ;;  %v2594_v42 = vpop.f32.mrb[60].mxu0  ;;  %v2658_v31 = vpop.f32.mrb[60].mxu1 }
 0x441   : > { %v1421_v11 = vadd.f32 %v2594_v42, %v3977_v3  ;;  %v1677_v14 = vadd.f32 %v2658_v31, %v3977_v3  ;;  %v1412_v52 = vpop.f32.mrb[61].mxu0  ;;  %v1668_v26 = vpop.f32.mrb[61].mxu1 }
 0x442   : > { %v1413_v28 = vadd.f32 %v3977_v3, %v1412_v52  ;;  %v1669_v0 = vadd.f32 %v3977_v3, %v1668_v26  ;;  %v2595_v44 = vpop.f32.mrb[62].mxu0  ;;  %v2659_v58 = vpop.f32.mrb[62].mxu1 }
 0x443   : > { %v1757_v30 = vmax.f32 %v1421_v11, 0.0  ;;  %v1821_v25 = vmax.f32 %v1677_v14, 0.0  ;;  %v1424_v17 = vadd.f32 %v2595_v44, %v3977_v3  ;;  %v1680_v57 = vadd.f32 %v2659_v58, %v3977_v3  ;;  %v1415_v32 = vpop.f32.mrb[63].mxu0  ;;  %v1671_v15 = vpop.f32.mrb[63].mxu1 }
 0x444   : > { %v1755_v51 = vmax.f32 %v1413_v28, 0.0  ;;  %v1819_v8 = vmax.f32 %v1669_v0, 0.0  ;;  %v1416_v29 = vadd.f32 %v3977_v3, %v1415_v32  ;;  %v1672_v22 = vadd.f32 %v3977_v3, %v1671_v15 }
 0x445   : > { %1885 = vst [vmem:[%s3989_s18 + $0x1d0] sm:$0xff] %v1757_v30  ;;  %1949 = vst [vmem:[%s3989_s18 + $0x3d0] sm:$0xff] %v1821_v25  ;;  %v1758_v20 = vmax.f32 %v1424_v17, 0.0  ;;  %v1822_v13 = vmax.f32 %v1680_v57, 0.0 }
 0x446   : > { %1883 = vst [vmem:[%s3989_s18 + $0x1c0] sm:$0xff] %v1755_v51  ;;  %1947 = vst [vmem:[%s3989_s18 + $0x3c0] sm:$0xff] %v1819_v8  ;;  %v1756_v4 = vmax.f32 %v1416_v29, 0.0  ;;  %v1820_v6 = vmax.f32 %v1672_v22, 0.0 }
 0x447   : > { %1886 = vst [vmem:[%s3989_s18 + $0x1d8] sm:$0xff] %v1758_v20  ;;  %1950 = vst [vmem:[%s3989_s18 + $0x3d8] sm:$0xff] %v1822_v13 }
 0x448   : > { %1884 = vst [vmem:[%s3989_s18 + $0x1c8] sm:$0xff] %v1756_v4  ;;  %1948 = vst [vmem:[%s3989_s18 + $0x3c8] sm:$0xff] %v1820_v6  ;;  %v2598_v1 = vpop.f32.mrb[64].mxu0  ;;  %v2662_v48 = vpop.f32.mrb[64].mxu1 }
 0x449   : > { %v1437_v49 = vadd.f32 %v2598_v1, %v3977_v3  ;;  %v1693_v35 = vadd.f32 %v2662_v48, %v3977_v3  ;;  %v1428_v62 = vpop.f32.mrb[65].mxu0  ;;  %v1684_v43 = vpop.f32.mrb[65].mxu1 }
 0x44a   : > { %v1429_v61 = vadd.f32 %v3977_v3, %v1428_v62  ;;  %v1685_v34 = vadd.f32 %v3977_v3, %v1684_v43  ;;  %v2599_v21 = vpop.f32.mrb[66].mxu0  ;;  %v2663_v19 = vpop.f32.mrb[66].mxu1 }
 0x44b   : > { %v1761_v16 = vmax.f32 %v1437_v49, 0.0  ;;  %v1825_v18 = vmax.f32 %v1693_v35, 0.0  ;;  %v1440_v41 = vadd.f32 %v2599_v21, %v3977_v3  ;;  %v1696_v56 = vadd.f32 %v2663_v19, %v3977_v3  ;;  %v1431_v5 = vpop.f32.mrb[67].mxu0  ;;  %v1687_v55 = vpop.f32.mrb[67].mxu1 }
 0x44c   : > { %v1759_v36 = vmax.f32 %v1429_v61, 0.0  ;;  %v1823_v54 = vmax.f32 %v1685_v34, 0.0  ;;  %v1432_v27 = vadd.f32 %v3977_v3, %v1431_v5  ;;  %v1688_v23 = vadd.f32 %v3977_v3, %v1687_v55 }
 0x44d   : > { %1889 = vst [vmem:[%s3989_s18 + $0x1f0] sm:$0xff] %v1761_v16  ;;  %1953 = vst [vmem:[%s3989_s18 + $0x3f0] sm:$0xff] %v1825_v18  ;;  %v1762_v10 = vmax.f32 %v1440_v41, 0.0  ;;  %v1826_v50 = vmax.f32 %v1696_v56, 0.0 }
 0x44e   : > { %1887 = vst [vmem:[%s3989_s18 + $0x1e0] sm:$0xff] %v1759_v36  ;;  %1951 = vst [vmem:[%s3989_s18 + $0x3e0] sm:$0xff] %v1823_v54  ;;  %v1760_v7 = vmax.f32 %v1432_v27, 0.0  ;;  %v1824_v45 = vmax.f32 %v1688_v23, 0.0 }
 0x44f   : > { %1890 = vst [vmem:[%s3989_s18 + $0x1f8] sm:$0xff] %v1762_v10  ;;  %1954 = vst [vmem:[%s3989_s18 + $0x3f8] sm:$0xff] %v1826_v50 }
 0x450   : > { %1888 = vst [vmem:[%s3989_s18 + $0x1e8] sm:$0xff] %v1760_v7  ;;  %1952 = vst [vmem:[%s3989_s18 + $0x3e8] sm:$0xff] %v1824_v45 }
 0x451   : > { %2764 = shalt.err (!%p2761_p3)
}
 0x452   : > { %s2765_s14 = scalar_lea.hbm %s4238_s22, 16384  ;;  %s2769_s17 = scalar_lea.hbm %s4298_s7, 32768 }
 0x453   : > { %p2766_p4 = scmp.ne.s32.totalorder %s4238_s22, %s2765_s14  ;;  %p2770_p9 = scmp.lt.u32.totalorder %s4238_s22, %s4298_s7 }
 0x454   : > { %p2771_p10 = scmp.lt.u32.totalorder %s2769_s17, %s2765_s14  ;;  %p2773_p12 = scmp.lt.u32.totalorder %s2765_s14, %s4238_s22 }
 0x455   : > { %p2767_p7 = pnand %p2766_p4, %p2898_p5 }
 0x456   : > { %p2772_p11 = por %p2771_p10, %p2770_p9 }
 0x457   : > { %p2768_p8 = pneg %p2767_p7 }
 0x458   : > { %p2774_p13 = por %p2773_p12, %p2772_p11 }
 0x45a   : > { %p2775_p0 = pnand %p2774_p13, %p2768_p8 }
 0x45c   : > { %2778 = shalt.err (!%p2775_p0)
}
 0x45d   : > { %s2818_s28 = smov 128   ;;  %s2819_s21 = smov 8  }
 0x45e   : > { %2680 = dma.vmem_to_hbm [thread:$0]  (%p2898_p5), %s4240_s20, 16384, %s4238_s22, %s4250_s23, %s2818_s28, %s2818_s28, %s2819_s21  }
 0x45f PF: > { %p2686_p1 = scmp.ge.s32.totalorder %s2813_s27, 2  ;;  %s1984_s29 = sand.u32 1, %s2801_s24  }
 0x460   : > { %s1985_s8 = scalar_lea.sflag [#allocation3], %s1984_s29 }
 0x461   : > { %p2683_p2 = pnand %p2686_p1, %p2902_p6 }
 0x463   : > { %2796 = dma.done.wait (!%p2683_p2), %s1985_s8, 16384  }
 0x464   : > { %2798 = vsyncadd (!%p2683_p2), %s1985_s8, 4294950912  ;;  %p17_p3 = scmp.ge.s32.totalorder %s2885_s30, 4   ;;  %s4627_s24 = smov %s2805_s25 }
 0x465   : > { %s4628_s25 = smov %s2809_s26  ;;  %s4629_s26 = smov %s2896_s10 }
 0x466   : > { %s4630_s27 = smov %s2885_s30  ;;  %19 = sbr.rel (!%p17_p3) target bundleno = 3 (0x3), region = 83 }
 0x46d   :  { %1990 = vsyncpa [#allocation3], 1 }
 0x46e   :  { %1992 = vsyncpa [#allocation3 + $0x1], 1 }

</bundles_post_ra>
